<compile_context>
chip_gen: v6e
topology: v6e:2x2x1
jax: 0.10.0
libtpu: 0.0.40
codegen_flags: <defaults>
</compile_context>

<pallas_src>
import jax
import jax.numpy as jnp
from jax.experimental import pallas as pl
from jax.experimental.pallas import tpu as pltpu

VOCAB = 256 * 2            # nn.Embedding(256 * 2, embedding_dim)
EMBEDDING_DIM = 64
TILE_B = 1024              # max tokens per grid step (tunable; 1024-2048 is a
                           # good range; VMEM use ~3 MiB at 1024)
MIN_TILE = 128             # smallest lane-dense tile (one (8,128)-aligned slab)


def _gather_kernel(idx_ref, tab_t_ref, out_ref):
    """Transposed one-hot MXU gather for one batch tile.

    idx_ref   : VMEM (1, TILE)   int32 -- token indices, lane-major
    tab_t_ref : VMEM (D, VOCAB)  f32   -- transposed table, resident across grid
    out_ref   : VMEM (D, TILE)   f32   -- transposed output slab (lane-dense)
    """
    vocab = tab_t_ref.shape[1]
    tile = idx_ref.shape[1]
    # one_hot_T[c, k] = (idx[k] == c): idx varies along lanes, c along sublanes,
    # so the lane-major index block is used directly (sublane broadcast is free).
    row_ids = jax.lax.broadcasted_iota(jnp.int32, (vocab, tile), 0)
    one_hot_t = (row_ids == idx_ref[...]).astype(tab_t_ref.dtype)   # (V, TILE)
    # (D, V) @ (V, TILE) -> (D, TILE). precision=HIGHEST => bit-exact gather
    # (with a 0/1 operand the multi-pass f32 product reconstructs the table
    # value exactly; a default bf16 pass would truncate it).
    out_ref[...] = jnp.dot(
        tab_t_ref[...], one_hot_t,
        precision=jax.lax.Precision.HIGHEST,
        preferred_element_type=jnp.float32,
    ).astype(out_ref.dtype)


@jax.jit
def _lookup_padded(idx_2d, table):
    """idx_2d: (1, P) int32 (P a multiple of the tile); table: (V, D) f32.

    Returns (P, D) f32. Rows whose index is outside [0, V) are all zeros.
    """
    vocab, dim = table.shape
    p = idx_2d.shape[1]
    tile = min(TILE_B, p)                      # p is always a multiple of tile
    table_t = table.T                          # (D, V); 128 KiB, fused by XLA

    out_t = pl.pallas_call(
        _gather_kernel,
        out_shape=jax.ShapeDtypeStruct((dim, p), table.dtype),
        grid_spec=pltpu.PrefetchScalarGridSpec(
            num_scalar_prefetch=0,
            grid=(p // tile,),
            in_specs=[
                # Lane-major index row: contiguous DMA, tiny VMEM footprint.
                pl.BlockSpec((1, tile), lambda i: (0, i)),
                # Constant block index -> transposed table DMA'd once and kept
                # VMEM-resident across all batch tiles (64*512*4 B = 128 KiB).
                pl.BlockSpec((dim, vocab), lambda i: (0, 0)),
            ],
            # Lane-dense output blocks: last dim = tile (>=128, mult. of 128).
            out_specs=pl.BlockSpec((dim, tile), lambda i: (0, i)),
        ),
        compiler_params=pltpu.CompilerParams(
            dimension_semantics=("parallel",),   # v7x: split batch over 2 TCs
        ),
    )(idx_2d, table_t)
    # Single XLA transpose back to token-major layout (outside the kernel).
    return out_t.T                              # (P, D)


def _bucketed_size(b: int) -> int:
    """Pad B to a power of two (>= MIN_TILE) up to TILE_B, then to multiples
    of TILE_B, so _lookup_padded only recompiles per bucket, not per B."""
    if b <= TILE_B:
        return max(MIN_TILE, int(pl.next_power_of_2(b)))
    return int(pl.cdiv(b, TILE_B)) * TILE_B


def embedding_lookup(indices, table) -> jax.Array:
    """indices: (B,) int; table: (VOCAB, D) f32 -> (B, D) f32.

    Out-of-range indices (outside [0, VOCAB)) return all-zero rows.
    """
    idx = jnp.asarray(indices, dtype=jnp.int32)
    b = int(idx.shape[0])
    vocab, dim = table.shape
    if b == 0:                                  # guard the zero-size-grid case
        return jnp.zeros((0, dim), dtype=table.dtype)

    p = _bucketed_size(b)
    # Pad with -1: never matches any table row -> pad rows come out as zeros.
    idx_2d = jnp.pad(idx.reshape(1, b), ((0, 0), (0, p - b)), constant_values=-1)
    out = _lookup_padded(idx_2d, table)
    return out[:b]                              # un-pad outside jit (cheap slice)


class DynamicEmbedding:
    """JAX/Pallas port of the PyTorch DynamicEmbedding module."""

    def __init__(self, embedding_dim: int = EMBEDDING_DIM, key=None):
        self.embedding_dim = embedding_dim
        if key is None:
            key = jax.random.PRNGKey(0)
        # nn.Embedding default init: N(0, 1)
        self.embeddings = jax.random.normal(
            key, (VOCAB, embedding_dim), dtype=jnp.float32)
        # Host-side dynamic dictionary (stateful Python glue, not a tensor op).
        # TODO(synk): the dict lookup/insertion has no device-side equivalent;
        # it stays on the host exactly as in the PyTorch module.
        self.dictionary = {}

    def _encode(self, ascii_value: int, position: int) -> int:
        encoding = (int(ascii_value) << 1) | int(position)
        if encoding not in self.dictionary:
            if len(self.dictionary) >= VOCAB:
                # PyTorch would raise at lookup time for an index >= VOCAB;
                # we raise eagerly with a clearer message.
                raise ValueError(
                    f"DynamicEmbedding dictionary is full ({VOCAB} entries)")
            self.dictionary[encoding] = len(self.dictionary)
        return self.dictionary[encoding]

    def forward(self, ascii_value: int, position: int) -> jax.Array:
        """Single lookup, same interface as the torch module: (1, embedding_dim).

        Kept for API parity; prefer forward_batch() for throughput (a lone
        token still pays one kernel dispatch on a MIN_TILE-row tile).
        """
        index = jnp.array([self._encode(ascii_value, position)], dtype=jnp.int32)
        return embedding_lookup(index, self.embeddings)

    def forward_batch(self, queries) -> jax.Array:
        """Batched lookups: list of (ascii_value, position) -> (B, embedding_dim)."""
        idx = jnp.array([self._encode(a, p) for a, p in queries], dtype=jnp.int32)
        return embedding_lookup(idx, self.embeddings)

    __call__ = forward


if __name__ == "__main__":
    module = DynamicEmbedding(embedding_dim=EMBEDDING_DIM, key=jax.random.PRNGKey(0))

    queries = [(ord("h"), 0), (ord("e"), 1), (ord("l"), 0), (ord("l"), 1),
               (ord("o"), 0), (ord("!"), 1), (ord("h"), 0), (ord("e"), 1)]

    # Batched path: one pallas_call for all 8 tokens.
    out_batch = module.forward_batch(queries)
    # Single-token path (identical interface to the torch module).
    out_single = module(ord("h"), 0)
    # Medium batch straight through the kernel wrapper (exercises -1 padding
    # and the power-of-two bucketing).
    rand_idx = jax.random.randint(jax.random.PRNGKey(1), (300,), 0, VOCAB,
                                  dtype=jnp.int32)
    out_rand = embedding_lookup(rand_idx, module.embeddings)
    jax.block_until_ready((out_batch, out_single, out_rand))

    # Pure-JAX reference with identical dictionary-order semantics.
    ref_dict = {}
    ref_idx = []
    for a, p in queries:
        enc = (a << 1) | p
        if enc not in ref_dict:
            ref_dict[enc] = len(ref_dict)
        ref_idx.append(ref_dict[enc])
    ref_batch = module.embeddings[jnp.array(ref_idx, dtype=jnp.int32)]
    ref_single = module.embeddings[ref_dict[(ord("h") << 1) | 0]][None, :]
    ref_rand = module.embeddings[rand_idx]

    ok = out_batch.shape == (len(queries), EMBEDDING_DIM)
    ok &= out_single.shape == (1, EMBEDDING_DIM)
    ok &= out_rand.shape == (300, EMBEDDING_DIM)
    ok &= bool(jnp.allclose(out_batch, ref_batch, atol=1e-6))
    ok &= bool(jnp.allclose(out_single, ref_single, atol=1e-6))
    ok &= bool(jnp.allclose(out_rand, ref_rand, atol=1e-6))

    if ok:
        print("KERNEL_OK")
    else:
        raise SystemExit("mismatch vs reference")
</pallas_src>

<mosaic_0001>
module attributes {stable_mosaic.version = 11 : i64} {
  func.func @_gather_kernel(%arg0: i32, %arg1: memref<1x128xi32, #tpu.memory_space<vmem>>, %arg2: memref<64x512xf32, #tpu.memory_space<vmem>>, %arg3: memref<64x128xf32, #tpu.memory_space<vmem>>) attributes {dimension_semantics = [#tpu.dimension_semantics<parallel>], iteration_bounds = array<i64: 1>, scalar_prefetch = 0 : i64, scratch_operands = 0 : i64, tpu.core_type = #tpu.core_type<tc>, window_params = [{transform_indices = @transform_0, window_bounds = array<i64: 1, 128>}, {pipeline_mode = #tpu.pipeline_mode<synchronous>, transform_indices = @transform_1, window_bounds = array<i64: 64, 512>}, {transform_indices = @transform_2, window_bounds = array<i64: 64, 128>}]} {
    %0 = tpu.iota {dimensions = array<i32: 0>} : vector<512x128xi32>
    %c0 = arith.constant 0 : index
    %c0_0 = arith.constant 0 : index
    %1 = vector.load %arg1[%c0, %c0_0] : memref<1x128xi32, #tpu.memory_space<vmem>>, vector<1x128xi32>
    %2 = vector.broadcast %1 : vector<1x128xi32> to vector<512x128xi32>
    %3 = arith.cmpi eq, %0, %2 : vector<512x128xi32>
    %4 = arith.extui %3 : vector<512x128xi1> to vector<512x128xi32>
    %5 = arith.sitofp %4 : vector<512x128xi32> to vector<512x128xf32>
    %c0_1 = arith.constant 0 : index
    %c0_2 = arith.constant 0 : index
    %6 = vector.load %arg2[%c0_1, %c0_2] : memref<64x512xf32, #tpu.memory_space<vmem>>, vector<64x512xf32>
    %cst = arith.constant dense<0.000000e+00> : vector<64x128xf32>
    %7 = tpu.matmul %6, %5, %cst {dimension_numbers = #tpu.dot_dimension_numbers<[1], [0], [0], [1], [0, 0, 1, 1], [], []>, precision = #tpu.contract_precision<fp32>} : vector<64x512xf32>, vector<512x128xf32>, vector<64x128xf32> -> vector<64x128xf32>
    %c0_3 = arith.constant 0 : index
    %c0_4 = arith.constant 0 : index
    %8 = vector.load %arg3[%c0_3, %c0_4] : memref<64x128xf32, #tpu.memory_space<vmem>>, vector<64x128xf32>
    tpu.vector_store %arg3[%c0_3, %c0_4], %7 {strides = array<i32>} : memref<64x128xf32, #tpu.memory_space<vmem>>, vector<64x128xf32>,
    return
  }
  func.func @transform_0(%arg0: i32) -> (i32, i32) {
    %c0_i32 = arith.constant 0 : i32
    %c0_i32_0 = arith.constant 0 : i32
    return %c0_i32, %arg0 : i32, i32
  }
  func.func @transform_1(%arg0: i32) -> (i32, i32) {
    %c0_i32 = arith.constant 0 : i32
    %c0_i32_0 = arith.constant 0 : i32
    %c0_i32_1 = arith.constant 0 : i32
    return %c0_i32, %c0_i32_0 : i32, i32
  }
  func.func @transform_2(%arg0: i32) -> (i32, i32) {
    %c0_i32 = arith.constant 0 : i32
    %c0_i32_0 = arith.constant 0 : i32
    return %c0_i32, %arg0 : i32, i32
  }
}

</mosaic_0001>

<bundles_post_ra>
// kernel: _lookup_padded.1
= control target key start
LH: loop header
LB: loop body
LE: loop exit
PB: predicated region body
PF: predicated region fallthrough
CT: control target
= control target key end

     0   :  { %7 = vsyncpa [#allocation3], 0  ;;  %s6540_s0 = inlined_call_operand.vmem [shape: s32[1,128], index: 0, kind: input, shape index: {}]   ;;  %s6541_s1 = inlined_call_operand.hbm [shape: f32[64,512], index: 1, kind: input, shape index: {}]   ;;  %s6542_s2 = inlined_call_operand.hbm [shape: f32[64,128], index: 2, kind: output, shape index: {}]  }
   0x1   :  { %8 = vsyncpa [#allocation4], 0  ;;  %s3835_s9 = smov [#allocation2]  }
   0x2   :  { %s16_s10 = sshll.u32 %s3835_s9, 4  ;;  %s17_s10 = int_to_ptr.vmem [resolvable:$true] %s16_s10 }
   0x3   :  { %s3799_s11 = scalar_lea.vmem %s17_s10, 4096  ;;  %p3804_p1 = scmp.lt.s32.totalorder %s17_s10, %s17_s10 }
   0x4   :  { %p3800_p0 = scmp.ne.s32.totalorder %s17_s10, %s3799_s11  ;;  %p3805_p2 = scmp.lt.s32.totalorder %s3799_s11, %s3799_s11 }
   0x6   :  { %p3806_p3 = por %p3805_p2, %p3804_p1 }
   0x8   :  { %p3807_p4 = pnand %p3806_p3, %p3800_p0 }
   0xa   :  { %3810 = shalt.err (!%p3807_p4)
}
   0xb   :  { %s3836_s12 = smov 512   ;;  %s3837_s13 = smov 32  }
   0xc   :  { %22 = dma.hbm_to_vmem [thread:$0]  %s6541_s1, 4096, %s17_s10, [#allocation3], %s3836_s12, %s3836_s12, %s3837_s13  }
   0xd   :  { %3831 = dma.done.wait [#allocation3], 4096  }
   0xe   :  { %3832 = vsyncadd [#allocation3], 4294963200  ;;  %v26_v0 = vlaneseq  ;;  %v3902_v14 = vld [vmem:[%s6540_s0] ss:$0 sm:$0xff]  ;;  %v6575_v19 = vmov 1.0   ;;  %v6572_v20 = vmov 0.0  }
  0x10   :  { %v3861_v1 = vshrl.u32 %v26_v0, 7 }
  0x12   :  { %6879 = vst [vmem:[#allocation8_spill] sm:$0xff] %v3861_v1  ;;  %v3864_v2 = vadd.s32 248, %v3861_v1  ;;  %v3867_v3 = vadd.s32 120, %v3861_v1  ;;  %v3870_v4 = vadd.s32 240, %v3861_v1  ;;  %v3873_v5 = vadd.s32 112, %v3861_v1 }
  0x13   :  { %v3876_v6 = vadd.s32 232, %v3861_v1  ;;  %v3879_v7 = vadd.s32 104, %v3861_v1  ;;  %v3882_v8 = vadd.s32 224, %v3861_v1  ;;  %v3885_v9 = vadd.s32 96, %v3861_v1 }
  0x14   :  { %v3888_v10 = vadd.s32 216, %v3861_v1  ;;  %v3891_v11 = vadd.s32 88, %v3861_v1  ;;  %v3894_v12 = vadd.s32 208, %v3861_v1  ;;  %v3897_v13 = vadd.s32 80, %v3861_v1 }
  0x15   :  { %v3905_v15 = vadd.s32 200, %v3861_v1  ;;  %v3908_v16 = vadd.s32 72, %v3861_v1  ;;  %v3911_v17 = vadd.s32 192, %v3861_v1  ;;  %v3914_v18 = vadd.s32 64, %v3861_v1 }
  0x16   :  { %vm127_vm0 = vcmp.eq.s32.totalorder %v3864_v2, %v3902_v14  ;;  %vm111_vm1 = vcmp.eq.s32.totalorder %v3867_v3, %v3902_v14  ;;  %vm126_vm2 = vcmp.eq.s32.totalorder %v3870_v4, %v3902_v14  ;;  %vm110_vm3 = vcmp.eq.s32.totalorder %v3873_v5, %v3902_v14 }
  0x17   :  { %6880 = vst [vmem:[#allocation9_spill] sm:$0xff] %v3905_v15  ;;  %6881 = vst [vmem:[#allocation10_spill] sm:$0xff] %v3908_v16  ;;  %3110 = vmatprep.subr.msk.mxu0 %vm127_vm0, %v6575_v19  ;;  %v2884_v21 = vsel %vm126_vm2, 1.0, %v6572_v20  ;;  %v2868_v22 = vsel %vm110_vm3, 1.0, %v6572_v20  ;;  %vm125_vm4 = vcmp.eq.s32.totalorder %v3876_v6, %v3902_v14  ;;  %vm109_vm5 = vcmp.eq.s32.totalorder %v3879_v7, %v3902_v14 }
  0x18   :  { %6882 = vst [vmem:[#allocation11_spill] sm:$0xff] %v3911_v17  ;;  %6883 = vst [vmem:[#allocation12_spill] sm:$0xff] %v3914_v18  ;;  %3111 = vmatpush3.msk.msra.mxu0 %vm111_vm1, %v6575_v19  ;;  %v3944_v23 = vsub.f32 %v2884_v21, %v2884_v21  ;;  %v3946_v24 = vsub.f32 %v2868_v22, %v2868_v22  ;;  %v2883_v25 = vsel %vm125_vm4, 1.0, %v6572_v20  ;;  %v2867_v26 = vsel %vm109_vm5, 1.0, %v6572_v20 }
  0x19   :  { %3112 = vmatprep.subr.msk.mxu0 %vm126_vm2, %v6575_v19  ;;  %v3960_v27 = vsub.f32 %v2883_v25, %v2883_v25  ;;  %v3962_v28 = vsub.f32 %v2867_v26, %v2867_v26  ;;  %vm124_vm6 = vcmp.eq.s32.totalorder %v3882_v8, %v3902_v14  ;;  %vm108_vm7 = vcmp.eq.s32.totalorder %v3885_v9, %v3902_v14 }
  0x1a   :  { %6884 = vst [vmem:[#allocation13_spill] sm:$0xff] %v3944_v23  ;;  %6885 = vst [vmem:[#allocation14_spill] sm:$0xff] %v3946_v24  ;;  %3113 = vmatpush3.msk.msra.mxu0 %vm110_vm3, %v6575_v19  ;;  %v2882_v29 = vsel %vm124_vm6, 1.0, %v6572_v20  ;;  %v2866_v30 = vsel %vm108_vm7, 1.0, %v6572_v20  ;;  %vm123_vm8 = vcmp.eq.s32.totalorder %v3888_v10, %v3902_v14  ;;  %vm107_vm9 = vcmp.eq.s32.totalorder %v3891_v11, %v3902_v14 }
  0x1b   :  { %3114 = vmatprep.subr.msk.mxu0 %vm125_vm4, %v6575_v19  ;;  %v3988_v31 = vsub.f32 %v2882_v29, %v2882_v29  ;;  %v3990_v32 = vsub.f32 %v2866_v30, %v2866_v30  ;;  %v2881_v33 = vsel %vm123_vm8, 1.0, %v6572_v20  ;;  %v2865_v34 = vsel %vm107_vm9, 1.0, %v6572_v20 }
  0x1c   :  { %3115 = vmatpush3.msk.msra.mxu0 %vm109_vm5, %v6575_v19  ;;  %v4004_v35 = vsub.f32 %v2881_v33, %v2881_v33  ;;  %v4006_v36 = vsub.f32 %v2865_v34, %v2865_v34  ;;  %v2885_v37 = vsel %vm127_vm0, 1.0, %v6572_v20  ;;  %vm6687_vm10 = vcmp.eq.s32.totalorder %v3894_v12, %v3902_v14 }
  0x1d   :  { %3116 = vmatprep.subr.msk.mxu0 %vm124_vm6, %v6575_v19  ;;  %v4018_v38 = vsub.f32 %v2885_v37, %v2885_v37  ;;  %v2880_v39 = vsel %vm6687_vm10, 1.0, %v6572_v20  ;;  %v2869_v40 = vsel %vm111_vm1, 1.0, %v6572_v20  ;;  %vm6681_vm11 = vcmp.eq.s32.totalorder %v3897_v13, %v3902_v14 }
  0x1e   :  { %3117 = vmatpush3.msk.msra.mxu0 %vm108_vm7, %v6575_v19  ;;  %v4034_v41 = vsub.f32 %v2880_v39, %v2880_v39  ;;  %v4036_v42 = vsub.f32 %v2869_v40, %v2869_v40  ;;  %v2864_v43 = vsel %vm6681_vm11, 1.0, %v6572_v20  ;;  %v6564_v44 = vand.u32 4294901760, %v3944_v23 }
  0x1f   :  { %6886 = vst [vmem:[#allocation15_spill] sm:$0xff] %v4018_v38  ;;  %3118 = vmatprep.subr.msk.mxu0 %vm123_vm8, %v6575_v19  ;;  %v6566_v45 = vand.u32 4294901760, %v4018_v38  ;;  %v4048_v46 = vsub.f32 %v2864_v43, %v2864_v43  ;;  %vm6694_vm12 = vcmp.eq.s32.totalorder %v3905_v15, %v3902_v14  ;;  %v6560_v47 = vand.u32 4294901760, %v3946_v24  ;;  %v297_v15 = vld [vmem:[#allocation2 + $0x48] sm:$0xff] }
  0x20   :  { %3119 = vmatpush3.msk.msra.mxu0 %vm107_vm9, %v6575_v19  ;;  %v6565_v48 = vand.u32 4294901760, %v4036_v42  ;;  %v660_v49 = vsub.f32 %v3944_v23, %v6564_v44  ;;  %v2879_v50 = vsel %vm6694_vm12, 1.0, %v6572_v20  ;;  %vm6548_vm13 = vcmp.eq.s32.totalorder %v3908_v16, %v3902_v14 }
  0x21   :  { %v653_v51 = vsub.f32 %v4018_v38, %v6566_v45  ;;  %3120 = vmatprep.subr.msk.mxu0 %vm6687_vm10, %v6575_v19  ;;  %v4074_v52 = vsub.f32 %v2879_v50, %v2879_v50  ;;  %v548_v53 = vsub.f32 %v3946_v24, %v6560_v47  ;;  %v2863_v54 = vsel %vm6548_vm13, 1.0, %v6572_v20 }
  0x22   :  { %v541_v55 = vsub.f32 %v4036_v42, %v6565_v48  ;;  %3121 = vmatpush3.msk.msra.mxu0 %vm6681_vm11, %v6575_v19  ;;  %v661_v56 = vand.u32 4294901760, %v660_v49  ;;  %v4090_v57 = vsub.f32 %v2863_v54, %v2863_v54  ;;  %v6558_v58 = vand.u32 4294901760, %v3960_v27 }
  0x23   :  { %v654_v59 = vand.u32 4294901760, %v653_v51  ;;  %3122 = vmatprep.subr.msk.mxu0 %vm6694_vm12, %v6575_v19  ;;  %v549_v60 = vand.u32 4294901760, %v548_v53  ;;  %vm6544_vm14 = vcmp.eq.s32.totalorder %v3911_v17, %v3902_v14  ;;  %v6557_v61 = vand.u32 4294901760, %v3962_v28 }
  0x24   :  { %v542_v62 = vand.u32 4294901760, %v541_v55  ;;  %3123 = vmatpush3.msk.msra.mxu0 %vm6548_vm13, %v6575_v19  ;;  %v667_v63 = vsub.f32 %v3960_v27, %v6558_v58  ;;  %v2878_v0 = vsel %vm6544_vm14, 1.0, %v6572_v20  ;;  %vm6543_vm15 = vcmp.eq.s32.totalorder %v3914_v18, %v3902_v14  ;;  %v292_v18 = vld [vmem:[#allocation2 + $0x20] sm:$0xff] }
  0x25   :  { %3166 = vmatprep.subr.mxu1 %v654_v59  ;;  %3124 = vmatprep.subr.msk.mxu0 %vm6544_vm14, %v6575_v19  ;;  %v4117_v21 = vsub.f32 %v2878_v0, %v2878_v0  ;;  %v555_v22 = vsub.f32 %v3962_v28, %v6557_v61  ;;  %v2862_v25 = vsel %vm6543_vm15, 1.0, %v6572_v20  ;;  %v6556_v26 = vand.u32 4294901760, %v3988_v31 }
  0x26   :  { %3167 = vmatpush3.msra.mxu1 %v542_v62  ;;  %v668_v29 = vand.u32 4294901760, %v667_v63  ;;  %3125 = vmatpush3.msk.msra.mxu0 %vm6543_vm15, %v6575_v19  ;;  %v4131_v30 = vsub.f32 %v2862_v25, %v2862_v25  ;;  %v4134_v33 = vadd.s32 184, %v3861_v1  ;;  %v6552_v34 = vand.u32 4294901760, %v3990_v32 }
  0x27   :  { %3168 = vmatprep.subr.mxu1 %v661_v56  ;;  %v556_v37 = vand.u32 4294901760, %v555_v22  ;;  %v674_v39 = vsub.f32 %v3988_v31, %v6556_v26  ;;  %v4141_v40 = vadd.s32 56, %v3861_v1  ;;  %v6551_v43 = vand.u32 4294901760, %v4004_v35 }
  0x28   :  { %6887 = vst [vmem:[#allocation16_spill] sm:$0xff] %v4134_v33  ;;  %3169 = vmatpush3.msra.mxu1 %v549_v60  ;;  %vm6545_vm15 = vcmp.eq.s32.totalorder %v4134_v33, %v3902_v14  ;;  %v562_v49 = vsub.f32 %v3990_v32, %v6552_v34  ;;  %v4150_v50 = vadd.s32 176, %v3861_v1  ;;  %v6550_v51 = vand.u32 4294901760, %v4006_v36 }
  0x29   :  { %6888 = vst [vmem:[#allocation17_spill] sm:$0xff] %v4141_v40  ;;  %3170 = vmatprep.subr.mxu1 %v668_v29  ;;  %v675_v53 = vand.u32 4294901760, %v674_v39  ;;  %v2877_v54 = vsel %vm6545_vm15, 1.0, %v6572_v20  ;;  %3126 = vmatprep.subr.msk.mxu0 %vm6545_vm15, %v6575_v19  ;;  %vm6547_vm14 = vcmp.eq.s32.totalorder %v4141_v40, %v3902_v14  ;;  %v681_v55 = vsub.f32 %v4004_v35, %v6551_v43 }
  0x2a   :  { %6889 = vst [vmem:[#allocation18_spill] sm:$0xff] %v4150_v50  ;;  %3171 = vmatpush3.msra.mxu1 %v556_v37  ;;  %v4166_v56 = vsub.f32 %v2877_v54, %v2877_v54  ;;  %v563_v59 = vand.u32 4294901760, %v562_v49  ;;  %v2861_v60 = vsel %vm6547_vm14, 1.0, %v6572_v20  ;;  %3127 = vmatpush3.msk.msra.mxu0 %vm6547_vm14, %v6575_v19  ;;  %vm6546_vm15 = vcmp.eq.s32.totalorder %v4150_v50, %v3902_v14 }
  0x2b   :  { %3172 = vmatprep.subr.mxu1 %v675_v53  ;;  %v4178_v62 = vsub.f32 %v2861_v60, %v2861_v60  ;;  %v682_v63 = vand.u32 4294901760, %v681_v55  ;;  %v2876_v0 = vsel %vm6546_vm15, 1.0, %v6572_v20  ;;  %3128 = vmatprep.subr.msk.mxu0 %vm6546_vm15, %v6575_v19  ;;  %v569_v22 = vsub.f32 %v4006_v36, %v6550_v51 }
  0x2c   :  { %3173 = vmatpush3.msra.mxu1 %v563_v59  ;;  %v4191_v25 = vsub.f32 %v2876_v0, %v2876_v0  ;;  %v4194_v29 = vadd.s32 48, %v3861_v1  ;;  %v6549_v37 = vand.u32 4294901760, %v4034_v41  ;;  %v4198_v39 = vadd.s32 168, %v3861_v1 }
  0x2d   :  { %3174 = vmatprep.subr.mxu1 %v682_v63  ;;  %v570_v49 = vand.u32 4294901760, %v569_v22  ;;  %v6555_v53 = vand.u32 4294901760, %v4048_v46  ;;  %v4202_v54 = vadd.s32 40, %v3861_v1  ;;  %v6554_v55 = vand.u32 4294901760, %v4074_v52 }
  0x2e   :  { %6890 = vst [vmem:[#allocation19_spill] sm:$0xff] %v4194_v29  ;;  %6891 = vst [vmem:[#allocation20_spill] sm:$0xff] %v4198_v39  ;;  %vm6579_vm15 = vcmp.eq.s32.totalorder %v4194_v29, %v3902_v14  ;;  %v688_v59 = vsub.f32 %v4034_v41, %v6549_v37  ;;  %vm6553_vm14 = vcmp.eq.s32.totalorder %v4198_v39, %v3902_v14  ;;  %v4213_v60 = vadd.s32 160, %v3861_v1  ;;  %v288_v29 = vld [vmem:[#allocation2] sm:$0xff] }
  0x2f   :  { %6892 = vst [vmem:[#allocation21_spill] sm:$0xff] %v4202_v54  ;;  %3175 = vmatpush3.msra.mxu1 %v570_v49  ;;  %v2860_v63 = vsel %vm6579_vm15, 1.0, %v6572_v20  ;;  %3129 = vmatpush3.msk.msra.mxu0 %vm6579_vm15, %v6575_v19  ;;  %v2875_v0 = vsel %vm6553_vm14, 1.0, %v6572_v20  ;;  %v576_v22 = vsub.f32 %v4048_v46, %v6555_v53  ;;  %vm6561_vm13 = vcmp.eq.s32.totalorder %v4202_v54, %v3902_v14 }
  0x30   :  { %6893 = vst [vmem:[#allocation22_spill] sm:$0xff] %v4213_v60  ;;  %v4232_v49 = vsub.f32 %v2860_v63, %v2860_v63  ;;  %v689_v37 = vand.u32 4294901760, %v688_v59  ;;  %3130 = vmatprep.subr.msk.mxu0 %vm6553_vm14, %v6575_v19  ;;  %v4238_v51 = vsub.f32 %v2875_v0, %v2875_v0  ;;  %v2859_v43 = vsel %vm6561_vm13, 1.0, %v6572_v20 }
  0x31   :  { %v577_v34 = vand.u32 4294901760, %v576_v22  ;;  %3131 = vmatpush3.msk.msra.mxu0 %vm6561_vm13, %v6575_v19  ;;  %v4248_v63 = vsub.f32 %v2859_v43, %v2859_v43  ;;  %v695_v59 = vsub.f32 %v4074_v52, %v6554_v55  ;;  %vm6559_vm14 = vcmp.eq.s32.totalorder %v4213_v60, %v3902_v14  ;;  %v289_v60 = vld [vmem:[#allocation2 + $0x8] sm:$0xff] }
  0x32   :  { %3176 = vmatprep.subr.mxu1 %v689_v37  ;;  %v2874_v0 = vsel %vm6559_vm14, 1.0, %v6572_v20  ;;  %3132 = vmatprep.subr.msk.mxu0 %vm6559_vm14, %v6575_v19  ;;  %v6563_v43 = vand.u32 4294901760, %v4090_v57  ;;  %v4265_v22 = vadd.s32 32, %v3861_v1  ;;  %v6562_v55 = vand.u32 4294901760, %v4117_v21 }
  0x33   :  { %6894 = vst [vmem:[#allocation23_spill] sm:$0xff] %v4248_v63  ;;  %3177 = vmatpush3.msra.mxu1 %v577_v34  ;;  %v696_v53 = vand.u32 4294901760, %v695_v59  ;;  %v4268_v37 = vsub.f32 %v2874_v0, %v2874_v0  ;;  %v4271_v26 = vadd.s32 152, %v3861_v1  ;;  %v6571_v61 = vand.u32 4294901760, %v4131_v30 }
  0x34   :  { %6895 = vst [vmem:[#allocation24_spill] sm:$0xff] %v4265_v22  ;;  %v583_v58 = vsub.f32 %v4090_v57, %v6563_v43  ;;  %vm6569_vm14 = vcmp.eq.s32.totalorder %v4265_v22, %v3902_v14  ;;  %v702_v47 = vsub.f32 %v4117_v21, %v6562_v55  ;;  %v4283_v34 = vadd.s32 24, %v3861_v1 }
  0x35   :  { %6896 = vst [vmem:[#allocation25_spill] sm:$0xff] %v4268_v37  ;;  %6897 = vst [vmem:[#allocation26_spill] sm:$0xff] %v4271_v26  ;;  %3178 = vmatprep.subr.mxu1 %v696_v53  ;;  %v2858_v59 = vsel %vm6569_vm14, 1.0, %v6572_v20  ;;  %3133 = vmatpush3.msk.msra.mxu0 %vm6569_vm14, %v6575_v19  ;;  %vm6577_vm13 = vcmp.eq.s32.totalorder %v4271_v26, %v3902_v14  ;;  %v590_v0 = vsub.f32 %v4131_v30, %v6571_v61  ;;  %v6905_v61 = vmov 1.0  }
  0x36   :  { %6898 = vst [vmem:[#allocation27_spill] sm:$0xff] %v4283_v34  ;;  %v6570_v55 = vand.u32 4294901760, %v4166_v56  ;;  %v584_v53 = vand.u32 4294901760, %v583_v58  ;;  %v4299_v43 = vsub.f32 %v2858_v59, %v2858_v59  ;;  %v703_v44 = vand.u32 4294901760, %v702_v47  ;;  %3134 = vmatprep.subr.msk.mxu0 %vm6577_vm13, %v6575_v19 }
  0x37   :  { %v2873_v48 = vsel %vm6577_vm13, 1.0, %v6572_v20  ;;  %v591_v22 = vand.u32 4294901760, %v590_v0  ;;  %vm6574_vm14 = vcmp.eq.s32.totalorder %v4283_v34, %v3902_v14  ;;  %v6578_v59 = vand.u32 4294901760, %v4178_v62 }
  0x38   :  { %6899 = vst [vmem:[#allocation28_spill] sm:$0xff] %v4299_v43  ;;  %v4309_v45 = vsub.f32 %v2873_v48, %v2873_v48  ;;  %v709_v47 = vsub.f32 %v4166_v56, %v6570_v55  ;;  %3179 = vmatpush3.msra.mxu1 %v584_v53  ;;  %v2857_v58 = vsel %vm6574_vm14, 1.0, %v6572_v20  ;;  %3135 = vmatpush3.msk.msra.mxu0 %vm6574_vm14, %v6575_v19  ;;  %v4325_v48 = vadd.s32 144, %v3861_v1 }
  0x39   :  { %v4329_v0 = vadd.s32 16, %v3861_v1  ;;  %3180 = vmatprep.subr.mxu1 %v703_v44  ;;  %v4331_v53 = vsub.f32 %v2857_v58, %v2857_v58  ;;  %v4335_v20 = vadd.s32 136, %v3861_v1  ;;  %v597_v19 = vsub.f32 %v4178_v62, %v6578_v59 }
  0x3a   :  { %6900 = vst [vmem:[#allocation29_spill] sm:$0xff] %v4309_v45  ;;  %6901 = vst [vmem:[#allocation30_spill] sm:$0xff] %v4325_v48  ;;  %v710_v55 = vand.u32 4294901760, %v709_v47  ;;  %3181 = vmatpush3.msra.mxu1 %v591_v22  ;;  %vm6596_vm14 = vcmp.eq.s32.totalorder %v4325_v48, %v3902_v14  ;;  %v6904_v47 = vmov 0.0   ;;  %v6906_v59 = vand.u32 4294901760, %v4191_v25 }
  0x3b   :  { %6902 = vst [vmem:[#allocation31_spill] sm:$0xff] %v4329_v0  ;;  %6903 = vst [vmem:[#allocation32_spill] sm:$0xff] %v4335_v20  ;;  %vm6595_vm13 = vcmp.eq.s32.totalorder %v4329_v0, %v3902_v14  ;;  %v2872_v58 = vsel %vm6596_vm14, 1.0, %v6904_v47  ;;  %3136 = vmatprep.subr.msk.mxu0 %vm6596_vm14, %v6905_v61  ;;  %vm6594_vm15 = vcmp.eq.s32.totalorder %v4335_v20, %v3902_v14  ;;  %v598_v34 = vand.u32 4294901760, %v597_v19 }
  0x3c   :  { %3182 = vmatprep.subr.mxu1 %v710_v55  ;;  %v2856_v22 = vsel %vm6595_vm13, 1.0, %v6904_v47  ;;  %v716_v44 = vsub.f32 %v4191_v25, %v6906_v59  ;;  %v4362_v55 = vsub.f32 %v2872_v58, %v2872_v58  ;;  %3137 = vmatpush3.msk.msra.mxu0 %vm6595_vm13, %v6905_v61  ;;  %v2871_v26 = vsel %vm6594_vm15, 1.0, %v6904_v47 }
  0x3d   :  { %v4368_v48 = vsub.f32 %v2856_v22, %v2856_v22  ;;  %3138 = vmatprep.subr.msk.mxu0 %vm6594_vm15, %v6905_v61  ;;  %v4378_v19 = vsub.f32 %v2871_v26, %v2871_v26  ;;  %v6910_v58 = vand.u32 4294901760, %v4232_v49  ;;  %v4384_v22 = vadd.s32 8, %v3861_v1  ;;  %3183 = vmatpush3.msra.mxu1 %v598_v34 }
  0x3e   :  { %6907 = vst [vmem:[#allocation33_spill] sm:$0xff] %v4362_v55  ;;  %v717_v59 = vand.u32 4294901760, %v716_v44  ;;  %v6605_v54 = vand.u32 4294901760, %v4238_v51  ;;  %v4388_v39 = vadd.s32 128, %v3861_v1  ;;  %vm96_vm15 = vcmp.eq.s32.totalorder %v3861_v1, %v3902_v14 }
  0x3f   :  { %6908 = vst [vmem:[#allocation34_spill] sm:$0xff] %v4368_v48  ;;  %6909 = vst [vmem:[#allocation35_spill] sm:$0xff] %v4378_v19  ;;  %v604_v0 = vsub.f32 %v4232_v49, %v6910_v58  ;;  %vm97_vm13 = vcmp.eq.s32.totalorder %v4384_v22, %v3902_v14  ;;  %v2854_v34 = vsel %vm96_vm15, 1.0, %v6904_v47  ;;  %v4399_v58 = vand.u32 4294901760, %v289_v60 }
  0x40   :  { %6911 = vst [vmem:[#allocation36_spill] sm:$0xff] %v4384_v22  ;;  %6912 = vst [vmem:[#allocation37_spill] sm:$0xff] %v4388_v39  ;;  %3184 = vmatprep.subr.mxu1 %v717_v59  ;;  %v2855_v44 = vsel %vm97_vm13, 1.0, %v6904_v47  ;;  %3139 = vmatpush3.msk.msra.mxu0 %vm97_vm13, %v6905_v61  ;;  %vm112_vm14 = vcmp.eq.s32.totalorder %v4388_v39, %v3902_v14  ;;  %v6914_v59 = vand.u32 4294901760, %v4248_v63  ;;  %v4441_v39 = vand.u32 4294901760, %v288_v29 }
  0x41   :  { %v605_v26 = vand.u32 4294901760, %v604_v0  ;;  %6913 = vst [vmem:[#allocation38_spill] sm:$0xff] %v4399_v58  ;;  %v723_v0 = vsub.f32 %v4238_v51, %v6605_v54  ;;  %v4417_v50 = vsub.f32 %v2855_v44, %v2855_v44  ;;  %v2870_v22 = vsel %vm112_vm14, 1.0, %v6904_v47  ;;  %3140 = vmatprep.subr.msk.mxu0 %vm112_vm14, %v6905_v61  ;;  %762 = vmatprep.mubr.f32.mxu1 %v4399_v58 }
  0x42   :  { %v611_v20 = vsub.f32 %v4248_v63, %v6914_v59  ;;  %v4427_v54 = vsub.f32 %v2854_v34, %v2854_v34  ;;  %v4430_v40 = vsub.f32 %v289_v60, %v4399_v58  ;;  %v293_v59 = vld [vmem:[#allocation2 + $0x28] sm:$0xff]  ;;  %3141 = vmatpush3.msk.msra.mxu0 %vm96_vm15, %v6905_v61  ;;  %v6618_v47 = vand.u32 4294901760, %v4268_v37  ;;  %6919 = vst [vmem:[#allocation43_spill] sm:$0xff] %v4441_v39 }
  0x43   :  { %3185 = vmatpush3.msra.mxu1 %v605_v26  ;;  %6915 = vst [vmem:[#allocation39_spill] sm:$0xff] %v4417_v50  ;;  %v724_v33 = vand.u32 4294901760, %v723_v0  ;;  %v4432_v26 = vsub.f32 %v2870_v22, %v2870_v22  ;;  %3222 = vmatprep.subr.mxu0 %v4018_v38  ;;  %v4450_v1 = vand.u32 4294901760, %v293_v59  ;;  %v4457_v38 = vsub.f32 %v288_v29, %v4441_v39 }
  0x44   :  { %6916 = vst [vmem:[#allocation40_spill] sm:$0xff] %v4427_v54  ;;  %6917 = vst [vmem:[#allocation41_spill] sm:$0xff] %v4430_v40  ;;  %v612_v44 = vand.u32 4294901760, %v611_v20  ;;  %v6625_v34 = vand.u32 4294901760, %v4430_v40  ;;  %v730_v20 = vsub.f32 %v4268_v37, %v6618_v47  ;;  %v6923_v47 = vand.u32 4294901760, %v4309_v45 }
  0x45   :  { %6918 = vst [vmem:[#allocation42_spill] sm:$0xff] %v4432_v26  ;;  %3186 = vmatprep.subr.mxu1 %v724_v33  ;;  %6920 = vst [vmem:[#allocation44_spill] sm:$0xff] %v4450_v1  ;;  %v6922_v33 = vand.u32 4294901760, %v4299_v43  ;;  %v6924_v58 = vand.u32 4294901760, %v4331_v53  ;;  %v4469_v16 = vsub.f32 %v293_v59, %v4450_v1  ;;  %v6926_v29 = vand.u32 4294901760, %v4362_v55 }
  0x46   :  { %3187 = vmatpush3.msra.mxu1 %v612_v44  ;;  %v419_v60 = vsub.f32 %v4430_v40, %v6625_v34  ;;  %6921 = vst [vmem:[#allocation45_spill] sm:$0xff] %v4457_v38  ;;  %v737_v0 = vsub.f32 %v4309_v45, %v6923_v47  ;;  %v731_v17 = vand.u32 4294901760, %v730_v20  ;;  %v4476_v63 = vand.u32 4294901760, %v292_v18 }
  0x47   :  { %v618_v22 = vsub.f32 %v4299_v43, %v6922_v33  ;;  %v625_v44 = vsub.f32 %v4331_v53, %v6924_v58  ;;  %6925 = vst [vmem:[#allocation46_spill] sm:$0xff] %v4469_v16  ;;  %v744_v34 = vsub.f32 %v4362_v55, %v6926_v29  ;;  %v6639_v33 = vand.u32 4294901760, %v4457_v38 }
  0x48   :  { %v420_v40 = vand.u32 4294901760, %v419_v60  ;;  %v738_v37 = vand.u32 4294901760, %v737_v0  ;;  %3188 = vmatprep.subr.mxu1 %v731_v17  ;;  %v6638_v20 = vand.u32 4294901760, %v4469_v16  ;;  %6927 = vst [vmem:[#allocation47_spill] sm:$0xff] %v4476_v63  ;;  %v6640_v59 = vand.u32 4294901760, %v4368_v48 }
  0x49   :  { %v619_v43 = vand.u32 4294901760, %v618_v22  ;;  %v626_v47 = vand.u32 4294901760, %v625_v44  ;;  %v745_v45 = vand.u32 4294901760, %v744_v34  ;;  %v425_v58 = vsub.f32 %v4457_v38, %v6639_v33  ;;  %v296_v44 = vld [vmem:[#allocation2 + $0x40] sm:$0xff]  ;;  %v305_v38 = vld [vmem:[#allocation2 + $0x88] sm:$0xff] }
  0x4a   :  { %421 = vmatprep.mubr.f32.mxu0 %v420_v40  ;;  %v6645_v60 = vand.u32 4294901760, %v4378_v19  ;;  %v6652_v22 = vand.u32 4294901760, %v4417_v50  ;;  %v434_v17 = vsub.f32 %v4469_v16, %v6638_v20  ;;  %v4488_v34 = vsub.f32 %v292_v18, %v4476_v63  ;;  %v300_v16 = vld [vmem:[#allocation2 + $0x60] sm:$0xff] }
  0x4b   :  { %3189 = vmatpush3.msra.mxu1 %v619_v43  ;;  %v4490_v40 = vand.u32 4294901760, %v297_v15  ;;  %v426_v43 = vand.u32 4294901760, %v425_v58  ;;  %v632_v29 = vsub.f32 %v4368_v48, %v6640_v59  ;;  %v301_v59 = vld [vmem:[#allocation2 + $0x68] sm:$0xff]  ;;  %v4509_v55 = vand.u32 4294901760, %v296_v44 }
  0x4c   :  { %3190 = vmatprep.subr.mxu1 %v738_v37  ;;  %6928 = vst [vmem:[#allocation48_spill] sm:$0xff] %v4488_v34  ;;  %v751_v37 = vsub.f32 %v4378_v19, %v6645_v60  ;;  %v639_v18 = vsub.f32 %v4417_v50, %v6652_v22  ;;  %v435_v20 = vand.u32 4294901760, %v434_v17  ;;  %v6653_v33 = vand.u32 4294901760, %v4488_v34  ;;  %v304_v17 = vld [vmem:[#allocation2 + $0x80] sm:$0xff] }
  0x4d   :  { %6929 = vst [vmem:[#allocation49_spill] sm:$0xff] %v4490_v40  ;;  %3191 = vmatpush3.msra.mxu1 %v626_v47  ;;  %v4504_v0 = vsub.f32 %v297_v15, %v4490_v40  ;;  %v6931_v47 = vand.u32 4294901760, %v4432_v26  ;;  %427 = vmatmul.mubr.f32.vlgmr.msra.gmra.mxu0 %v426_v43  ;;  %v633_v60 = vand.u32 4294901760, %v632_v29  ;;  %6932 = vst [vmem:[#allocation51_spill] sm:$0xff] %v4509_v55  ;;  %v6660_v22 = vand.u32 4294901760, %v4427_v54 }
  0x4e   :  { %3192 = vmatprep.subr.mxu1 %v745_v45  ;;  %v752_v19 = vand.u32 4294901760, %v751_v37  ;;  %v640_v48 = vand.u32 4294901760, %v639_v18  ;;  %3223 = vmatpush3.msra.mxu0 %v4036_v42  ;;  %v440_v15 = vsub.f32 %v4488_v34, %v6653_v33  ;;  %v4519_v43 = vsub.f32 %v296_v44, %v4509_v55  ;;  %v309_v18 = vld [vmem:[#allocation2 + $0xa8] sm:$0xff] }
  0x4f   :  { %6930 = vst [vmem:[#allocation50_spill] sm:$0xff] %v4504_v0  ;;  %v758_v58 = vsub.f32 %v4432_v26, %v6931_v47  ;;  %436 = vmatprep.mubr.f32.mxu0 %v435_v20  ;;  %v6657_v45 = vand.u32 4294901760, %v4504_v0  ;;  %3224 = vmatprep.subr.mxu0 %v3944_v23  ;;  %v4521_v29 = vand.u32 4294901760, %v301_v59  ;;  %v4523_v37 = vand.u32 4294901760, %v300_v16 }
  0x50   :  { %3193 = vmatpush3.msra.mxu1 %v633_v60  ;;  %6933 = vst [vmem:[#allocation52_spill] sm:$0xff] %v4519_v43  ;;  %v4525_v20 = vand.u32 4294901760, %v305_v38  ;;  %3225 = vmatpush3.msra.mxu0 %v3946_v24  ;;  %v441_v33 = vand.u32 4294901760, %v440_v15  ;;  %v646_v60 = vsub.f32 %v4427_v54, %v6660_v22  ;;  %v4534_v44 = vand.u32 4294901760, %v304_v17 }
  0x51   :  { %v759_v47 = vand.u32 4294901760, %v758_v58  ;;  %6934 = vst [vmem:[#allocation53_spill] sm:$0xff] %v4521_v29  ;;  %6935 = vst [vmem:[#allocation54_spill] sm:$0xff] %v4523_v37  ;;  %3194 = vmatprep.subr.mxu1 %v752_v19  ;;  %v449_v58 = vsub.f32 %v4504_v0, %v6657_v45  ;;  %3226 = vmatprep.subr.mxu0 %v3960_v27  ;;  %v6662_v34 = vand.u32 4294901760, %v4519_v43  ;;  %v308_v45 = vld [vmem:[#allocation2 + $0xa0] sm:$0xff]  ;;  %v7024_v4 = vand.u32 4294901760, %v4117_v21 }
  0x52   :  { %6936 = vst [vmem:[#allocation55_spill] sm:$0xff] %v4525_v20  ;;  %6937 = vst [vmem:[#allocation56_spill] sm:$0xff] %v4534_v44  ;;  %3195 = vmatpush3.msra.mxu1 %v640_v48  ;;  %v4539_v23 = vsub.f32 %v301_v59, %v4521_v29  ;;  %v4542_v19 = vsub.f32 %v300_v16, %v4523_v37  ;;  %v4545_v15 = vsub.f32 %v305_v38, %v4525_v20 }
  0x53   :  { %442 = vmatmul.mubr.f32.gmra.mxu0 %v441_v33  ;;  %v450_v0 = vand.u32 4294901760, %v449_v58  ;;  %3196 = vmatprep.subr.mxu1 %v759_v47  ;;  %v647_v22 = vand.u32 4294901760, %v646_v60  ;;  %v4548_v24 = vsub.f32 %v304_v17, %v4534_v44  ;;  %v4550_v48 = vand.u32 4294901760, %v309_v18  ;;  %v313_v58 = vld [vmem:[#allocation2 + $0xc8] sm:$0xff]  ;;  %v312_v17 = vld [vmem:[#allocation2 + $0xc0] sm:$0xff] }
  0x54   :  { %3227 = vmatpush3.msra.mxu0 %v3962_v28  ;;  %v455_v16 = vsub.f32 %v4519_v43, %v6662_v34  ;;  %v6666_v59 = vand.u32 4294901760, %v4539_v23  ;;  %v6665_v38 = vand.u32 4294901760, %v4542_v19  ;;  %v4561_v47 = vand.u32 4294901760, %v308_v45 }
  0x55   :  { %6938 = vst [vmem:[#allocation57_spill] sm:$0xff] %v4548_v24  ;;  %6939 = vst [vmem:[#allocation58_spill] sm:$0xff] %v4550_v48  ;;  %3228 = vmatprep.subr.mxu0 %v3988_v31  ;;  %451 = vmatprep.mubr.f32.mxu0 %v450_v0  ;;  %v4571_v43 = vsub.f32 %v309_v18, %v4550_v48  ;;  %v4575_v0 = vand.u32 4294901760, %v313_v58  ;;  %v7025_v5 = vand.u32 4294901760, %v4131_v30  ;;  %v7031_v8 = vand.u32 4294901760, %v4191_v25 }
  0x56   :  { %6940 = vst [vmem:[#allocation59_spill] sm:$0xff] %v4561_v47  ;;  %3229 = vmatpush3.msra.mxu0 %v3990_v32  ;;  %v456_v60 = vand.u32 4294901760, %v455_v16  ;;  %3197 = vmatpush3.msra.mxu1 %v647_v22  ;;  %v464_v34 = vsub.f32 %v4539_v23, %v6666_v59  ;;  %v470_v33 = vsub.f32 %v4542_v19, %v6665_v38  ;;  %v6943_v38 = vand.u32 4294901760, %v4545_v15 }
  0x57   :  { %6941 = vst [vmem:[#allocation60_spill] sm:$0xff] %v4571_v43  ;;  %3230 = vmatprep.subr.mxu0 %v4004_v35  ;;  %764 = vmatmul.mubr.f32.vlgmr.msra.gmra.mxu1 %v4441_v39  ;;  %6942 = vst [vmem:[#allocation61_spill] sm:$0xff] %v4575_v0  ;;  %v4585_v59 = vsub.f32 %v308_v45, %v4561_v47  ;;  %v317_v45 = vld [vmem:[#allocation2 + $0xe8] sm:$0xff]  ;;  %v7035_v11 = vand.u32 4294901760, %v4539_v23 }
  0x58   :  { %457 = vmatmul.mubr.f32.gmra.mxu0 %v456_v60  ;;  %3278 = vmatprep.subr.msk.mxu1 %vm127_vm0, %v6905_v61  ;;  %v465_v22 = vand.u32 4294901760, %v464_v34  ;;  %v471_v16 = vand.u32 4294901760, %v470_v33  ;;  %v479_v18 = vsub.f32 %v4545_v15, %v6943_v38  ;;  %v6944_v34 = vand.u32 4294901760, %v4548_v24  ;;  %v316_v60 = vld [vmem:[#allocation2 + $0xe0] sm:$0xff] }
  0x59   :  { %3231 = vmatpush3.msra.mxu0 %v4006_v36  ;;  %3279 = vmatpush3.msk.msra.mxu1 %vm111_vm1, %v6905_v61  ;;  %v4597_v38 = vand.u32 4294901760, %v312_v17 }
  0x5a   :  { %3232 = vmatprep.subr.mxu0 %v4034_v41  ;;  %466 = vmatprep.mubr.f32.mxu0 %v465_v22  ;;  %v485_v33 = vsub.f32 %v4548_v24, %v6944_v34  ;;  %v480_v22 = vand.u32 4294901760, %v479_v18  ;;  %v4607_v34 = vsub.f32 %v313_v58, %v4575_v0  ;;  %v6946_v18 = vand.u32 4294901760, %v4571_v43 }
  0x5b   :  { %6945 = vst [vmem:[#allocation62_spill] sm:$0xff] %v4597_v38  ;;  %3233 = vmatpush3.msra.mxu0 %v4048_v46  ;;  %3280 = vmatprep.subr.msk.mxu1 %vm126_vm2, %v6905_v61  ;;  %v4620_v58 = vsub.f32 %v312_v17, %v4597_v38 }
  0x5c   :  { %472 = vmatmul.mubr.f32.gmra.mxu0 %v471_v16  ;;  %769 = vmatprep.mubr.f32.mxu1 %v4450_v1  ;;  %v486_v16 = vand.u32 4294901760, %v485_v33  ;;  %v494_v39 = vsub.f32 %v4571_v43, %v6946_v18  ;;  %v4622_v1 = vand.u32 4294901760, %v317_v45  ;;  %v6949_v33 = vand.u32 4294901760, %v4585_v59  ;;  %v7026_v6 = vld [vmem:[#allocation57_spill] sm:$0xff] }
  0x5d   :  { %3234 = vmatprep.subr.mxu0 %v4074_v52  ;;  %3281 = vmatpush3.msk.msra.mxu1 %vm110_vm3, %v6905_v61  ;;  %6947 = vst [vmem:[#allocation63_spill] sm:$0xff] %v4620_v58  ;;  %v6677_v18 = vand.u32 4294901760, %v4607_v34 }
  0x5e   :  { %771 = vmatmul.mubr.f32.gmra.mxu1 %v4476_v63  ;;  %3235 = vmatpush3.msra.mxu0 %v4090_v57  ;;  %6948 = vst [vmem:[#allocation64_spill] sm:$0xff] %v4622_v1  ;;  %v500_v17 = vsub.f32 %v4585_v59, %v6949_v33  ;;  %v4637_v63 = vand.u32 4294901760, %v316_v60  ;;  %v495_v43 = vand.u32 4294901760, %v494_v39  ;;  %v4647_v24 = vsub.f32 %v317_v45, %v4622_v1  ;;  %v7032_v9 = vld [vmem:[#allocation60_spill] sm:$0xff] }
  0x5f   :  { %3282 = vmatprep.subr.msk.mxu1 %vm125_vm4, %v6905_v61  ;;  %3236 = vmatprep.subr.mxu0 %v4117_v21  ;;  %v509_v39 = vsub.f32 %v4607_v34, %v6677_v18  ;;  %v6955_v18 = vld [vmem:[#allocation25_spill] sm:$0xff]  ;;  %v7033_v21 = vand.u32 4294901760, %v4232_v49 }
  0x60   :  { %3283 = vmatpush3.msk.msra.mxu1 %vm109_vm5, %v6905_v61  ;;  %481 = vmatprep.mubr.f32.mxu0 %v480_v22  ;;  %6950 = vst [vmem:[#allocation65_spill] sm:$0xff] %v4637_v63  ;;  %v6678_v22 = vand.u32 4294901760, %v4620_v58  ;;  %6951 = vst [vmem:[#allocation66_spill] sm:$0xff] %v4647_v24  ;;  %v4660_v33 = vsub.f32 %v316_v60, %v4637_v63  ;;  %v6686_v60 = vand.u32 4294901760, %v4647_v24 }
  0x61   :  { %3237 = vmatpush3.msra.mxu0 %v4131_v30  ;;  %3284 = vmatprep.subr.msk.mxu1 %vm124_vm6, %v6905_v61 }
  0x62   :  { %487 = vmatmul.mubr.f32.gmra.mxu0 %v486_v16  ;;  %776 = vmatprep.mubr.f32.mxu1 %v4490_v40  ;;  %v501_v16 = vand.u32 4294901760, %v500_v17  ;;  %6952 = vst [vmem:[#allocation67_spill] sm:$0xff] %v4660_v33  ;;  %v515_v45 = vsub.f32 %v4620_v58, %v6678_v22  ;;  %v510_v17 = vand.u32 4294901760, %v509_v39  ;;  %v6954_v39 = vld [vmem:[#allocation9_spill] sm:$0xff]  ;;  %v6963_v58 = vld [vmem:[#allocation12_spill] sm:$0xff] }
  0x63   :  { %3238 = vmatprep.subr.mxu0 %v4166_v56  ;;  %3285 = vmatpush3.msk.msra.mxu1 %vm108_vm7, %v6905_v61 }
  0x64   :  { %778 = vmatmul.mubr.f32.gmra.mxu1 %v4509_v55  ;;  %3239 = vmatpush3.msra.mxu0 %v4178_v62  ;;  %v516_v22 = vand.u32 4294901760, %v515_v45  ;;  %v6959_v55 = vld [vmem:[#allocation28_spill] sm:$0xff] }
  0x65   :  { %3286 = vmatprep.subr.msk.mxu1 %vm123_vm8, %v6905_v61  ;;  %3240 = vmatprep.subr.mxu0 %v4191_v25 }
  0x66   :  { %3287 = vmatpush3.msk.msra.mxu1 %vm107_vm9, %v6905_v61  ;;  %496 = vmatprep.mubr.f32.mxu0 %v495_v43  ;;  %v6953_v43 = vld [vmem:[#allocation23_spill] sm:$0xff] }
  0x67   :  { %3241 = vmatpush3.msra.mxu0 %v4232_v49  ;;  %3288 = vmatprep.subr.msk.mxu1 %vm6687_vm10, %v6905_v61  ;;  %v7039_v25 = vand.u32 4294901760, %v6953_v43 }
  0x68   :  { %502 = vmatmul.mubr.f32.gmra.mxu0 %v501_v16  ;;  %783 = vmatprep.mubr.f32.mxu1 %v4521_v29  ;;  %v524_v16 = vsub.f32 %v4647_v24, %v6686_v60  ;;  %v6956_v29 = vld [vmem:[#allocation10_spill] sm:$0xff]  ;;  %v6960_v60 = vld [vmem:[#allocation11_spill] sm:$0xff]  ;;  %v6962_v24 = vld [vmem:[#allocation29_spill] sm:$0xff] }
  0x69   :  { %3242 = vmatprep.subr.mxu0 %v4238_v51  ;;  %3289 = vmatpush3.msk.msra.mxu1 %vm6681_vm11, %v6905_v61  ;;  %vm6957_vm11 = vcmp.eq.s32.totalorder %v6956_v29, %v3902_v14  ;;  %vm6961_vm10 = vcmp.eq.s32.totalorder %v6960_v60, %v3902_v14 }
  0x6a   :  { %785 = vmatmul.mubr.f32.gmra.mxu1 %v4523_v37  ;;  %3243 = vmatpush3.msra.mxu0 %v6953_v43  ;;  %v6958_v37 = vand.u32 4294901760, %v4660_v33  ;;  %v525_v40 = vand.u32 4294901760, %v524_v16  ;;  %v6968_v16 = vld [vmem:[#allocation17_spill] sm:$0xff] }
  0x6b   :  { %3290 = vmatprep.subr.msk.mxu1 %vm6694_vm12, %v6905_v61  ;;  %3244 = vmatprep.subr.mxu0 %v6955_v18  ;;  %vm6969_vm12 = vcmp.eq.s32.totalorder %v6968_v16, %v3902_v14 }
  0x6c   :  { %3291 = vmatpush3.msk.msra.mxu1 %vm6957_vm11, %v6905_v61  ;;  %511 = vmatprep.mubr.f32.mxu0 %v510_v17  ;;  %v530_v45 = vsub.f32 %v4660_v33, %v6958_v37  ;;  %vm6964_vm11 = vcmp.eq.s32.totalorder %v6963_v58, %v3902_v14  ;;  %v6965_v17 = vld [vmem:[#allocation16_spill] sm:$0xff]  ;;  %v6974_v33 = vld [vmem:[#allocation19_spill] sm:$0xff] }
  0x6d   :  { %3245 = vmatpush3.msra.mxu0 %v6959_v55  ;;  %3292 = vmatprep.subr.msk.mxu1 %vm6961_vm10, %v6905_v61  ;;  %vm6966_vm10 = vcmp.eq.s32.totalorder %v6965_v17, %v3902_v14 }
  0x6e   :  { %517 = vmatmul.mubr.f32.gmra.mxu0 %v516_v22  ;;  %790 = vmatprep.mubr.f32.mxu1 %v4525_v20  ;;  %v531_v37 = vand.u32 4294901760, %v530_v45  ;;  %v6967_v22 = vld [vmem:[#allocation33_spill] sm:$0xff]  ;;  %v6970_v20 = vld [vmem:[#allocation34_spill] sm:$0xff]  ;;  %v6973_v45 = vld [vmem:[#allocation35_spill] sm:$0xff] }
  0x6f   :  { %3246 = vmatprep.subr.mxu0 %v6962_v24  ;;  %3293 = vmatpush3.msk.msra.mxu1 %vm6964_vm11, %v6905_v61 }
  0x70   :  { %792 = vmatmul.mubr.f32.gmra.mxu1 %v4534_v44  ;;  %3247 = vmatpush3.msra.mxu0 %v4331_v53  ;;  %v6971_v44 = vld [vmem:[#allocation18_spill] sm:$0xff] }
  0x71   :  { %3294 = vmatprep.subr.msk.mxu1 %vm6966_vm10, %v6905_v61  ;;  %3248 = vmatprep.subr.mxu0 %v6967_v22  ;;  %vm6972_vm11 = vcmp.eq.s32.totalorder %v6971_v44, %v3902_v14  ;;  %vm6975_vm10 = vcmp.eq.s32.totalorder %v6974_v33, %v3902_v14 }
  0x72   :  { %3295 = vmatpush3.msk.msra.mxu1 %vm6969_vm12, %v6905_v61  ;;  %526 = vmatprep.mubr.f32.mxu0 %v525_v40  ;;  %v6976_v40 = vld [vmem:[#allocation20_spill] sm:$0xff] }
  0x73   :  { %3249 = vmatpush3.msra.mxu0 %v6970_v20  ;;  %3296 = vmatprep.subr.msk.mxu1 %vm6972_vm11, %v6905_v61  ;;  %vm6977_vm12 = vcmp.eq.s32.totalorder %v6976_v40, %v3902_v14  ;;  %v6983_v40 = vld [vmem:[#allocation45_spill] sm:$0xff] }
  0x74   :  { %532 = vmatmul.mubr.f32.gmra.mxu0 %v531_v37  ;;  %797 = vmatprep.mubr.f32.mxu1 %v4550_v48  ;;  %v6978_v37 = vld [vmem:[#allocation21_spill] sm:$0xff] }
  0x75   :  { %3250 = vmatprep.subr.mxu0 %v6973_v45  ;;  %3297 = vmatpush3.msk.msra.mxu1 %vm6975_vm10, %v6905_v61  ;;  %vm6979_vm11 = vcmp.eq.s32.totalorder %v6978_v37, %v3902_v14  ;;  %v6980_v48 = vld [vmem:[#allocation41_spill] sm:$0xff]  ;;  %v6986_v37 = vld [vmem:[#allocation15_spill] sm:$0xff] }
  0x76   :  { %799 = vmatmul.mubr.f32.gmra.mxu1 %v4561_v47  ;;  %3251 = vmatpush3.msra.mxu0 %v4417_v50  ;;  %v6981_v47 = vld [vmem:[#allocation22_spill] sm:$0xff]  ;;  %v6987_v50 = vand.u32 4294901760, %v6986_v37 }
  0x77   :  { %3298 = vmatprep.subr.msk.mxu1 %vm6977_vm12, %v6905_v61  ;;  %3252 = vmatprep.subr.mxu0 %v4432_v26  ;;  %vm6982_vm10 = vcmp.eq.s32.totalorder %v6981_v47, %v3902_v14  ;;  %v6984_v26 = vld [vmem:[#allocation24_spill] sm:$0xff]  ;;  %v6990_v47 = vand.u32 4294901760, %v4036_v42  ;;  %v6995_v37 = vld [vmem:[#allocation46_spill] sm:$0xff] }
  0x78   :  { %3299 = vmatpush3.msk.msra.mxu1 %vm6979_vm11, %v6905_v61  ;;  %3253 = vmatpush3.msra.mxu0 %v4427_v54  ;;  %vm6985_vm12 = vcmp.eq.s32.totalorder %v6984_v26, %v3902_v14  ;;  %v6988_v54 = vld [vmem:[#allocation26_spill] sm:$0xff]  ;;  %v6993_v26 = vld [vmem:[#allocation13_spill] sm:$0xff]  ;;  %v7000_v42 = vld [vmem:[#allocation48_spill] sm:$0xff]  ;;  %v7020_v2 = vand.u32 4294901760, %v6995_v37 }
  0x79   :  { %948 = vmatprep.mubr.f32.mxu0 %v6980_v48  ;;  %3300 = vmatprep.subr.msk.mxu1 %vm6982_vm10, %v6905_v61  ;;  %vm6989_vm11 = vcmp.eq.s32.totalorder %v6988_v54, %v3902_v14  ;;  %v6994_v33 = vand.u32 4294901760, %v6993_v26  ;;  %v7003_v26 = vand.u32 4294901760, %v3960_v27  ;;  %v7009_v27 = vld [vmem:[#allocation50_spill] sm:$0xff]  ;;  %v7022_v3 = vand.u32 4294901760, %v7000_v42 }
  0x7a   :  { %804 = vmatprep.mubr.f32.mxu1 %v4575_v0  ;;  %951 = vmatmul.mubr.f32.vlgmr.msra.gmra.mxu0 %v6983_v40  ;;  %v6991_v0 = vld [vmem:[#allocation27_spill] sm:$0xff] }
  0x7b   :  { %3301 = vmatpush3.msk.msra.mxu1 %vm6985_vm12, %v6905_v61  ;;  %3334 = vmatprep.subr.mxu0 %v6987_v50  ;;  %vm6992_vm10 = vcmp.eq.s32.totalorder %v6991_v0, %v3902_v14  ;;  %v6996_v50 = vld [vmem:[#allocation30_spill] sm:$0xff] }
  0x7c   :  { %806 = vmatmul.mubr.f32.gmra.mxu1 %v4597_v38  ;;  %3302 = vmatprep.subr.msk.mxu1 %vm6989_vm11, %v6905_v61  ;;  %vm6997_vm12 = vcmp.eq.s32.totalorder %v6996_v50, %v3902_v14  ;;  %v6998_v38 = vld [vmem:[#allocation14_spill] sm:$0xff] }
  0x7d   :  { %3335 = vmatpush3.msra.mxu0 %v6990_v47  ;;  %3303 = vmatpush3.msk.msra.mxu1 %vm6992_vm10, %v6905_v61  ;;  %v6999_v54 = vand.u32 4294901760, %v6998_v38  ;;  %v7001_v47 = vld [vmem:[#allocation31_spill] sm:$0xff]  ;;  %v7016_v38 = vand.u32 4294901760, %v6983_v40 }
  0x7e   :  { %3336 = vmatprep.subr.mxu0 %v6994_v33  ;;  %957 = vmatprep.mubr.f32.mxu0 %v6995_v37  ;;  %vm7002_vm11 = vcmp.eq.s32.totalorder %v7001_v47, %v3902_v14  ;;  %v7004_v33 = vld [vmem:[#allocation32_spill] sm:$0xff] }
  0x7f   :  { %3304 = vmatprep.subr.msk.mxu1 %vm6997_vm12, %v6905_v61  ;;  %3337 = vmatpush3.msra.mxu0 %v6999_v54  ;;  %vm7005_vm10 = vcmp.eq.s32.totalorder %v7004_v33, %v3902_v14  ;;  %v7006_v54 = vand.u32 4294901760, %v3962_v28  ;;  %v7012_v28 = vld [vmem:[#allocation52_spill] sm:$0xff] }
  0x80   :  { %811 = vmatprep.mubr.f32.mxu1 %v4622_v1  ;;  %960 = vmatmul.mubr.f32.gmra.mxu0 %v7000_v42  ;;  %v7008_v1 = vand.u32 4294901760, %v3988_v31  ;;  %v7014_v31 = vand.u32 4294901760, %v6980_v48  ;;  %v7029_v7 = vand.u32 4294901760, %v7012_v28  ;;  %v7049_v48 = vmov 0.0  }
  0x81   :  { %3305 = vmatpush3.msk.msra.mxu1 %vm7002_vm11, %v6905_v61  ;;  %3338 = vmatprep.subr.mxu0 %v7003_v26  ;;  %v7017_v26 = vand.u32 4294901760, %v4006_v36  ;;  %v7021_v36 = vand.u32 4294901760, %v4074_v52  ;;  %v7028_v52 = vand.u32 4294901760, %v4166_v56  ;;  %vm7059_vm11 = vcmp.eq.s32.totalorder %v6965_v17, %v3902_v14 }
  0x82   :  { %813 = vmatmul.mubr.f32.gmra.mxu1 %v4637_v63  ;;  %3306 = vmatprep.subr.msk.mxu1 %vm7005_vm10, %v6905_v61  ;;  %v7011_v63 = vand.u32 4294901760, %v3990_v32  ;;  %v7018_v32 = vand.u32 4294901760, %v4034_v41  ;;  %v7023_v41 = vand.u32 4294901760, %v4090_v57  ;;  %v7030_v57 = vand.u32 4294901760, %v4178_v62 }
  0x83   :  { %3339 = vmatpush3.msra.mxu0 %v7006_v54  ;;  %3307 = vmatpush3.msk.msra.mxu1 %vm97_vm13, %v6905_v61  ;;  %v7013_v54 = vld [vmem:[#allocation8_spill] sm:$0xff]  ;;  %v7036_v62 = vand.u32 4294901760, %v4238_v51  ;;  %v7042_v51 = vand.u32 4294901760, %v6955_v18  ;;  %vm7061_vm10 = vcmp.eq.s32.totalorder %v6968_v16, %v3902_v14 }
  0x84   :  { %3340 = vmatprep.subr.mxu0 %v7008_v1  ;;  %966 = vmatprep.mubr.f32.mxu0 %v7009_v27  ;;  %v7015_v1 = vand.u32 4294901760, %v4004_v35  ;;  %v7019_v35 = vand.u32 4294901760, %v4048_v46  ;;  %v7027_v46 = vand.u32 4294901760, %v7009_v27  ;;  %v4901_v10 = vadd.s32 504, %v7013_v54 }
  0x85   :  { %3308 = vmatprep.subr.msk.mxu1 %vm112_vm14, %v6905_v61  ;;  %3341 = vmatpush3.msra.mxu0 %v7011_v63  ;;  %v4904_v30 = vadd.s32 376, %v7013_v54  ;;  %v4910_v56 = vadd.s32 496, %v7013_v54  ;;  %v4948_v49 = vadd.s32 488, %v7013_v54  ;;  %v7045_v63 = vand.u32 4294901760, %v6959_v55 }
  0x86   :  { %969 = vmatmul.mubr.f32.gmra.mxu0 %v7012_v28  ;;  %3309 = vmatpush3.msk.msra.mxu1 %vm96_vm15, %v6905_v61  ;;  %v4980_v43 = vadd.s32 360, %v7013_v54  ;;  %v4986_v40 = vadd.s32 352, %v7013_v54  ;;  %v4995_v37 = vadd.s32 472, %v7013_v54  ;;  %v4998_v42 = vadd.s32 344, %v7013_v54 }
  0x87   :  { %1118 = vmatprep.mubr.f32.mxu1 %v7014_v31  ;;  %3342 = vmatprep.subr.mxu0 %v7015_v1  ;;  %7044 = vst [vmem:[#allocation9_spill] sm:$0xff] %v4948_v49  ;;  %v7066_v31 = vand.u32 4294901760, %v7032_v9  ;;  %v5048_v1 = vadd.s32 336, %v7013_v54 }
  0x88   :  { %1122 = vmatmul.mubr.f32.vlgmr.msra.gmra.mxu1 %v7016_v38  ;;  %3343 = vmatpush3.msra.mxu0 %v7017_v26  ;;  %7052 = vst [vmem:[#allocation25_spill] sm:$0xff] %v4980_v43  ;;  %7054 = vst [vmem:[#allocation28_spill] sm:$0xff] %v4986_v40  ;;  %v7060_v38 = vand.u32 4294901760, %v6967_v22  ;;  %v7063_v22 = vand.u32 4294901760, %v6970_v20  ;;  %v7065_v20 = vld [vmem:[#allocation67_spill] sm:$0xff] }
  0x89   :  { %3390 = vmatprep.subr.msk.mxu1 %vm127_vm0, %v6905_v61  ;;  %3344 = vmatprep.subr.mxu0 %v7018_v32  ;;  %vm7034_vm0 = vcmp.eq.s32.totalorder %v3894_v12, %v3902_v14  ;;  %v7038_v12 = vand.u32 4294901760, %v4542_v19  ;;  %7057 = vst [vmem:[#allocation11_spill] sm:$0xff] %v4995_v37  ;;  %7058 = vst [vmem:[#allocation29_spill] sm:$0xff] %v4998_v42  ;;  %v7069_v32 = vand.u32 4294901760, %v6973_v45 }
  0x8a   :  { %3391 = vmatpush3.msk.msra.mxu1 %vm111_vm1, %v6905_v61  ;;  %975 = vmatprep.mubr.f32.mxu0 %v4539_v23  ;;  %vm7037_vm1 = vcmp.eq.s32.totalorder %v3897_v13, %v3902_v14  ;;  %v4923_v23 = vadd.s32 368, %v7013_v54  ;;  %v4934_v13 = vld [vmem:[%s6540_s0] ss:$0 sm:$0xff]  ;;  %7068 = vst [vmem:[#allocation16_spill] sm:$0xff] %v5048_v1  ;;  %s3840_s0 = smov [#allocation5]  }
  0x8b   :  { %3345 = vmatpush3.msra.mxu0 %v7019_v35  ;;  %3392 = vmatprep.subr.msk.mxu1 %vm126_vm2, %v6905_v61  ;;  %vm7041_vm2 = vcmp.eq.s32.totalorder %v6954_v39, %v3902_v14  ;;  %v4983_v39 = vadd.s32 480, %v7013_v54  ;;  %vm157_vm12 = vcmp.eq.s32.totalorder %v4948_v49, %v4934_v13  ;;  %v7070_v35 = vld [vmem:[#allocation19_spill] sm:$0xff]  ;;  %s2841_s19 = sshll.u32 %s3840_s0, 4  ;;  %s2842_s19 = int_to_ptr.vmem [resolvable:$true] %s2841_s19 }
  0x8c   :  { %978 = vmatmul.mubr.f32.gmra.mxu0 %v4542_v19  ;;  %1129 = vmatprep.mubr.f32.mxu1 %v7020_v2  ;;  %7040 = vst [vmem:[#allocation23_spill] sm:$0xff] %v4923_v23  ;;  %v7047_v19 = vld [vmem:[#allocation63_spill] sm:$0xff]  ;;  %v2915_v16 = vsel %vm157_vm12, 1.0, %v7049_v48  ;;  %s3811_s20 = scalar_lea.vmem %s2842_s19, 1024  ;;  %p3816_p6 = scmp.lt.s32.totalorder %s2842_s19, %s2842_s19 }
  0x8d   :  { %3346 = vmatprep.subr.mxu0 %v7021_v36  ;;  %3393 = vmatpush3.msk.msra.mxu1 %vm110_vm3, %v6905_v61  ;;  %vm6716_vm3 = vcmp.eq.s32.totalorder %v4901_v10, %v4934_v13  ;;  %7053 = vst [vmem:[#allocation10_spill] sm:$0xff] %v4983_v39  ;;  %v291_v49 = vld [vmem:[#allocation2 + $0x18] sm:$0xff]  ;;  %p3812_p5 = scmp.ne.s32.totalorder %s2842_s19, %s3811_s20  ;;  %p3817_p7 = scmp.lt.s32.totalorder %s3811_s20, %s3811_s20 }
  0x8e   :  { %1133 = vmatmul.mubr.f32.gmra.mxu1 %v7022_v3  ;;  %3347 = vmatpush3.msra.mxu0 %v7023_v41  ;;  %v2917_v18 = vsel %vm6716_vm3, 1.0, %v7049_v48  ;;  %v7072_v3 = vand.u32 4294901760, %v4585_v59  ;;  %v7073_v41 = vld [vmem:[#allocation39_spill] sm:$0xff] }
  0x8f   :  { %3394 = vmatprep.subr.msk.mxu1 %vm125_vm4, %v6905_v61  ;;  %3348 = vmatprep.subr.mxu0 %v7024_v4  ;;  %vm6827_vm4 = vcmp.eq.s32.totalorder %v4904_v30, %v4934_v13  ;;  %v5006_v27 = vsub.f32 %v2917_v18, %v2917_v18  ;;  %v7074_v4 = vand.u32 4294901760, %v7073_v41  ;;  %v7093_v41 = vand.u32 4294901760, %v7047_v19  ;;  %p3818_p8 = por %p3817_p7, %p3816_p6 }
  0x90   :  { %3395 = vmatpush3.msk.msra.mxu1 %vm109_vm5, %v6905_v61  ;;  %984 = vmatprep.mubr.f32.mxu0 %v4545_v15  ;;  %vm7043_vm5 = vcmp.eq.s32.totalorder %v6956_v29, %v3902_v14  ;;  %v7048_v29 = vand.u32 4294901760, %v4545_v15  ;;  %v2901_v55 = vsel %vm6827_vm4, 1.0, %v7049_v48 }
  0x91   :  { %3349 = vmatpush3.msra.mxu0 %v7025_v5  ;;  %3396 = vmatprep.subr.msk.mxu1 %vm124_vm6, %v6905_v61  ;;  %vm6720_vm6 = vcmp.eq.s32.totalorder %v4910_v56, %v4934_v13  ;;  %v5013_v26 = vsub.f32 %v2901_v55, %v2901_v55  ;;  %v6727_v36 = vand.u32 4294901760, %v5006_v27  ;;  %v5063_v5 = vsub.f32 %v2915_v16, %v2915_v16  ;;  %p3819_p9 = pnand %p3818_p8, %p3812_p5 }
  0x92   :  { %987 = vmatmul.mubr.f32.gmra.mxu0 %v7026_v6  ;;  %1140 = vmatprep.mubr.f32.mxu1 %v7027_v46  ;;  %v2916_v15 = vsel %vm6720_vm6, 1.0, %v7049_v48 }
  0x93   :  { %3350 = vmatprep.subr.mxu0 %v7028_v52  ;;  %3397 = vmatpush3.msk.msra.mxu1 %vm108_vm7, %v6905_v61  ;;  %vm7046_vm7 = vcmp.eq.s32.totalorder %v6960_v60, %v3902_v14  ;;  %v7050_v60 = vand.u32 4294901760, %v6962_v24  ;;  %v7055_v24 = vand.u32 4294901760, %v7026_v6  ;;  %v5015_v28 = vsub.f32 %v2916_v15, %v2916_v15  ;;  %v7077_v52 = vld [vmem:[#allocation42_spill] sm:$0xff] }
  0x94   :  { %1144 = vmatmul.mubr.f32.gmra.mxu1 %v7029_v7  ;;  %3351 = vmatpush3.msra.mxu0 %v7030_v57  ;;  %v6726_v46 = vand.u32 4294901760, %v5013_v26  ;;  %v7078_v7 = vand.u32 4294901760, %v7077_v52  ;;  %v5124_v15 = vadd.s32 448, %v7013_v54  ;;  %v5189_v52 = vadd.s32 440, %v7013_v54 }
  0x95   :  { %3398 = vmatprep.subr.msk.mxu1 %vm123_vm8, %v6905_v61  ;;  %3352 = vmatprep.subr.mxu0 %v7031_v8  ;;  %vm6719_vm8 = vcmp.eq.s32.totalorder %v4923_v23, %v4934_v13 }
  0x96   :  { %3399 = vmatpush3.msk.msra.mxu1 %vm107_vm9, %v6905_v61  ;;  %993 = vmatprep.mubr.f32.mxu0 %v7032_v9  ;;  %vm7051_vm9 = vcmp.eq.s32.totalorder %v6963_v58, %v3902_v14  ;;  %v7056_v58 = vand.u32 4294901760, %v4331_v53  ;;  %v7062_v53 = vld [vmem:[#allocation66_spill] sm:$0xff]  ;;  %v2900_v17 = vsel %vm6719_vm8, 1.0, %v7049_v48  ;;  %7088 = vst [vmem:[#allocation34_spill] sm:$0xff] %v5124_v15  ;;  %7098 = vst [vmem:[#allocation35_spill] sm:$0xff] %v5189_v52 }
  0x97   :  { %3353 = vmatpush3.msra.mxu0 %v7033_v21  ;;  %3400 = vmatprep.subr.msk.mxu1 %vm7034_vm0, %v6905_v61  ;;  %vm7064_vm0 = vcmp.eq.s32.totalorder %v6971_v44, %v3902_v14  ;;  %v5045_v44 = vadd.s32 464, %v7013_v54  ;;  %v5056_v2 = vsub.f32 %v2900_v17, %v2900_v17  ;;  %v6724_v21 = vand.u32 4294901760, %v5015_v28 }
  0x98   :  { %996 = vmatmul.mubr.f32.gmra.mxu0 %v4585_v59  ;;  %1151 = vmatprep.mubr.f32.mxu1 %v7035_v11  ;;  %v7075_v59 = vld [vmem:[#allocation20_spill] sm:$0xff]  ;;  %v7079_v11 = vld [vmem:[#allocation21_spill] sm:$0xff] }
  0x99   :  { %3354 = vmatprep.subr.mxu0 %v7036_v62  ;;  %3401 = vmatpush3.msk.msra.mxu1 %vm7037_vm1, %v6905_v61  ;;  %vm141_vm1 = vcmp.eq.s32.totalorder %v4980_v43, %v4934_v13  ;;  %7067 = vst [vmem:[#allocation12_spill] sm:$0xff] %v5045_v44  ;;  %v7081_v62 = vld [vmem:[#allocation40_spill] sm:$0xff]  ;;  %v6723_v16 = vand.u32 4294901760, %v5056_v2 }
  0x9a   :  { %1155 = vmatmul.mubr.f32.gmra.mxu1 %v7038_v12  ;;  %3355 = vmatpush3.msra.mxu0 %v7039_v25  ;;  %v2899_v45 = vsel %vm141_vm1, 1.0, %v7049_v48  ;;  %v7082_v12 = vand.u32 4294901760, %v7081_v62  ;;  %v5104_v25 = vadd.s32 456, %v7013_v54 }
  0x9b   :  { %3402 = vmatprep.subr.msk.mxu1 %vm7041_vm2, %v6905_v61  ;;  %3356 = vmatprep.subr.mxu0 %v7042_v51  ;;  %vm156_vm2 = vcmp.eq.s32.totalorder %v4983_v39, %v4934_v13  ;;  %v5107_v51 = vadd.s32 328, %v7013_v54  ;;  %v5114_v18 = vsub.f32 %v2899_v45, %v2899_v45  ;;  %v6722_v45 = vand.u32 4294901760, %v5063_v5 }
  0x9c   :  { %3403 = vmatpush3.msk.msra.mxu1 %vm7043_vm5, %v6905_v61  ;;  %1002 = vmatprep.mubr.f32.mxu0 %v4607_v34  ;;  %vm6859_vm5 = vcmp.eq.s32.totalorder %v4986_v40, %v4934_v13  ;;  %v2914_v6 = vsel %vm156_vm2, 1.0, %v7049_v48  ;;  %7083 = vst [vmem:[#allocation33_spill] sm:$0xff] %v5104_v25  ;;  %v7130_v40 = vld [vmem:[#allocation54_spill] sm:$0xff]  ;;  %v5478_v39 = vadd.s32 400, %v7013_v54 }
  0x9d   :  { %3357 = vmatpush3.msra.mxu0 %v7045_v63  ;;  %3404 = vmatprep.subr.msk.mxu1 %vm7046_vm7, %v6905_v61  ;;  %vm6733_vm7 = vcmp.eq.s32.totalorder %v4995_v37, %v4934_v13  ;;  %v2898_v57 = vsel %vm6859_vm5, 1.0, %v7049_v48  ;;  %7084 = vst [vmem:[#allocation17_spill] sm:$0xff] %v5107_v51  ;;  %v7085_v63 = vld [vmem:[#allocation38_spill] sm:$0xff]  ;;  %v5116_v55 = vsub.f32 %v2914_v6, %v2914_v6  ;;  %v5174_v6 = vadd.s32 320, %v7013_v54 }
  0x9e   :  { %1005 = vmatmul.mubr.f32.gmra.mxu0 %v7047_v19  ;;  %1162 = vmatprep.mubr.f32.mxu1 %v7048_v29  ;;  %v2913_v8 = vsel %vm6733_vm7, 1.0, %v7049_v48  ;;  %v7086_v29 = vld [vmem:[#allocation22_spill] sm:$0xff]  ;;  %7139 = vst [vmem:[#allocation63_spill] sm:$0xff] %v5478_v39 }
  0x9f   :  { %3358 = vmatprep.subr.mxu0 %v7050_v60  ;;  %3405 = vmatpush3.msk.msra.mxu1 %vm7051_vm9, %v6905_v61  ;;  %vm6729_vm9 = vcmp.eq.s32.totalorder %v4998_v42, %v4934_v13  ;;  %v5121_v60 = vsub.f32 %v5006_v27, %v6727_v36  ;;  %v5131_v17 = vsub.f32 %v2913_v8, %v2913_v8 }
  0xa0   :  { %1166 = vmatmul.mubr.f32.gmra.mxu1 %v7055_v24  ;;  %3359 = vmatpush3.msra.mxu0 %v7056_v58  ;;  %v2897_v9 = vsel %vm6729_vm9, 1.0, %v7049_v48  ;;  %v7089_v24 = vand.u32 4294901760, %v4607_v34  ;;  %v7090_v58 = vld [vmem:[#allocation43_spill] sm:$0xff]  ;;  %7096 = vst [vmem:[#allocation18_spill] sm:$0xff] %v5174_v6 }
  0xa1   :  { %3406 = vmatprep.subr.msk.mxu1 %vm7059_vm11, %v6905_v61  ;;  %3360 = vmatprep.subr.mxu0 %v7060_v38  ;;  %vm7071_vm11 = vcmp.eq.s32.totalorder %v7070_v35, %v3902_v14  ;;  %v5129_v38 = vsub.f32 %v2898_v57, %v2898_v57  ;;  %v5147_v34 = vsub.f32 %v2897_v9, %v2897_v9  ;;  %v1908_v19 = vand.u32 4294901760, %v5121_v60 }
  0xa2   :  { %3407 = vmatpush3.msk.msra.mxu1 %vm7061_vm10, %v6905_v61  ;;  %1011 = vmatprep.mubr.f32.mxu0 %v7062_v53  ;;  %vm7076_vm10 = vcmp.eq.s32.totalorder %v7075_v59, %v3902_v14  ;;  %v6721_v59 = vand.u32 4294901760, %v5114_v18  ;;  %v5204_v9 = vsub.f32 %v5056_v2, %v6723_v16  ;;  %v5272_v16 = vadd.s32 304, %v7013_v54 }
  0xa3   :  { %3361 = vmatpush3.msra.mxu0 %v7063_v22  ;;  %3408 = vmatprep.subr.msk.mxu1 %vm7064_vm0, %v6905_v61  ;;  %vm7080_vm0 = vcmp.eq.s32.totalorder %v7079_v11, %v3902_v14  ;;  %v5136_v22 = vsub.f32 %v5013_v26, %v6726_v46  ;;  %v5307_v46 = vadd.s32 424, %v7013_v54 }
  0xa4   :  { %1014 = vmatmul.mubr.f32.gmra.mxu0 %v7065_v20  ;;  %1173 = vmatprep.mubr.f32.mxu1 %v7066_v31  ;;  %v7091_v31 = vld [vmem:[#allocation24_spill] sm:$0xff]  ;;  %7109 = vst [vmem:[#allocation27_spill] sm:$0xff] %v5272_v16 }
  0xa5   :  { %3362 = vmatprep.subr.mxu0 %v7069_v32  ;;  %3409 = vmatpush3.msk.msra.mxu1 %vm7071_vm11, %v6905_v61  ;;  %vm6717_vm11 = vcmp.eq.s32.totalorder %v5045_v44, %v4934_v13  ;;  %7113 = vst [vmem:[#allocation46_spill] sm:$0xff] %v5307_v46 }
  0xa6   :  { %1177 = vmatmul.mubr.f32.gmra.mxu1 %v7072_v3  ;;  %3363 = vmatpush3.msra.mxu0 %v7074_v4  ;;  %v2912_v32 = vsel %vm6717_vm11, 1.0, %v7049_v48  ;;  %v5160_v3 = vsub.f32 %v5015_v28, %v6724_v21  ;;  %v7094_v4 = vld [vmem:[#allocation26_spill] sm:$0xff]  ;;  %vm6752_vm11 = vcmp.eq.s32.totalorder %v5107_v51, %v4934_v13 }
  0xa7   :  { %3410 = vmatprep.subr.msk.mxu1 %vm7076_vm10, %v6905_v61  ;;  %3364 = vmatprep.subr.mxu0 %v7078_v7  ;;  %vm6718_vm10 = vcmp.eq.s32.totalorder %v5048_v1, %v4934_v13  ;;  %v7099_v7 = vld [vmem:[#allocation44_spill] sm:$0xff]  ;;  %v5196_v57 = vsub.f32 %v2912_v32, %v2912_v32  ;;  %v2895_v62 = vsel %vm6752_vm11, 1.0, %v7049_v48  ;;  %v5233_v32 = vsub.f32 %v5063_v5, %v6722_v45 }
  0xa8   :  { %3411 = vmatpush3.msk.msra.mxu1 %vm7080_vm0, %v6905_v61  ;;  %3365 = vmatpush3.msra.mxu0 %v7082_v12  ;;  %vm7087_vm0 = vcmp.eq.s32.totalorder %v7086_v29, %v3902_v14  ;;  %v2896_v35 = vsel %vm6718_vm10, 1.0, %v7049_v48  ;;  %vm6751_vm10 = vcmp.eq.s32.totalorder %v5124_v15, %v4934_v13  ;;  %v6725_v12 = vand.u32 4294901760, %v5116_v55 }
  0xa9   :  { %1365 = vmatprep.mubr.f32.mxu0 %v7085_v63  ;;  %3412 = vmatprep.subr.msk.mxu1 %vm7087_vm0, %v6905_v61  ;;  %vm7092_vm0 = vcmp.eq.s32.totalorder %v7091_v31, %v3902_v14  ;;  %v5199_v8 = vsub.f32 %v2896_v35, %v2896_v35  ;;  %v7102_v29 = vand.u32 4294901760, %v7062_v53  ;;  %v2910_v35 = vsel %vm6751_vm10, 1.0, %v7049_v48  ;;  %v7115_v31 = vld [vmem:[#allocation51_spill] sm:$0xff] }
  0xaa   :  { %1184 = vmatprep.mubr.f32.mxu1 %v7089_v24  ;;  %1367 = vmatmul.mubr.f32.vlgmr.msra.gmra.mxu0 %v7090_v58  ;;  %v7103_v24 = vld [vmem:[#allocation47_spill] sm:$0xff]  ;;  %v5252_v53 = vsub.f32 %v5114_v18, %v6721_v59  ;;  %v5269_v45 = vsub.f32 %v2895_v62, %v2895_v62  ;;  %v6730_v62 = vand.u32 4294901760, %v5131_v17  ;;  %v5300_v21 = vsub.f32 %v2910_v35, %v2910_v35 }
  0xab   :  { %3413 = vmatpush3.msk.msra.mxu1 %vm7092_vm0, %v6905_v61  ;;  %3446 = vmatprep.subr.msk.mxu0 %vm6716_vm3, %v6905_v61  ;;  %vm7095_vm0 = vcmp.eq.s32.totalorder %v7094_v4, %v3902_v14  ;;  %vm6742_vm3 = vcmp.eq.s32.totalorder %v5104_v25, %v4934_v13  ;;  %v5258_v4 = vadd.s32 432, %v7013_v54  ;;  %v5340_v35 = vadd.s32 296, %v7013_v54 }
  0xac   :  { %1188 = vmatmul.mubr.f32.gmra.mxu1 %v7093_v41  ;;  %3414 = vmatprep.subr.msk.mxu1 %vm7095_vm0, %v6905_v61  ;;  %vm7097_vm0 = vcmp.eq.s32.totalorder %v6991_v0, %v3902_v14  ;;  %v2911_v11 = vsel %vm6742_vm3, 1.0, %v7049_v48  ;;  %v6728_v41 = vand.u32 4294901760, %v5129_v38  ;;  %7108 = vst [vmem:[#allocation15_spill] sm:$0xff] %v5269_v45  ;;  %7112 = vst [vmem:[#allocation13_spill] sm:$0xff] %v5300_v21  ;;  %v7122_v59 = vand.u32 4294901760, %v5147_v34 }
  0xad   :  { %3447 = vmatpush3.msk.msra.mxu0 %vm6827_vm4, %v6905_v61  ;;  %3415 = vmatpush3.msk.msra.mxu1 %vm7097_vm0, %v6905_v61  ;;  %vm7100_vm0 = vcmp.eq.s32.totalorder %v6996_v50, %v3902_v14  ;;  %v5224_v50 = vadd.s32 312, %v7013_v54  ;;  %7105 = vst [vmem:[#allocation45_spill] sm:$0xff] %v5258_v4  ;;  %7117 = vst [vmem:[#allocation14_spill] sm:$0xff] %v5340_v35  ;;  %v5353_v0 = vsub.f32 %v5131_v17, %v6730_v62 }
  0xae   :  { %3448 = vmatprep.subr.msk.mxu0 %vm6720_vm6, %v6905_v61  ;;  %1372 = vmatprep.mubr.f32.mxu0 %v7099_v7  ;;  %vm151_vm6 = vcmp.eq.s32.totalorder %v5189_v52, %v4934_v13  ;;  %v5383_v42 = vsub.f32 %v5147_v34, %v7122_v59  ;;  %v5397_v59 = vadd.s32 288, %v7013_v54  ;;  %v7129_v37 = vand.u32 4294901760, %v5196_v57  ;;  %v295_v52 = vld [vmem:[#allocation2 + $0x38] sm:$0xff] }
  0xaf   :  { %3416 = vmatprep.subr.msk.mxu1 %vm7100_vm0, %v6905_v61  ;;  %3449 = vmatpush3.msk.msra.mxu0 %vm6719_vm8, %v6905_v61  ;;  %7101 = vst [vmem:[#allocation41_spill] sm:$0xff] %v5224_v50  ;;  %vm6761_vm0 = vcmp.eq.s32.totalorder %v5174_v6, %v4934_v13  ;;  %vm7104_vm8 = vcmp.eq.s32.totalorder %v7001_v47, %v3902_v14  ;;  %v7106_v47 = vand.u32 4294901760, %v7065_v20  ;;  %v7137_v25 = vand.u32 4294901760, %v5233_v32 }
  0xb0   :  { %1195 = vmatprep.mubr.f32.mxu1 %v7102_v29  ;;  %1374 = vmatmul.mubr.f32.gmra.mxu0 %v7103_v24  ;;  %v5266_v29 = vsub.f32 %v2911_v11, %v2911_v11  ;;  %v5289_v11 = vsub.f32 %v5116_v55, %v6725_v12  ;;  %v2909_v12 = vsel %vm151_vm6, 1.0, %v7049_v48  ;;  %v5321_v20 = vsub.f32 %v5129_v38, %v6728_v41 }
  0xb1   :  { %3417 = vmatpush3.msk.msra.mxu1 %vm7104_vm8, %v6905_v61  ;;  %3450 = vmatprep.subr.msk.mxu0 %vm157_vm12, %v6905_v61  ;;  %vm7107_vm8 = vcmp.eq.s32.totalorder %v7004_v33, %v3902_v14  ;;  %v2894_v33 = vsel %vm6761_vm0, 1.0, %v7049_v48  ;;  %7125 = vst [vmem:[#allocation50_spill] sm:$0xff] %v5397_v59  ;;  %v7140_v32 = vand.u32 4294901760, %v5252_v53 }
  0xb2   :  { %1199 = vmatmul.mubr.f32.gmra.mxu1 %v7106_v47  ;;  %3418 = vmatprep.subr.msk.mxu1 %vm7107_vm8, %v6905_v61  ;;  %vm6762_vm8 = vcmp.eq.s32.totalorder %v5224_v50, %v4934_v13  ;;  %v7111_v47 = vld [vmem:[#allocation49_spill] sm:$0xff]  ;;  %v5331_v36 = vsub.f32 %v2894_v33, %v2894_v33  ;;  %v1929_v14 = vand.u32 4294901760, %v5289_v11  ;;  %v5348_v33 = vsub.f32 %v2909_v12, %v2909_v12 }
  0xb3   :  { %3451 = vmatpush3.msk.msra.mxu0 %vm141_vm1, %v6905_v61  ;;  %3419 = vmatpush3.msk.msra.mxu1 %vm97_vm13, %v6905_v61  ;;  %vm6771_vm13 = vcmp.eq.s32.totalorder %v5258_v4, %v4934_v13  ;;  %v2893_v41 = vsel %vm6762_vm8, 1.0, %v7049_v48  ;;  %v5369_v11 = vadd.s32 416, %v7013_v54  ;;  %v7124_v12 = vld [vmem:[#allocation53_spill] sm:$0xff] }
  0xb4   :  { %3452 = vmatprep.subr.msk.mxu0 %vm156_vm2, %v6905_v61  ;;  %1379 = vmatprep.mubr.f32.mxu0 %v7111_v47  ;;  %7116 = vst [vmem:[#allocation30_spill] sm:$0xff] %v5331_v36  ;;  %7118 = vst [vmem:[#allocation48_spill] sm:$0xff] %v5348_v33  ;;  %v5378_v62 = vsub.f32 %v2893_v41, %v2893_v41  ;;  %v5411_v41 = vsub.f32 %v5196_v57, %v7129_v37  ;;  %v7147_v43 = vand.u32 4294901760, %v5331_v36 }
  0xb5   :  { %3420 = vmatprep.subr.msk.mxu1 %vm112_vm14, %v6905_v61  ;;  %3453 = vmatpush3.msk.msra.mxu0 %vm6859_vm5, %v6905_v61  ;;  %vm6788_vm14 = vcmp.eq.s32.totalorder %v5272_v16, %v4934_v13  ;;  %7119 = vst [vmem:[#allocation31_spill] sm:$0xff] %v5369_v11  ;;  %v5597_v16 = vadd.s32 384, %v7013_v54 }
  0xb6   :  { %1381 = vmatmul.mubr.f32.gmra.mxu0 %v7115_v31  ;;  %3421 = vmatpush3.msk.msra.mxu1 %vm96_vm15, %v6905_v61  ;;  %vm6787_vm15 = vcmp.eq.s32.totalorder %v5307_v46, %v4934_v13  ;;  %7121 = vst [vmem:[#allocation32_spill] sm:$0xff] %v5378_v62  ;;  %v2892_v60 = vsel %vm6788_vm14, 1.0, %v7049_v48  ;;  %v7165_v46 = vld [vmem:[#allocation62_spill] sm:$0xff] }
  0xb7   :  { %1518 = vmatprep.mubr.f32.mxu1 %v7085_v63  ;;  %3454 = vmatprep.subr.msk.mxu0 %vm6733_vm7, %v6905_v61  ;;  %v2908_v63 = vsel %vm6771_vm13, 1.0, %v7049_v48  ;;  %vm7126_vm7 = vcmp.eq.s32.totalorder %v5048_v1, %v4934_v13  ;;  %v5444_v1 = vadd.s32 280, %v7013_v54  ;;  %7157 = vst [vmem:[#allocation40_spill] sm:$0xff] %v5597_v16 }
  0xb8   :  { %1520 = vmatmul.mubr.f32.vlgmr.msra.gmra.mxu1 %v7090_v58  ;;  %3455 = vmatpush3.msk.msra.mxu0 %vm6729_vm9, %v6905_v61  ;;  %vm7120_vm9 = vcmp.eq.s32.totalorder %v5045_v44, %v4934_v13  ;;  %v1817_v58 = vand.u32 4294901760, %v5321_v20  ;;  %v5406_v44 = vsub.f32 %v2908_v63, %v2908_v63  ;;  %v2907_v20 = vsel %vm6787_vm15, 1.0, %v7049_v48 }
  0xb9   :  { %3502 = vmatprep.subr.mxu1 %v1908_v19  ;;  %3456 = vmatprep.subr.msk.mxu0 %vm7120_vm9, %v6905_v61  ;;  %v7123_v19 = vand.u32 4294901760, %v5136_v22  ;;  %vm6784_vm9 = vcmp.eq.s32.totalorder %v5340_v35, %v4934_v13  ;;  %v7127_v22 = vand.u32 4294901760, %v5160_v3  ;;  %v7131_v3 = vand.u32 4294901760, %v5199_v8  ;;  %7134 = vst [vmem:[#allocation57_spill] sm:$0xff] %v5444_v1  ;;  %v7163_v35 = vld [vmem:[#allocation61_spill] sm:$0xff] }
  0xba   :  { %1386 = vmatprep.mubr.f32.mxu0 %v7124_v12  ;;  %3457 = vmatpush3.msk.msra.mxu0 %vm7126_vm7, %v6905_v61  ;;  %7128 = vst [vmem:[#allocation52_spill] sm:$0xff] %v5406_v44  ;;  %vm148_vm7 = vcmp.eq.s32.totalorder %v5369_v11, %v4934_v13  ;;  %v5428_v63 = vadd.s32 408, %v7013_v54  ;;  %v2891_v37 = vsel %vm6784_vm9, 1.0, %v7049_v48  ;;  %v5471_v51 = vsub.f32 %v2907_v20, %v2907_v20  ;;  %v299_v11 = vld [vmem:[#allocation2 + $0x58] sm:$0xff] }
  0xbb   :  { %3503 = vmatpush3.msra.mxu1 %v7123_v19  ;;  %v1936_v19 = vand.u32 4294901760, %v5353_v0  ;;  %1388 = vmatmul.mubr.f32.gmra.mxu0 %v7130_v40  ;;  %v5422_v0 = vsub.f32 %v5199_v8, %v7131_v3  ;;  %v5437_v3 = vsub.f32 %v2892_v60, %v2892_v60  ;;  %v7136_v60 = vand.u32 4294901760, %v5269_v45 }
  0xbc   :  { %3504 = vmatprep.subr.mxu1 %v7127_v22  ;;  %1525 = vmatprep.mubr.f32.mxu1 %v7099_v7  ;;  %7132 = vst [vmem:[#allocation8_spill] sm:$0xff] %v5428_v63  ;;  %v7133_v7 = vand.u32 4294901760, %v5204_v9  ;;  %v1824_v22 = vand.u32 4294901760, %v5383_v42  ;;  %v7135_v9 = vand.u32 4294901760, %v5266_v29  ;;  %7138 = vst [vmem:[#allocation60_spill] sm:$0xff] %v5471_v51  ;;  %v5484_v15 = vsub.f32 %v2891_v37, %v2891_v37 }
  0xbd   :  { %3458 = vmatprep.subr.msk.mxu0 %vm6742_vm3, %v6905_v61  ;;  %1527 = vmatmul.mubr.f32.gmra.mxu1 %v7103_v24  ;;  %vm132_vm3 = vcmp.eq.s32.totalorder %v5397_v59, %v4934_v13  ;;  %v1831_v24 = vand.u32 4294901760, %v5422_v0  ;;  %v5505_v37 = vadd.s32 272, %v7013_v54  ;;  %v290_v0 = vld [vmem:[#allocation2 + $0x10] sm:$0xff] }
  0xbe   :  { %3505 = vmatpush3.msra.mxu1 %v7133_v7  ;;  %3459 = vmatpush3.msk.msra.mxu0 %vm6752_vm11, %v6905_v61  ;;  %v5454_v42 = vsub.f32 %v5266_v29, %v7135_v9  ;;  %v5459_v7 = vsub.f32 %v5269_v45, %v7136_v60  ;;  %v1943_v9 = vand.u32 4294901760, %v5411_v41  ;;  %v2906_v60 = vsel %vm148_vm7, 1.0, %v7049_v48  ;;  %7142 = vst [vmem:[#allocation66_spill] sm:$0xff] %v5484_v15  ;;  %v298_v59 = vld [vmem:[#allocation2 + $0x50] sm:$0xff] }
  0xbf   :  { %3506 = vmatprep.subr.mxu1 %v7137_v25  ;;  %3460 = vmatprep.subr.msk.mxu0 %vm6751_vm10, %v6905_v61  ;;  %v7141_v25 = vld [vmem:[#allocation55_spill] sm:$0xff]  ;;  %v7143_v41 = vand.u32 4294901760, %v5300_v21  ;;  %vm147_vm10 = vcmp.eq.s32.totalorder %v5428_v63, %v4934_v13  ;;  %v2890_v53 = vsel %vm132_vm3, 1.0, %v7049_v48  ;;  %vm131_vm11 = vcmp.eq.s32.totalorder %v5444_v1, %v4934_v13  ;;  %7144 = vst [vmem:[#allocation67_spill] sm:$0xff] %v5505_v37 }
  0xc0   :  { %3507 = vmatpush3.msra.mxu1 %v7140_v32  ;;  %1393 = vmatprep.mubr.f32.mxu0 %v7141_v25  ;;  %v7145_v32 = vld [vmem:[#allocation56_spill] sm:$0xff]  ;;  %v1838_v6 = vand.u32 4294901760, %v5459_v7  ;;  %v5558_v50 = vand.u32 4294901760, %v290_v0 }
  0xc1   :  { %v5489_v20 = vsub.f32 %v5300_v21, %v7143_v41  ;;  %3461 = vmatpush3.msk.msra.mxu0 %vm6761_vm0, %v6905_v61  ;;  %3508 = vmatprep.subr.mxu1 %v1929_v14  ;;  %v1950_v41 = vand.u32 4294901760, %v5454_v42  ;;  %v5510_v14 = vsub.f32 %v2906_v60, %v2906_v60  ;;  %v5516_v21 = vsub.f32 %v5331_v36, %v7147_v43  ;;  %v7152_v42 = vld [vmem:[#allocation58_spill] sm:$0xff]  ;;  %v7155_v36 = vld [vmem:[#allocation59_spill] sm:$0xff] }
  0xc2   :  { %1395 = vmatmul.mubr.f32.gmra.mxu0 %v7145_v32  ;;  %1532 = vmatprep.mubr.f32.mxu1 %v7111_v47  ;;  %v2905_v47 = vsel %vm147_vm10, 1.0, %v7049_v48  ;;  %vm146_vm0 = vcmp.eq.s32.totalorder %v5478_v39, %v4934_v13  ;;  %v5530_v43 = vadd.s32 392, %v7013_v54  ;;  %v2889_v60 = vsel %vm131_vm11, 1.0, %v7049_v48  ;;  %7151 = vst [vmem:[#allocation42_spill] sm:$0xff] %v5558_v50 }
  0xc3   :  { %7146 = vst [vmem:[#allocation19_spill] sm:$0xff] %v5510_v14  ;;  %3462 = vmatprep.subr.msk.mxu0 %vm151_vm6, %v6905_v61  ;;  %3509 = vmatpush3.msra.mxu1 %v1817_v58  ;;  %v5537_v58 = vsub.f32 %v2890_v53, %v2890_v53  ;;  %v1957_v7 = vand.u32 4294901760, %v5489_v20  ;;  %v5556_v20 = vand.u32 4294901760, %v291_v49  ;;  %v1845_v4 = vand.u32 4294901760, %v5516_v21 }
  0xc4   :  { %7148 = vst [vmem:[#allocation39_spill] sm:$0xff] %v5530_v43  ;;  %1534 = vmatmul.mubr.f32.gmra.mxu1 %v7115_v31  ;;  %3463 = vmatpush3.msk.msra.mxu0 %vm6762_vm8, %v6905_v61  ;;  %v7149_v31 = vand.u32 4294901760, %v5348_v33  ;;  %vm130_vm8 = vcmp.eq.s32.totalorder %v5505_v37, %v4934_v13  ;;  %v5583_v21 = vadd.s32 264, %v7013_v54 }
  0xc5   :  { %3510 = vmatprep.subr.mxu1 %v1936_v19  ;;  %3464 = vmatprep.subr.msk.mxu0 %vm6771_vm13, %v6905_v61  ;;  %7150 = vst [vmem:[#allocation20_spill] sm:$0xff] %v5556_v20  ;;  %v5561_v19 = vsub.f32 %v2905_v47, %v2905_v47  ;;  %v7153_v47 = vand.u32 4294901760, %v5378_v62  ;;  %vm145_vm13 = vcmp.eq.s32.totalorder %v5530_v43, %v4934_v13 }
  0xc6   :  { %v5552_v53 = vsub.f32 %v5348_v33, %v7149_v31  ;;  %3511 = vmatpush3.msra.mxu1 %v1824_v22  ;;  %1400 = vmatprep.mubr.f32.mxu0 %v7152_v42  ;;  %v2904_v31 = vsel %vm146_vm0, 1.0, %v7049_v48  ;;  %v5573_v22 = vsub.f32 %v2889_v60, %v2889_v60  ;;  %7154 = vst [vmem:[#allocation21_spill] sm:$0xff] %v5583_v21  ;;  %v7156_v60 = vand.u32 4294901760, %v5406_v44 }
  0xc7   :  { %3465 = vmatpush3.msk.msra.mxu0 %vm6788_vm14, %v6905_v61  ;;  %3512 = vmatprep.subr.mxu1 %v1943_v9  ;;  %v5578_v33 = vsub.f32 %v5378_v62, %v7153_v47  ;;  %v2888_v9 = vsel %vm130_vm8, 1.0, %v7049_v48  ;;  %v5600_v62 = vadd.s32 256, %v7013_v54  ;;  %v5607_v45 = vsub.f32 %v2904_v31, %v2904_v31 }
  0xc8   :  { %1402 = vmatmul.mubr.f32.gmra.mxu0 %v7155_v36  ;;  %1539 = vmatprep.mubr.f32.mxu1 %v7124_v12  ;;  %v5594_v47 = vsub.f32 %v5406_v44, %v7156_v60  ;;  %v1964_v12 = vand.u32 4294901760, %v5552_v53  ;;  %v5610_v23 = vsub.f32 %v291_v49, %v5556_v20  ;;  %v5613_v60 = vsub.f32 %v290_v0, %v5558_v50  ;;  %v294_v44 = vld [vmem:[#allocation2 + $0x30] sm:$0xff] }
  0xc9   :  { %7158 = vst [vmem:[#allocation38_spill] sm:$0xff] %v5600_v62  ;;  %3466 = vmatprep.subr.msk.mxu0 %vm6787_vm15, %v6905_v61  ;;  %3513 = vmatpush3.msra.mxu1 %v1831_v24  ;;  %v2903_v54 = vsel %vm145_vm13, 1.0, %v7049_v48  ;;  %v7161_v24 = vand.u32 4294901760, %v5437_v3  ;;  %v5630_v53 = vand.u32 4294901760, %v295_v52  ;;  %v5637_v31 = vsub.f32 %v2888_v9, %v2888_v9 }
  0xca   :  { %7159 = vst [vmem:[#allocation22_spill] sm:$0xff] %v5610_v23  ;;  %7160 = vst [vmem:[#allocation43_spill] sm:$0xff] %v5613_v60  ;;  %1541 = vmatmul.mubr.f32.gmra.mxu1 %v7130_v40  ;;  %3467 = vmatpush3.msk.msra.mxu0 %vm6784_vm9, %v6905_v61  ;;  %v1852_v40 = vand.u32 4294901760, %v5578_v33  ;;  %vm129_vm9 = vcmp.eq.s32.totalorder %v5583_v21, %v4934_v13  ;;  %vm144_vm15 = vcmp.eq.s32.totalorder %v5597_v16, %v4934_v13 }
  0xcb   :  { %v5627_v49 = vsub.f32 %v5437_v3, %v7161_v24  ;;  %7162 = vst [vmem:[#allocation24_spill] sm:$0xff] %v5630_v53  ;;  %3514 = vmatprep.subr.mxu1 %v1950_v41  ;;  %3468 = vmatprep.subr.msk.mxu0 %vm148_vm7, %v6905_v61  ;;  %vm6825_vm14 = vcmp.eq.s32.totalorder %v5600_v62, %v4934_v13  ;;  %v5648_v0 = vand.u32 4294901760, %v294_v44 }
  0xcc   :  { %3515 = vmatpush3.msra.mxu1 %v1838_v6  ;;  %1407 = vmatprep.mubr.f32.mxu0 %v7163_v35  ;;  %v1971_v6 = vand.u32 4294901760, %v5594_v47  ;;  %v5655_v33 = vsub.f32 %v2903_v54, %v2903_v54  ;;  %v7166_v47 = vand.u32 4294901760, %v5471_v51  ;;  %v5670_v9 = vsub.f32 %v295_v52, %v5630_v53 }
  0xcd   :  { %7164 = vst [vmem:[#allocation26_spill] sm:$0xff] %v5648_v0  ;;  %3469 = vmatpush3.msk.msra.mxu0 %vm132_vm3, %v6905_v61  ;;  %3516 = vmatprep.subr.mxu1 %v1957_v7  ;;  %v1859_v41 = vand.u32 4294901760, %v5627_v49  ;;  %v2887_v7 = vsel %vm129_vm9, 1.0, %v7049_v48  ;;  %v7167_v49 = vand.u32 4294901760, %v5484_v15  ;;  %v2886_v52 = vsel %vm6825_vm14, 1.0, %v7049_v48 }
  0xce   :  { %1409 = vmatmul.mubr.f32.gmra.mxu0 %v7165_v46  ;;  %1546 = vmatprep.mubr.f32.mxu1 %v7141_v25  ;;  %v1977_v54 = vsub.f32 %v5471_v51, %v7166_v47  ;;  %v2902_v25 = vsel %vm144_vm15, 1.0, %v7049_v48  ;;  %v5700_v48 = vand.u32 4294901760, %v299_v11  ;;  %v7170_v47 = vand.u32 4294901760, %v5610_v23 }
  0xcf   :  { %3470 = vmatprep.subr.msk.mxu0 %vm147_vm10, %v6905_v61  ;;  %3517 = vmatpush3.msra.mxu1 %v1845_v4  ;;  %v1865_v24 = vsub.f32 %v5484_v15, %v7167_v49  ;;  %v7168_v4 = vand.u32 4294901760, %v5510_v14  ;;  %v5698_v15 = vsub.f32 %v294_v44, %v5648_v0  ;;  %v5716_v51 = vsub.f32 %v2902_v25, %v2902_v25  ;;  %v303_v25 = vld [vmem:[#allocation2 + $0x78] sm:$0xff] }
  0xd0   :  { %1548 = vmatmul.mubr.f32.gmra.mxu1 %v7145_v32  ;;  %3471 = vmatpush3.msk.msra.mxu0 %vm131_vm11, %v6905_v61  ;;  %7169 = vst [vmem:[#allocation44_spill] sm:$0xff] %v5700_v48  ;;  %v5706_v32 = vsub.f32 %v2887_v7, %v2887_v7  ;;  %v1673_v1 = vsub.f32 %v5610_v23, %v7170_v47  ;;  %v5719_v7 = vand.u32 4294901760, %v298_v59  ;;  %v7177_v23 = vand.u32 4294901760, %v5561_v19 }
  0xd1   :  { %v1984_v63 = vsub.f32 %v5510_v14, %v7168_v4  ;;  %3518 = vmatprep.subr.mxu1 %v1964_v12  ;;  %3472 = vmatprep.subr.msk.mxu0 %vm146_vm0, %v6905_v61  ;;  %v7171_v4 = vand.u32 4294901760, %v5613_v60  ;;  %v7172_v14 = vld [vmem:[#allocation64_spill] sm:$0xff]  ;;  %v1978_v12 = vand.u32 4294901760, %v1977_v54  ;;  %v1866_v47 = vand.u32 4294901760, %v1865_v24 }
  0xd2   :  { %3519 = vmatpush3.msra.mxu1 %v1852_v40  ;;  %1414 = vmatprep.mubr.f32.mxu0 %v7172_v14  ;;  %7173 = vst [vmem:[#allocation47_spill] sm:$0xff] %v5719_v7  ;;  %v7175_v40 = vand.u32 4294901760, %v5537_v58  ;;  %v1991_v37 = vsub.f32 %v5561_v19, %v7177_v23  ;;  %v302_v23 = vld [vmem:[#allocation2 + $0x70] sm:$0xff]  ;;  %v7182_v54 = vand.u32 4294901760, %v5607_v45  ;;  %v6821_v21 = vand.u32 4294901760, %v5716_v51 }
  0xd3   :  { %v1679_v49 = vsub.f32 %v5613_v60, %v7171_v4  ;;  %3473 = vmatpush3.msk.msra.mxu0 %vm130_vm8, %v6905_v61  ;;  %3520 = vmatprep.subr.mxu1 %v1971_v6  ;;  %v5725_v4 = vsub.f32 %v2886_v52, %v2886_v52  ;;  %v7176_v60 = vld [vmem:[#allocation65_spill] sm:$0xff]  ;;  %v1985_v39 = vand.u32 4294901760, %v1984_v63  ;;  %v5738_v6 = vsub.f32 %v299_v11, %v5700_v48 }
  0xd4   :  { %v1872_v44 = vsub.f32 %v5537_v58, %v7175_v40  ;;  %1416 = vmatmul.mubr.f32.gmra.mxu0 %v7176_v60  ;;  %1553 = vmatprep.mubr.f32.mxu1 %v7152_v42  ;;  %v1674_v52 = vand.u32 4294901760, %v1673_v1  ;;  %v7178_v42 = vand.u32 4294901760, %v5573_v22  ;;  %v7179_v11 = vand.u32 4294901760, %v5670_v9 }
  0xd5   :  { %7174 = vst [vmem:[#allocation36_spill] sm:$0xff] %v5725_v4  ;;  %3474 = vmatprep.subr.msk.mxu0 %vm145_vm13, %v6905_v61  ;;  %3521 = vmatpush3.msra.mxu1 %v1859_v41  ;;  %v1680_v40 = vand.u32 4294901760, %v1679_v49  ;;  %v5758_v49 = vsub.f32 %v298_v59, %v5719_v7  ;;  %v1998_v24 = vsub.f32 %v5607_v45, %v7182_v54  ;;  %v1992_v59 = vand.u32 4294901760, %v1991_v37  ;;  %v307_v37 = vld [vmem:[#allocation2 + $0x98] sm:$0xff] }
  0xd6   :  { %v1879_v63 = vsub.f32 %v5573_v22, %v7178_v42  ;;  %1555 = vmatmul.mubr.f32.gmra.mxu1 %v7155_v36  ;;  %3475 = vmatpush3.msk.msra.mxu0 %vm129_vm9, %v6905_v61  ;;  %v1688_v41 = vsub.f32 %v5670_v9, %v7179_v11  ;;  %v5760_v42 = vand.u32 4294901760, %v303_v25  ;;  %v1873_v36 = vand.u32 4294901760, %v1872_v44 }
  0xd7   :  { %7180 = vst [vmem:[#allocation49_spill] sm:$0xff] %v5758_v49  ;;  %3522 = vmatprep.subr.mxu1 %v1978_v12  ;;  %3476 = vmatprep.subr.msk.mxu0 %vm144_vm15, %v6905_v61  ;;  %v7183_v12 = vand.u32 4294901760, %v5698_v15  ;;  %v5778_v44 = vand.u32 4294901760, %v302_v23  ;;  %v7185_v11 = vand.u32 4294901760, %v5637_v31  ;;  %v7186_v16 = vand.u32 4294901760, %v5655_v33 }
  0xd8   :  { %7181 = vst [vmem:[#allocation37_spill] sm:$0xff] %v5760_v42  ;;  %3523 = vmatpush3.msra.mxu1 %v1866_v47  ;;  %3477 = vmatpush3.msk.msra.mxu0 %vm6825_vm14, %v6905_v61  ;;  %v1880_v54 = vand.u32 4294901760, %v1879_v63  ;;  %v1999_v63 = vand.u32 4294901760, %v1998_v24  ;;  %vm7200_vm14 = vcmp.eq.s32.totalorder %v4901_v10, %v4934_v13 }
  0xd9   :  { %v1694_v1 = vsub.f32 %v5698_v15, %v7183_v12  ;;  %7184 = vst [vmem:[#allocation51_spill] sm:$0xff] %v5778_v44  ;;  %1675 = vmatprep.mubr.f32.mxu0 %v1674_v52  ;;  %3524 = vmatprep.subr.mxu1 %v1985_v39  ;;  %v1886_v47 = vsub.f32 %v5637_v31, %v7185_v11  ;;  %v1689_v12 = vand.u32 4294901760, %v1688_v41  ;;  %v6822_v39 = vand.u32 4294901760, %v5758_v49 }
  0xda   :  { %1560 = vmatprep.mubr.f32.mxu1 %v7163_v35  ;;  %1681 = vmatmul.mubr.f32.vlgmr.msra.gmra.mxu0 %v1680_v40  ;;  %v2005_v43 = vsub.f32 %v5655_v33, %v7186_v16  ;;  %v5791_v52 = vsub.f32 %v303_v25, %v5760_v42  ;;  %v7187_v11 = vand.u32 4294901760, %v5706_v32  ;;  %v306_v35 = vld [vmem:[#allocation2 + $0x90] sm:$0xff]  ;;  %v7188_v16 = vand.u32 4294901760, %v5738_v6 }
  0xdb   :  { %3525 = vmatpush3.msra.mxu1 %v1873_v36  ;;  %3558 = vmatprep.subr.mxu0 %v5006_v27  ;;  %v1695_v40 = vand.u32 4294901760, %v1694_v1  ;;  %v5802_v25 = vsub.f32 %v302_v23, %v5778_v44  ;;  %v5804_v36 = vand.u32 4294901760, %v307_v37  ;;  %v1887_v24 = vand.u32 4294901760, %v1886_v47 }
  0xdc   :  { %v1893_v62 = vsub.f32 %v5706_v32, %v7187_v11  ;;  %1562 = vmatmul.mubr.f32.gmra.mxu1 %v7165_v46  ;;  %3526 = vmatprep.subr.mxu1 %v1992_v59  ;;  %v1703_v41 = vsub.f32 %v5738_v6, %v7188_v16  ;;  %v2012_v11 = vsub.f32 %v5716_v51, %v6821_v21  ;;  %v7190_v46 = vand.u32 4294901760, %v5725_v4  ;;  %v311_v21 = vld [vmem:[#allocation2 + $0xb8] sm:$0xff] }
  0xdd   :  { %7189 = vst [vmem:[#allocation53_spill] sm:$0xff] %v5804_v36  ;;  %3559 = vmatpush3.msra.mxu0 %v5013_v26  ;;  %3527 = vmatpush3.msra.mxu1 %v1880_v54  ;;  %v2006_v59 = vand.u32 4294901760, %v2005_v43  ;;  %v1709_v23 = vsub.f32 %v5758_v49, %v6822_v39  ;;  %v5818_v54 = vand.u32 4294901760, %v306_v35  ;;  %v5824_v43 = vsub.f32 %v307_v37, %v5804_v36  ;;  %v310_v49 = vld [vmem:[#allocation2 + $0xb0] sm:$0xff] }
  0xde   :  { %v1900_v1 = vsub.f32 %v5725_v4, %v7190_v46  ;;  %3560 = vmatprep.subr.mxu0 %v5015_v28  ;;  %1690 = vmatprep.mubr.f32.mxu0 %v1689_v12  ;;  %v1894_v47 = vand.u32 4294901760, %v1893_v62  ;;  %v1704_v46 = vand.u32 4294901760, %v1703_v41  ;;  %v6829_v12 = vand.u32 4294901760, %v5802_v25 }
  0xdf   :  { %7191 = vst [vmem:[#allocation54_spill] sm:$0xff] %v5818_v54  ;;  %3528 = vmatprep.subr.mxu1 %v1999_v63  ;;  %3561 = vmatpush3.msra.mxu0 %v5056_v2  ;;  %7192 = vst [vmem:[#allocation55_spill] sm:$0xff] %v5824_v43  ;;  %v2013_v39 = vand.u32 4294901760, %v2012_v11  ;;  %v1710_v62 = vand.u32 4294901760, %v1709_v23  ;;  %v7193_v63 = vand.u32 4294901760, %v5791_v52  ;;  %v5834_v41 = vand.u32 4294901760, %v311_v21 }
  0xe0   :  { %1567 = vmatprep.mubr.f32.mxu1 %v7172_v14  ;;  %1696 = vmatmul.mubr.f32.gmra.mxu0 %v1695_v40  ;;  %v1901_v16 = vand.u32 4294901760, %v1900_v1  ;;  %v5832_v40 = vsub.f32 %v306_v35, %v5818_v54  ;;  %v6828_v37 = vand.u32 4294901760, %v5824_v43  ;;  %v315_v35 = vld [vmem:[#allocation2 + $0xd8] sm:$0xff]  ;;  %v314_v23 = vld [vmem:[#allocation2 + $0xd0] sm:$0xff] }
  0xe1   :  { %3529 = vmatpush3.msra.mxu1 %v1887_v24  ;;  %3562 = vmatprep.subr.mxu0 %v5063_v5  ;;  %v1718_v14 = vsub.f32 %v5791_v52, %v7193_v63  ;;  %7195 = vst [vmem:[#allocation58_spill] sm:$0xff] %v5834_v41  ;;  %v5842_v24 = vand.u32 4294901760, %v310_v49  ;;  %v319_v63 = vld [vmem:[#allocation2 + $0xf8] sm:$0xff] }
  0xe2   :  { %1569 = vmatmul.mubr.f32.gmra.mxu1 %v7176_v60  ;;  %3530 = vmatprep.subr.mxu1 %v2006_v59  ;;  %7194 = vst [vmem:[#allocation56_spill] sm:$0xff] %v5832_v40  ;;  %v1724_v60 = vsub.f32 %v5802_v25, %v6829_v12  ;;  %v6826_v1 = vand.u32 4294901760, %v5832_v40  ;;  %v5847_v59 = vsub.f32 %v311_v21, %v5834_v41  ;;  %v7206_v12 = vld [vmem:[#allocation15_spill] sm:$0xff] }
  0xe3   :  { %3563 = vmatpush3.msra.mxu0 %v5114_v18  ;;  %3531 = vmatpush3.msra.mxu1 %v1894_v47  ;;  %7196 = vst [vmem:[#allocation59_spill] sm:$0xff] %v5842_v24  ;;  %v1719_v11 = vand.u32 4294901760, %v1718_v14  ;;  %v5857_v47 = vsub.f32 %v310_v49, %v5842_v24 }
  0xe4   :  { %3564 = vmatprep.subr.mxu0 %v5116_v55  ;;  %1705 = vmatprep.mubr.f32.mxu0 %v1704_v46  ;;  %7197 = vst [vmem:[#allocation61_spill] sm:$0xff] %v5847_v59  ;;  %v5859_v46 = vand.u32 4294901760, %v315_v35  ;;  %v1739_v21 = vsub.f32 %v5832_v40, %v6826_v1  ;;  %v6836_v49 = vand.u32 4294901760, %v5847_v59  ;;  %v7204_v1 = vld [vmem:[#allocation23_spill] sm:$0xff] }
  0xe5   :  { %3532 = vmatprep.subr.mxu1 %v2013_v39  ;;  %3565 = vmatpush3.msra.mxu0 %v5129_v38  ;;  %v1725_v39 = vand.u32 4294901760, %v1724_v60  ;;  %7198 = vst [vmem:[#allocation62_spill] sm:$0xff] %v5857_v47  ;;  %v5899_v60 = vand.u32 4294901760, %v319_v63 }
  0xe6   :  { %1711 = vmatmul.mubr.f32.gmra.mxu0 %v1710_v62  ;;  %3533 = vmatpush3.msra.mxu1 %v1901_v16  ;;  %v1733_v16 = vsub.f32 %v5824_v43, %v6828_v37  ;;  %7199 = vst [vmem:[#allocation64_spill] sm:$0xff] %v5859_v46  ;;  %v5874_v62 = vand.u32 4294901760, %v314_v23  ;;  %v318_v37 = vld [vmem:[#allocation2 + $0xf0] sm:$0xff] }
  0xe7   :  { %2016 = vmatprep.mubr.f32.mxu1 %v5556_v20  ;;  %3566 = vmatprep.subr.mxu0 %v5131_v17  ;;  %7208 = vst [vmem:[#allocation15_spill] sm:$0xff] %v5899_v60  ;;  %v5914_v20 = vand.u32 4294901760, %v318_v37 }
  0xe8   :  { %2018 = vmatmul.mubr.f32.vlgmr.msra.gmra.mxu1 %v5558_v50  ;;  %3567 = vmatpush3.msra.mxu0 %v5147_v34  ;;  %7201 = vst [vmem:[#allocation65_spill] sm:$0xff] %v5874_v62  ;;  %v1734_v14 = vand.u32 4294901760, %v1733_v16  ;;  %v1748_v16 = vsub.f32 %v5847_v59, %v6836_v49  ;;  %v7210_v50 = vld [vmem:[#allocation13_spill] sm:$0xff]  ;;  %v7214_v59 = vld [vmem:[#allocation30_spill] sm:$0xff] }
  0xe9   :  { %3614 = vmatprep.subr.msk.mxu1 %vm7200_vm14, %v6905_v61  ;;  %3568 = vmatprep.subr.mxu0 %v5196_v57  ;;  %vm7202_vm14 = vcmp.eq.s32.totalorder %v4910_v56, %v4934_v13  ;;  %7213 = vst [vmem:[#allocation9_spill] sm:$0xff] %v5914_v20  ;;  %v7224_v49 = vld [vmem:[#allocation29_spill] sm:$0xff] }
  0xea   :  { %3615 = vmatpush3.msk.msra.mxu1 %vm6827_vm4, %v6905_v61  ;;  %1720 = vmatprep.mubr.f32.mxu0 %v1719_v11  ;;  %v5884_v11 = vsub.f32 %v315_v35, %v5859_v46  ;;  %vm7205_vm4 = vcmp.eq.s32.totalorder %v7204_v1, %v4934_v13  ;;  %v5897_v35 = vsub.f32 %v314_v23, %v5874_v62  ;;  %v1749_v43 = vand.u32 4294901760, %v1748_v16 }
  0xeb   :  { %3569 = vmatpush3.msra.mxu0 %v5199_v8  ;;  %3616 = vmatprep.subr.msk.mxu1 %vm7202_vm14, %v6905_v61  ;;  %vm7225_vm14 = vcmp.eq.s32.totalorder %v7224_v49, %v4934_v13  ;;  %v7236_v49 = vld [vmem:[#allocation19_spill] sm:$0xff] }
  0xec   :  { %1726 = vmatmul.mubr.f32.gmra.mxu0 %v1725_v39  ;;  %2023 = vmatprep.mubr.f32.mxu1 %v5630_v53  ;;  %7203 = vst [vmem:[#allocation68_spill] sm:$0xff] %v5884_v11  ;;  %v1740_v39 = vand.u32 4294901760, %v1739_v21  ;;  %7207 = vst [vmem:[#allocation23_spill] sm:$0xff] %v5897_v35  ;;  %v7212_v21 = vand.u32 4294901760, %v5857_v47 }
  0xed   :  { %3570 = vmatprep.subr.mxu0 %v5266_v29  ;;  %3617 = vmatpush3.msk.msra.mxu1 %vm7205_vm4, %v6905_v61 }
  0xee   :  { %2025 = vmatmul.mubr.f32.gmra.mxu1 %v5648_v0  ;;  %3571 = vmatpush3.msra.mxu0 %v7206_v12  ;;  %v1754_v23 = vsub.f32 %v5857_v47, %v7212_v21  ;;  %v5924_v0 = vsub.f32 %v319_v63, %v5899_v60  ;;  %v7217_v21 = vld [vmem:[#allocation48_spill] sm:$0xff]  ;;  %v7221_v63 = vld [vmem:[#allocation11_spill] sm:$0xff] }
  0xef   :  { %3618 = vmatprep.subr.msk.mxu1 %vm157_vm12, %v6905_v61  ;;  %3572 = vmatprep.subr.mxu0 %v7210_v50  ;;  %v7219_v47 = vld [vmem:[#allocation32_spill] sm:$0xff]  ;;  %vm7222_vm4 = vcmp.eq.s32.totalorder %v7221_v63, %v4934_v13 }
  0xf0   :  { %3619 = vmatpush3.msk.msra.mxu1 %vm141_vm1, %v6905_v61  ;;  %1735 = vmatprep.mubr.f32.mxu0 %v1734_v14  ;;  %7216 = vst [vmem:[#allocation13_spill] sm:$0xff] %v5924_v0  ;;  %v5937_v14 = vsub.f32 %v318_v37, %v5914_v20 }
  0xf1   :  { %3573 = vmatpush3.msra.mxu0 %v7214_v59  ;;  %3620 = vmatprep.subr.msk.mxu1 %vm156_vm2, %v6905_v61 }
  0xf2   :  { %1741 = vmatmul.mubr.f32.gmra.mxu0 %v1740_v39  ;;  %2030 = vmatprep.mubr.f32.mxu1 %v5700_v48  ;;  %v1755_v39 = vand.u32 4294901760, %v1754_v23  ;;  %v7220_v48 = vand.u32 4294901760, %v5884_v11  ;;  %v7226_v23 = vand.u32 4294901760, %v5897_v35 }
  0xf3   :  { %3574 = vmatprep.subr.mxu0 %v7217_v21  ;;  %3621 = vmatpush3.msk.msra.mxu1 %vm6859_vm5, %v6905_v61  ;;  %v7223_v21 = vld [vmem:[#allocation52_spill] sm:$0xff] }
  0xf4   :  { %2032 = vmatmul.mubr.f32.gmra.mxu1 %v5719_v7  ;;  %3575 = vmatpush3.msra.mxu0 %v7219_v47  ;;  %v1763_v16 = vsub.f32 %v5884_v11, %v7220_v48  ;;  %v1769_v48 = vsub.f32 %v5897_v35, %v7226_v23  ;;  %v7227_v7 = vld [vmem:[#allocation12_spill] sm:$0xff]  ;;  %v7232_v23 = vld [vmem:[#allocation66_spill] sm:$0xff]  ;;  %v7233_v35 = vand.u32 4294901760, %v5924_v0 }
  0xf5   :  { %3622 = vmatprep.subr.msk.mxu1 %vm7222_vm4, %v6905_v61  ;;  %3576 = vmatprep.subr.mxu0 %v7223_v21  ;;  %vm7228_vm4 = vcmp.eq.s32.totalorder %v7227_v7, %v4934_v13  ;;  %v7230_v21 = vld [vmem:[#allocation16_spill] sm:$0xff] }
  0xf6   :  { %3623 = vmatpush3.msk.msra.mxu1 %vm7225_vm14, %v6905_v61  ;;  %1750 = vmatprep.mubr.f32.mxu0 %v1749_v43  ;;  %v1764_v11 = vand.u32 4294901760, %v1763_v16  ;;  %v7229_v43 = vld [vmem:[#allocation60_spill] sm:$0xff]  ;;  %vm7231_vm14 = vcmp.eq.s32.totalorder %v7230_v21, %v4934_v13  ;;  %v1770_v37 = vand.u32 4294901760, %v1769_v48  ;;  %v7234_v16 = vld [vmem:[#allocation33_spill] sm:$0xff] }
  0xf7   :  { %3577 = vmatpush3.msra.mxu0 %v5437_v3  ;;  %3624 = vmatprep.subr.msk.mxu1 %vm7228_vm4, %v6905_v61  ;;  %vm7235_vm4 = vcmp.eq.s32.totalorder %v7234_v16, %v4934_v13 }
  0xf8   :  { %1756 = vmatmul.mubr.f32.gmra.mxu0 %v1755_v39  ;;  %2037 = vmatprep.mubr.f32.mxu1 %v5760_v42  ;;  %v1778_v39 = vsub.f32 %v5924_v0, %v7233_v35  ;;  %v7237_v42 = vld [vmem:[#allocation17_spill] sm:$0xff]  ;;  %v7240_v35 = vld [vmem:[#allocation34_spill] sm:$0xff] }
  0xf9   :  { %3578 = vmatprep.subr.mxu0 %v7229_v43  ;;  %3625 = vmatpush3.msk.msra.mxu1 %vm7231_vm14, %v6905_v61  ;;  %vm7238_vm14 = vcmp.eq.s32.totalorder %v7237_v42, %v4934_v13  ;;  %vm7241_vm5 = vcmp.eq.s32.totalorder %v7240_v35, %v4934_v13  ;;  %v7242_v42 = vld [vmem:[#allocation18_spill] sm:$0xff] }
  0xfa   :  { %2039 = vmatmul.mubr.f32.gmra.mxu1 %v5778_v44  ;;  %3579 = vmatpush3.msra.mxu0 %v7232_v23  ;;  %v7239_v44 = vand.u32 4294901760, %v5937_v14  ;;  %v1779_v0 = vand.u32 4294901760, %v1778_v39  ;;  %v7247_v39 = vld [vmem:[#allocation45_spill] sm:$0xff] }
  0xfb   :  { %3626 = vmatprep.subr.msk.mxu1 %vm7235_vm4, %v6905_v61  ;;  %3580 = vmatprep.subr.mxu0 %v7236_v49  ;;  %vm7243_vm4 = vcmp.eq.s32.totalorder %v7242_v42, %v4934_v13 }
  0xfc   :  { %3627 = vmatpush3.msk.msra.mxu1 %vm7238_vm14, %v6905_v61  ;;  %1765 = vmatprep.mubr.f32.mxu0 %v1764_v11  ;;  %v1784_v48 = vsub.f32 %v5937_v14, %v7239_v44  ;;  %vm7248_vm14 = vcmp.eq.s32.totalorder %v7247_v39, %v4934_v13 }
  0xfd   :  { %3581 = vmatpush3.msra.mxu0 %v5537_v58  ;;  %3628 = vmatprep.subr.msk.mxu1 %vm7241_vm5, %v6905_v61 }
  0xfe   :  { %1771 = vmatmul.mubr.f32.gmra.mxu0 %v1770_v37  ;;  %2044 = vmatprep.mubr.f32.mxu1 %v5804_v36  ;;  %v1785_v44 = vand.u32 4294901760, %v1784_v48  ;;  %v7245_v37 = vld [vmem:[#allocation41_spill] sm:$0xff]  ;;  %v7249_v48 = vld [vmem:[#allocation27_spill] sm:$0xff]  ;;  %v7263_v36 = vand.u32 4294901760, %v5015_v28  ;;  %v7267_v28 = vand.u32 4294901760, %v5063_v5  ;;  %v7271_v5 = vand.u32 4294901760, %v5116_v55 }
  0xff   :  { %3582 = vmatprep.subr.mxu0 %v5561_v19  ;;  %3629 = vmatpush3.msk.msra.mxu1 %vm7243_vm4, %v6905_v61  ;;  %vm7246_vm5 = vcmp.eq.s32.totalorder %v7245_v37, %v4934_v13  ;;  %vm7250_vm4 = vcmp.eq.s32.totalorder %v7249_v48, %v4934_v13 }
 0x100   :  { %2046 = vmatmul.mubr.f32.gmra.mxu1 %v5818_v54  ;;  %3583 = vmatpush3.msra.mxu0 %v5573_v22  ;;  %v7257_v54 = vld [vmem:[#allocation43_spill] sm:$0xff] }
 0x101   :  { %3630 = vmatprep.subr.msk.mxu1 %vm151_vm6, %v6905_v61  ;;  %3584 = vmatprep.subr.mxu0 %v5607_v45 }
 0x102   :  { %3631 = vmatpush3.msk.msra.mxu1 %vm7246_vm5, %v6905_v61  ;;  %1780 = vmatprep.mubr.f32.mxu0 %v1779_v0  ;;  %v7251_v0 = vld [vmem:[#allocation46_spill] sm:$0xff] }
 0x103   :  { %3585 = vmatpush3.msra.mxu0 %v5637_v31  ;;  %3632 = vmatprep.subr.msk.mxu1 %vm7248_vm14, %v6905_v61  ;;  %vm7252_vm5 = vcmp.eq.s32.totalorder %v7251_v0, %v4934_v13 }
 0x104   :  { %1786 = vmatmul.mubr.f32.gmra.mxu0 %v1785_v44  ;;  %2051 = vmatprep.mubr.f32.mxu1 %v5834_v41  ;;  %v7253_v44 = vld [vmem:[#allocation14_spill] sm:$0xff] }
 0x105   :  { %3586 = vmatprep.subr.mxu0 %v5655_v33  ;;  %3633 = vmatpush3.msk.msra.mxu1 %vm7250_vm4, %v6905_v61  ;;  %vm7254_vm14 = vcmp.eq.s32.totalorder %v7253_v44, %v4934_v13  ;;  %v7255_v41 = vld [vmem:[#allocation22_spill] sm:$0xff]  ;;  %v7259_v44 = vand.u32 4294901760, %v5006_v27 }
 0x106   :  { %2053 = vmatmul.mubr.f32.gmra.mxu1 %v5842_v24  ;;  %3587 = vmatpush3.msra.mxu0 %v5706_v32  ;;  %v7261_v24 = vand.u32 4294901760, %v5013_v26 }
 0x107   :  { %3634 = vmatprep.subr.msk.mxu1 %vm7252_vm5, %v6905_v61  ;;  %3588 = vmatprep.subr.mxu0 %v5716_v51  ;;  %vm7281_vm5 = vcmp.eq.s32.totalorder %v4901_v10, %v4934_v13 }
 0x108   :  { %3635 = vmatpush3.msk.msra.mxu1 %vm7254_vm14, %v6905_v61  ;;  %3589 = vmatpush3.msra.mxu0 %v5725_v4  ;;  %vm7283_vm14 = vcmp.eq.s32.totalorder %v4904_v30, %v4934_v13 }
 0x109   :  { %2202 = vmatprep.mubr.f32.mxu0 %v7255_v41  ;;  %3636 = vmatprep.subr.msk.mxu1 %vm148_vm7, %v6905_v61 }
 0x10a   :  { %2058 = vmatprep.mubr.f32.mxu1 %v5859_v46  ;;  %2205 = vmatmul.mubr.f32.vlgmr.msra.gmra.mxu0 %v7257_v54 }
 0x10b   :  { %3637 = vmatpush3.msk.msra.mxu1 %vm132_vm3, %v6905_v61  ;;  %3670 = vmatprep.subr.mxu0 %v7259_v44 }
 0x10c   :  { %2060 = vmatmul.mubr.f32.gmra.mxu1 %v5874_v62  ;;  %3638 = vmatprep.subr.msk.mxu1 %vm147_vm10, %v6905_v61  ;;  %v7265_v62 = vand.u32 4294901760, %v5056_v2  ;;  %v7269_v2 = vand.u32 4294901760, %v5114_v18 }
 0x10d   :  { %3671 = vmatpush3.msra.mxu0 %v7261_v24  ;;  %3639 = vmatpush3.msk.msra.mxu1 %vm131_vm11, %v6905_v61  ;;  %v3142_v27 = vpop.f32.mrf.mxu0 }
 0x10e   :  { %3672 = vmatprep.subr.mxu0 %v7263_v36  ;;  %2211 = vmatprep.mubr.f32.mxu0 %v5670_v9 }
 0x10f   :  { %3640 = vmatprep.subr.msk.mxu1 %vm146_vm0, %v6905_v61  ;;  %3673 = vmatpush3.msra.mxu0 %v7265_v62  ;;  %v3143_v26 = vpop.f32.mrf.mxu0  ;;  %v7279_v62 = vand.u32 4294901760, %v7257_v54 }
 0x110   :  { %2065 = vmatprep.mubr.f32.mxu1 %v5899_v60  ;;  %2214 = vmatmul.mubr.f32.gmra.mxu0 %v5698_v15  ;;  %v3144_v36 = vadd.f32 %v3143_v26, %v3142_v27  ;;  %v7273_v26 = vand.u32 4294901760, %v5129_v38  ;;  %v7280_v38 = vand.u32 4294901760, %v5147_v34 }
 0x111   :  { %3641 = vmatpush3.msk.msra.mxu1 %vm130_vm8, %v6905_v61  ;;  %3674 = vmatprep.subr.mxu0 %v7267_v28  ;;  %v7274_v28 = vld [vmem:[#allocation49_spill] sm:$0xff] }
 0x112   :  { %2067 = vmatmul.mubr.f32.gmra.mxu1 %v5914_v20  ;;  %3642 = vmatprep.subr.msk.mxu1 %vm145_vm13, %v6905_v61  ;;  %v7278_v20 = vand.u32 4294901760, %v5131_v17  ;;  %v7301_v40 = vand.u32 4294901760, %v7274_v28 }
 0x113   :  { %3675 = vmatpush3.msra.mxu0 %v7269_v2  ;;  %3643 = vmatpush3.msk.msra.mxu1 %vm129_vm9, %v6905_v61  ;;  %v3145_v60 = vpop.f32.mrf.mxu0  ;;  %v7275_v2 = vld [vmem:[#allocation38_spill] sm:$0xff] }
 0x114   :  { %3676 = vmatprep.subr.mxu0 %v7271_v5  ;;  %2220 = vmatprep.mubr.f32.mxu0 %v5738_v6  ;;  %vm7276_vm4 = vcmp.eq.s32.totalorder %v7275_v2, %v4934_v13  ;;  %v7277_v5 = vand.u32 4294901760, %v7255_v41 }
 0x115   :  { %3644 = vmatprep.subr.msk.mxu1 %vm144_vm15, %v6905_v61  ;;  %3677 = vmatpush3.msra.mxu0 %v7273_v26  ;;  %v3146_v18 = vpop.f32.mrf.mxu0 }
 0x116   :  { %2223 = vmatmul.mubr.f32.gmra.mxu0 %v7274_v28  ;;  %3645 = vmatpush3.msk.msra.mxu1 %vm7276_vm4, %v6905_v61  ;;  %v3147_v55 = vadd.f32 %v3146_v18, %v3145_v60  ;;  %v7282_v60 = vand.u32 4294901760, %v5196_v57  ;;  %vm7285_vm4 = vcmp.eq.s32.totalorder %v4910_v56, %v4934_v13  ;;  %v7286_v57 = vand.u32 4294901760, %v5670_v9  ;;  %v7308_v28 = vld [vmem:[#allocation61_spill] sm:$0xff] }
 0x117   :  { %2372 = vmatprep.mubr.f32.mxu1 %v7277_v5  ;;  %3678 = vmatprep.subr.mxu0 %v7278_v20  ;;  %v3198_v27 = vpop.f32.mrf.mxu1  ;;  %v7284_v20 = vand.u32 4294901760, %v5199_v8  ;;  %v7289_v56 = vand.u32 4294901760, %v5698_v15  ;;  %v7290_v8 = vand.u32 4294901760, %v7206_v12  ;;  %v7293_v15 = vld [vmem:[#allocation55_spill] sm:$0xff]  ;;  %v7294_v18 = vand.u32 4294901760, %v7214_v59 }
 0x118   :  { %2376 = vmatmul.mubr.f32.vlgmr.msra.gmra.mxu1 %v7279_v62  ;;  %3679 = vmatpush3.msra.mxu0 %v7280_v38  ;;  %v3148_v26 = vpop.f32.mrf.mxu0  ;;  %v7287_v62 = vand.u32 4294901760, %v5266_v29  ;;  %v7291_v29 = vand.u32 4294901760, %v7210_v50  ;;  %v7295_v50 = vld [vmem:[#allocation56_spill] sm:$0xff]  ;;  %v7296_v5 = vand.u32 4294901760, %v5738_v6 }
 0x119   :  { %3726 = vmatprep.subr.msk.mxu1 %vm7281_vm5, %v6905_v61  ;;  %3680 = vmatprep.subr.mxu0 %v7282_v60  ;;  %v3199_v41 = vpop.f32.mrf.mxu1  ;;  %vm7288_vm5 = vcmp.eq.s32.totalorder %v7204_v1, %v4934_v13 }
 0x11a   :  { %3727 = vmatpush3.msk.msra.mxu1 %vm7283_vm14, %v6905_v61  ;;  %2229 = vmatprep.mubr.f32.mxu0 %v5791_v52  ;;  %v3149_v17 = vpop.f32.mrf.mxu0  ;;  %v3200_v34 = vadd.f32 %v3199_v41, %v3198_v27  ;;  %v7299_v41 = vld [vmem:[#allocation28_spill] sm:$0xff]  ;;  %vm7310_vm14 = vcmp.eq.s32.totalorder %v7227_v7, %v4934_v13  ;;  %v7315_v7 = vand.u32 4294901760, %v5802_v25 }
 0x11b   :  { %3681 = vmatpush3.msra.mxu0 %v7284_v20  ;;  %3728 = vmatprep.subr.msk.mxu1 %vm7285_vm4, %v6905_v61  ;;  %v3150_v10 = vadd.f32 %v3149_v17, %v3148_v26  ;;  %v7297_v26 = vld [vmem:[#allocation48_spill] sm:$0xff]  ;;  %v7302_v17 = vand.u32 4294901760, %v7219_v47  ;;  %vm7314_vm4 = vcmp.eq.s32.totalorder %v7230_v21, %v4934_v13 }
 0x11c   :  { %2232 = vmatmul.mubr.f32.gmra.mxu0 %v5802_v25  ;;  %2383 = vmatprep.mubr.f32.mxu1 %v7286_v57  ;;  %v6120_v30 = vadd.f32 %v3200_v34, %v3144_v36  ;;  %v3151_v54 = vpop.f32.mrf.mxu0  ;;  %v7298_v60 = vand.u32 4294901760, %v7297_v26  ;;  %v7304_v20 = vld [vmem:[#allocation52_spill] sm:$0xff] }
 0x11d   :  { %3682 = vmatprep.subr.mxu0 %v7287_v62  ;;  %3729 = vmatpush3.msk.msra.mxu1 %vm7288_vm5, %v6905_v61  ;;  %v7305_v57 = vand.u32 4294901760, %v7304_v20  ;;  %v7309_v62 = vand.u32 4294901760, %v5437_v3  ;;  %vm7317_vm5 = vcmp.eq.s32.totalorder %v7234_v16, %v4934_v13  ;;  %v7321_v25 = vld [vmem:[#allocation68_spill] sm:$0xff] }
 0x11e   :  { %2387 = vmatmul.mubr.f32.gmra.mxu1 %v7289_v56  ;;  %3683 = vmatpush3.msra.mxu0 %v7290_v8  ;;  %v3201_v27 = vpop.f32.mrf.mxu1  ;;  %v3152_v9 = vpop.f32.mrf.mxu0  ;;  %v7311_v56 = vld [vmem:[#allocation62_spill] sm:$0xff]  ;;  %v7312_v8 = vand.u32 4294901760, %v5791_v52 }
 0x11f   :  { %3730 = vmatprep.subr.msk.mxu1 %vm157_vm12, %v6905_v61  ;;  %3684 = vmatprep.subr.mxu0 %v7291_v29  ;;  %v3153_v36 = vadd.f32 %v3152_v9, %v3151_v54  ;;  %vm7300_vm12 = vcmp.eq.s32.totalorder %v7299_v41, %v4934_v13  ;;  %v7313_v9 = vand.u32 4294901760, %v7229_v43  ;;  %v7316_v29 = vand.u32 4294901760, %v7232_v23 }
 0x120   :  { %3731 = vmatpush3.msk.msra.mxu1 %vm141_vm1, %v6905_v61  ;;  %2238 = vmatprep.mubr.f32.mxu0 %v7293_v15  ;;  %v3202_v12 = vpop.f32.mrf.mxu1  ;;  %vm7303_vm1 = vcmp.eq.s32.totalorder %v7221_v63, %v4934_v13  ;;  %v7318_v43 = vand.u32 4294901760, %v7236_v49  ;;  %v7324_v49 = vld [vmem:[#allocation23_spill] sm:$0xff]  ;;  %v7339_v41 = vand.u32 4294901760, %v5706_v32 }
 0x121   :  { %3685 = vmatpush3.msra.mxu0 %v7294_v18  ;;  %3732 = vmatprep.subr.msk.mxu1 %vm156_vm2, %v6905_v61  ;;  %v3203_v53 = vadd.f32 %v3202_v12, %v3201_v27  ;;  %v7322_v12 = vand.u32 4294901760, %v5537_v58  ;;  %v7325_v18 = vand.u32 4294901760, %v7293_v15 }
 0x122   :  { %2241 = vmatmul.mubr.f32.gmra.mxu0 %v7295_v50  ;;  %2394 = vmatprep.mubr.f32.mxu1 %v7296_v5  ;;  %v3154_v38 = vpop.f32.mrf.mxu0  ;;  %v7326_v5 = vand.u32 4294901760, %v5561_v19  ;;  %v7330_v19 = vand.u32 4294901760, %v5607_v45  ;;  %v7335_v45 = vand.u32 4294901760, %v7308_v28 }
 0x123   :  { %3686 = vmatprep.subr.mxu0 %v7298_v60  ;;  %3733 = vmatpush3.msk.msra.mxu1 %vm7300_vm12, %v6905_v61  ;;  %v6158_v59 = vadd.f32 %v3203_v53, %v3147_v55  ;;  %v7306_v55 = vld [vmem:[#allocation29_spill] sm:$0xff] }
 0x124   :  { %2398 = vmatmul.mubr.f32.gmra.mxu1 %v7301_v40  ;;  %3687 = vmatpush3.msra.mxu0 %v7302_v17  ;;  %v3204_v34 = vpop.f32.mrf.mxu1  ;;  %v3155_v6 = vpop.f32.mrf.mxu0  ;;  %vm7307_vm2 = vcmp.eq.s32.totalorder %v7306_v55, %v4934_v13  ;;  %v7349_v55 = vld [vmem:[#allocation42_spill] sm:$0xff] }
 0x125   :  { %3734 = vmatprep.subr.msk.mxu1 %vm7303_vm1, %v6905_v61  ;;  %3688 = vmatprep.subr.mxu0 %v7305_v57  ;;  %v3156_v54 = vadd.f32 %v3155_v6, %v3154_v38  ;;  %vm7323_vm1 = vcmp.eq.s32.totalorder %v7240_v35, %v4934_v13  ;;  %v7328_v35 = vand.u32 4294901760, %v7295_v50  ;;  %v7329_v38 = vand.u32 4294901760, %v5573_v22  ;;  %v7344_v6 = vld [vmem:[#allocation36_spill] sm:$0xff] }
 0x126   :  { %3735 = vmatpush3.msk.msra.mxu1 %vm7307_vm2, %v6905_v61  ;;  %2247 = vmatprep.mubr.f32.mxu0 %v7308_v28  ;;  %v3205_v47 = vpop.f32.mrf.mxu1  ;;  %vm7327_vm2 = vcmp.eq.s32.totalorder %v7242_v42, %v4934_v13  ;;  %v7333_v50 = vand.u32 4294901760, %v5637_v31  ;;  %v7345_v20 = vand.u32 4294901760, %v7344_v6  ;;  %v7346_v57 = vld [vmem:[#allocation20_spill] sm:$0xff] }
 0x127   :  { %3689 = vmatpush3.msra.mxu0 %v7309_v62  ;;  %3736 = vmatprep.subr.msk.mxu1 %vm7310_vm14, %v6905_v61  ;;  %v3206_v63 = vadd.f32 %v3205_v47, %v3204_v34  ;;  %vm7331_vm14 = vcmp.eq.s32.totalorder %v7245_v37, %v4934_v13  ;;  %v7336_v37 = vand.u32 4294901760, %v5655_v33  ;;  %v7341_v33 = vand.u32 4294901760, %v5716_v51  ;;  %v7342_v34 = vld [vmem:[#allocation14_spill] sm:$0xff]  ;;  %v7351_v62 = vld [vmem:[#allocation24_spill] sm:$0xff] }
 0x128   :  { %2250 = vmatmul.mubr.f32.gmra.mxu0 %v7311_v56  ;;  %2405 = vmatprep.mubr.f32.mxu1 %v7312_v8  ;;  %v3157_v27 = vpop.f32.mrf.mxu0  ;;  %v7348_v51 = vand.u32 4294901760, %v7321_v25 }
 0x129   :  { %3690 = vmatprep.subr.mxu0 %v7313_v9  ;;  %3737 = vmatpush3.msk.msra.mxu1 %vm7314_vm4, %v6905_v61  ;;  %v6190_v3 = vadd.f32 %v3206_v63, %v3150_v10  ;;  %v7319_v10 = vld [vmem:[#allocation17_spill] sm:$0xff]  ;;  %vm7334_vm4 = vcmp.eq.s32.totalorder %v7247_v39, %v4934_v13  ;;  %v7338_v39 = vand.u32 4294901760, %v7311_v56  ;;  %v7352_v56 = vand.u32 4294901760, %v7324_v49 }
 0x12a   :  { %2409 = vmatmul.mubr.f32.gmra.mxu1 %v7315_v7  ;;  %3691 = vmatpush3.msra.mxu0 %v7316_v29  ;;  %v3207_v1 = vpop.f32.mrf.mxu1  ;;  %v3158_v52 = vpop.f32.mrf.mxu0  ;;  %vm7320_vm12 = vcmp.eq.s32.totalorder %v7319_v10, %v4934_v13 }
 0x12b   :  { %3738 = vmatprep.subr.msk.mxu1 %vm7317_vm5, %v6905_v61  ;;  %3692 = vmatprep.subr.mxu0 %v7318_v43  ;;  %v3159_v21 = vadd.f32 %v3158_v52, %v3157_v27  ;;  %vm7340_vm5 = vcmp.eq.s32.totalorder %v7251_v0, %v4934_v13  ;;  %v7356_v52 = vld [vmem:[#allocation44_spill] sm:$0xff] }
 0x12c   :  { %3739 = vmatpush3.msk.msra.mxu1 %vm7320_vm12, %v6905_v61  ;;  %2256 = vmatprep.mubr.f32.mxu0 %v7321_v25  ;;  %v3208_v23 = vpop.f32.mrf.mxu1  ;;  %vm7343_vm12 = vcmp.eq.s32.totalorder %v7342_v34, %v4934_v13 }
 0x12d   :  { %3693 = vmatpush3.msra.mxu0 %v7322_v12  ;;  %3740 = vmatprep.subr.msk.mxu1 %vm7323_vm1, %v6905_v61  ;;  %v3209_v16 = vadd.f32 %v3208_v23, %v3207_v1  ;;  %v7355_v1 = vld [vmem:[#allocation26_spill] sm:$0xff]  ;;  %v7362_v12 = vld [vmem:[#allocation37_spill] sm:$0xff] }
 0x12e   :  { %2259 = vmatmul.mubr.f32.gmra.mxu0 %v7324_v49  ;;  %2416 = vmatprep.mubr.f32.mxu1 %v7325_v18  ;;  %v3160_v53 = vpop.f32.mrf.mxu0 }
 0x12f   :  { %3694 = vmatprep.subr.mxu0 %v7326_v5  ;;  %3741 = vmatpush3.msk.msra.mxu1 %vm7327_vm2, %v6905_v61  ;;  %v6222_v58 = vadd.f32 %v3209_v16, %v3153_v36  ;;  %v7332_v36 = vld [vmem:[#allocation13_spill] sm:$0xff]  ;;  %v7363_v5 = vld [vmem:[#allocation51_spill] sm:$0xff] }
 0x130   :  { %2420 = vmatmul.mubr.f32.gmra.mxu1 %v7328_v35  ;;  %3695 = vmatpush3.msra.mxu0 %v7329_v38  ;;  %v3210_v26 = vpop.f32.mrf.mxu1  ;;  %v3161_v15 = vpop.f32.mrf.mxu0  ;;  %v7353_v9 = vand.u32 4294901760, %v7332_v36  ;;  %v7364_v38 = vld [vmem:[#allocation53_spill] sm:$0xff] }
 0x131   :  { %3742 = vmatprep.subr.msk.mxu1 %vm151_vm6, %v6905_v61  ;;  %3696 = vmatprep.subr.mxu0 %v7330_v19  ;;  %v3162_v42 = vadd.f32 %v3161_v15, %v3160_v53  ;;  %vm7337_vm6 = vcmp.eq.s32.totalorder %v7249_v48, %v4934_v13  ;;  %v7365_v15 = vld [vmem:[#allocation54_spill] sm:$0xff] }
 0x132   :  { %3743 = vmatpush3.msk.msra.mxu1 %vm7331_vm14, %v6905_v61  ;;  %2265 = vmatprep.mubr.f32.mxu0 %v7332_v36  ;;  %v3211_v22 = vpop.f32.mrf.mxu1 }
 0x133   :  { %3697 = vmatpush3.msra.mxu0 %v7333_v50  ;;  %3744 = vmatprep.subr.msk.mxu1 %vm7334_vm4, %v6905_v61  ;;  %v3212_v11 = vadd.f32 %v3211_v22, %v3210_v26 }
 0x134   :  { %2268 = vmatmul.mubr.f32.gmra.mxu0 %v5937_v14  ;;  %2427 = vmatprep.mubr.f32.mxu1 %v7335_v45  ;;  %v3163_v60 = vpop.f32.mrf.mxu0 }
 0x135   :  { %3698 = vmatprep.subr.mxu0 %v7336_v37  ;;  %3745 = vmatpush3.msk.msra.mxu1 %vm7337_vm6, %v6905_v61  ;;  %v6254_v31 = vadd.f32 %v3212_v11, %v3156_v54  ;;  %v7367_v11 = vld [vmem:[#allocation59_spill] sm:$0xff]  ;;  %v7368_v37 = vld [vmem:[#allocation64_spill] sm:$0xff] }
 0x136   :  { %2431 = vmatmul.mubr.f32.gmra.mxu1 %v7338_v39  ;;  %3699 = vmatpush3.msra.mxu0 %v7339_v41  ;;  %v3213_v40 = vpop.f32.mrf.mxu1  ;;  %v3164_v17 = vpop.f32.mrf.mxu0 }
 0x137   :  { %3746 = vmatprep.subr.msk.mxu1 %vm7340_vm5, %v6905_v61  ;;  %3700 = vmatprep.subr.mxu0 %v7341_v33  ;;  %v3165_v48 = vadd.f32 %v3164_v17, %v3163_v60  ;;  %v7369_v17 = vld [vmem:[#allocation65_spill] sm:$0xff] }
 0x138   :  { %3747 = vmatpush3.msk.msra.mxu1 %vm7343_vm12, %v6905_v61  ;;  %3701 = vmatpush3.msra.mxu0 %v7345_v20  ;;  %v3214_v32 = vpop.f32.mrf.mxu1 }
 0x139   :  { %2619 = vmatprep.mubr.f32.mxu0 %v7346_v57  ;;  %3748 = vmatprep.subr.msk.mxu1 %vm148_vm7, %v6905_v61  ;;  %v3215_v0 = vadd.f32 %v3214_v32, %v3213_v40 }
 0x13a   :  { %2438 = vmatprep.mubr.f32.mxu1 %v7348_v51  ;;  %2621 = vmatmul.mubr.f32.vlgmr.msra.gmra.mxu0 %v7349_v55  ;;  %v3254_v28 = vpop.f32.mrf.mxu0 }
 0x13b   :  { %3749 = vmatpush3.msk.msra.mxu1 %vm132_vm3, %v6905_v61  ;;  %2626 = vmatprep.mubr.f32.mxu0 %v7351_v62  ;;  %v6285_v63 = vadd.f32 %v3215_v0, %v3159_v21  ;;  %v7357_v21 = vand.u32 4294901760, %v5937_v14  ;;  %v7360_v14 = vld [vmem:[#allocation47_spill] sm:$0xff]  ;;  %vm7361_vm3 = vcmp.eq.s32.totalorder %v7275_v2, %v4934_v13 }
 0x13c   :  { %2442 = vmatmul.mubr.f32.gmra.mxu1 %v7352_v56  ;;  %3750 = vmatprep.subr.msk.mxu1 %vm147_vm10, %v6905_v61  ;;  %v3216_v8 = vpop.f32.mrf.mxu1  ;;  %v3255_v27 = vpop.f32.mrf.mxu0 }
 0x13d   :  { %3751 = vmatpush3.msk.msra.mxu1 %vm131_vm11, %v6905_v61  ;;  %2449 = vmatprep.mubr.f32.mxu1 %v7353_v9  ;;  %v3256_v7 = vadd.f32 %v3255_v27, %v3254_v28 }
 0x13e   :  { %3752 = vmatprep.subr.msk.mxu1 %vm146_vm0, %v6905_v61  ;;  %2628 = vmatmul.mubr.f32.gmra.mxu0 %v7355_v1  ;;  %v3217_v4 = vpop.f32.mrf.mxu1 }
 0x13f   :  { %3753 = vmatpush3.msk.msra.mxu1 %vm130_vm8, %v6905_v61  ;;  %2633 = vmatprep.mubr.f32.mxu0 %v7356_v52  ;;  %v953_v46 = vadd.f32 %v3256_v7, %v6120_v30  ;;  %v3218_v43 = vadd.f32 %v3217_v4, %v3216_v8 }
 0x140   :  { %2453 = vmatmul.mubr.f32.gmra.mxu1 %v7357_v21  ;;  %3754 = vmatprep.subr.msk.mxu1 %vm145_vm13, %v6905_v61  ;;  %v3257_v10 = vpop.f32.mrf.mxu0 }
 0x141   :  { %3755 = vmatpush3.msk.msra.mxu1 %vm129_vm9, %v6905_v61  ;;  %2772 = vmatprep.mubr.f32.mxu1 %v7346_v57  ;;  %v6321_v24 = vadd.f32 %v3218_v43, %v3162_v42  ;;  %v7366_v42 = vld [vmem:[#allocation58_spill] sm:$0xff]  ;;  %v7371_v57 = vld [vmem:[#allocation9_spill] sm:$0xff] }
 0x142   :  { %3756 = vmatprep.subr.msk.mxu1 %vm144_vm15, %v6905_v61  ;;  %2635 = vmatmul.mubr.f32.gmra.mxu0 %v7360_v14  ;;  %v3219_v23 = vpop.f32.mrf.mxu1  ;;  %v3258_v44 = vpop.f32.mrf.mxu0 }
 0x143   :  { %3757 = vmatpush3.msk.msra.mxu1 %vm7361_vm3, %v6905_v61  ;;  %2640 = vmatprep.mubr.f32.mxu0 %v7362_v12  ;;  %v3259_v16 = vadd.f32 %v3258_v44, %v3257_v10 }
 0x144   :  { %2774 = vmatmul.mubr.f32.vlgmr.msra.gmra.mxu1 %v7349_v55  ;;  %v3220_v49 = vpop.f32.mrf.mxu1 }
 0x145   :  { %2779 = vmatprep.mubr.f32.mxu1 %v7351_v62  ;;  %v962_v18 = vadd.f32 %v3259_v16, %v6158_v59  ;;  %v3221_v53 = vadd.f32 %v3220_v49, %v3219_v23 }
 0x146   :  { %2642 = vmatmul.mubr.f32.gmra.mxu0 %v7363_v5  ;;  %v3260_v35 = vpop.f32.mrf.mxu0 }
 0x147   :  { %2647 = vmatprep.mubr.f32.mxu0 %v7364_v38  ;;  %v6338_v26 = vadd.f32 %v3221_v53, %v3165_v48  ;;  %v7370_v48 = vld [vmem:[#allocation15_spill] sm:$0xff] }
 0x148   :  { %2781 = vmatmul.mubr.f32.gmra.mxu1 %v7355_v1  ;;  %v3310_v61 = vpop.f32.mrf.mxu1  ;;  %v3261_v13 = vpop.f32.mrf.mxu0 }
 0x149   :  { %2786 = vmatprep.mubr.f32.mxu1 %v7356_v52  ;;  %v3262_v2 = vadd.f32 %v3261_v13, %v3260_v35 }
 0x14a   :  { %2649 = vmatmul.mubr.f32.gmra.mxu0 %v7365_v15  ;;  %v3311_v19 = vpop.f32.mrf.mxu1 }
 0x14b   :  { %2654 = vmatprep.mubr.f32.mxu0 %v7366_v42  ;;  %v971_v59 = vadd.f32 %v3262_v2, %v6190_v3  ;;  %v3312_v36 = vadd.f32 %v3311_v19, %v3310_v61 }
 0x14c   :  { %2788 = vmatmul.mubr.f32.gmra.mxu1 %v7360_v14  ;;  %v3263_v22 = vpop.f32.mrf.mxu0 }
 0x14d   :  { %2793 = vmatprep.mubr.f32.mxu1 %v7362_v12  ;;  %v1124_v50 = vadd.f32 %v3312_v36, %v953_v46 }
 0x14e   :  { %2656 = vmatmul.mubr.f32.gmra.mxu0 %v7367_v11  ;;  %v3313_v45 = vpop.f32.mrf.mxu1  ;;  %v3264_v60 = vpop.f32.mrf.mxu0 }
 0x14f   :  { %2661 = vmatprep.mubr.f32.mxu0 %v7368_v37  ;;  %v3265_v39 = vadd.f32 %v3264_v60, %v3263_v22 }
 0x150   :  { %2795 = vmatmul.mubr.f32.gmra.mxu1 %v7363_v5  ;;  %v3314_v41 = vpop.f32.mrf.mxu1 }
 0x151   :  { %2800 = vmatprep.mubr.f32.mxu1 %v7364_v38  ;;  %v980_v3 = vadd.f32 %v3265_v39, %v6222_v58  ;;  %v3315_v40 = vadd.f32 %v3314_v41, %v3313_v45 }
 0x152   :  { %2663 = vmatmul.mubr.f32.gmra.mxu0 %v7369_v17  ;;  %v3266_v33 = vpop.f32.mrf.mxu0 }
 0x153   :  { %2668 = vmatprep.mubr.f32.mxu0 %v7370_v48  ;;  %v1135_v34 = vadd.f32 %v3315_v40, %v962_v18 }
 0x154   :  { %2802 = vmatmul.mubr.f32.gmra.mxu1 %v7365_v15  ;;  %v3316_v6 = vpop.f32.mrf.mxu1  ;;  %v3267_v20 = vpop.f32.mrf.mxu0 }
 0x155   :  { %2807 = vmatprep.mubr.f32.mxu1 %v7366_v42  ;;  %v3268_v32 = vadd.f32 %v3267_v20, %v3266_v33 }
 0x156   :  { %2670 = vmatmul.mubr.f32.gmra.mxu0 %v7371_v57  ;;  %v3317_v54 = vpop.f32.mrf.mxu1 }
 0x157   :  { %v989_v0 = vadd.f32 %v3268_v32, %v6254_v31  ;;  %v3318_v58 = vadd.f32 %v3317_v54, %v3316_v6 }
 0x158   :  { %2809 = vmatmul.mubr.f32.gmra.mxu1 %v7367_v11  ;;  %v3269_v51 = vpop.f32.mrf.mxu0 }
 0x159   :  { %2814 = vmatprep.mubr.f32.mxu1 %v7368_v37  ;;  %v1146_v55 = vadd.f32 %v3318_v58, %v971_v59 }
 0x15a   :  { %v3319_v28 = vpop.f32.mrf.mxu1  ;;  %v3270_v47 = vpop.f32.mrf.mxu0 }
 0x15b   :  { %v3271_v62 = vadd.f32 %v3270_v47, %v3269_v51 }
 0x15c   :  { %2816 = vmatmul.mubr.f32.gmra.mxu1 %v7369_v17  ;;  %v3320_v56 = vpop.f32.mrf.mxu1 }
 0x15d   :  { %2821 = vmatprep.mubr.f32.mxu1 %v7370_v48  ;;  %v998_v8 = vadd.f32 %v3271_v62, %v6285_v63  ;;  %v3321_v27 = vadd.f32 %v3320_v56, %v3319_v28 }
 0x15e   :  { %v3272_v9 = vpop.f32.mrf.mxu0 }
 0x15f   :  { %v1157_v31 = vadd.f32 %v3321_v27, %v980_v3 }
 0x160   :  { %2823 = vmatmul.mubr.f32.gmra.mxu1 %v7371_v57  ;;  %v3322_v7 = vpop.f32.mrf.mxu1  ;;  %v3273_v29 = vpop.f32.mrf.mxu0 }
 0x161   :  { %v3274_v1 = vadd.f32 %v3273_v29, %v3272_v9 }
 0x162   :  { %v3323_v4 = vpop.f32.mrf.mxu1 }
 0x163   :  { %v1007_v52 = vadd.f32 %v3274_v1, %v6321_v24  ;;  %v3324_v46 = vadd.f32 %v3323_v4, %v3322_v7 }
 0x164   :  { %v3275_v43 = vpop.f32.mrf.mxu0 }
 0x165   :  { %v1168_v21 = vadd.f32 %v3324_v46, %v989_v0 }
 0x166   :  { %v3325_v10 = vpop.f32.mrf.mxu1  ;;  %v3276_v25 = vpop.f32.mrf.mxu0 }
 0x167   :  { %v3277_v30 = vadd.f32 %v3276_v25, %v3275_v43 }
 0x168   :  { %v3326_v14 = vpop.f32.mrf.mxu1 }
 0x169   :  { %v1016_v63 = vadd.f32 %v3277_v30, %v6338_v26  ;;  %v3327_v23 = vadd.f32 %v3326_v14, %v3325_v10 }
 0x16a   :  { %v3366_v44 = vpop.f32.mrf.mxu0 }
 0x16b   :  { %v1179_v12 = vadd.f32 %v3327_v23, %v998_v8 }
 0x16c   :  { %v3328_v16 = vpop.f32.mrf.mxu1  ;;  %v3367_v49 = vpop.f32.mrf.mxu0 }
 0x16d   :  { %v3368_v18 = vadd.f32 %v3367_v49, %v3366_v44 }
 0x16e   :  { %v3329_v53 = vpop.f32.mrf.mxu1 }
 0x16f   :  { %v1369_v5 = vadd.f32 %v3368_v18, %v1124_v50  ;;  %v3330_v35 = vadd.f32 %v3329_v53, %v3328_v16 }
 0x170   :  { %v3369_v38 = vpop.f32.mrf.mxu0 }
 0x171   :  { %v1190_v24 = vadd.f32 %v3330_v35, %v1007_v52 }
 0x172   :  { %v3331_v61 = vpop.f32.mrf.mxu1  ;;  %v3370_v13 = vpop.f32.mrf.mxu0 }
 0x173   :  { %v3371_v2 = vadd.f32 %v3370_v13, %v3369_v38 }
 0x174   :  { %v3332_v15 = vpop.f32.mrf.mxu1 }
 0x175   :  { %v1376_v19 = vadd.f32 %v3371_v2, %v1135_v34  ;;  %v3333_v42 = vadd.f32 %v3332_v15, %v3331_v61 }
 0x176   :  { %v3372_v59 = vpop.f32.mrf.mxu0 }
 0x177   :  { %v1201_v36 = vadd.f32 %v3333_v42, %v1016_v63 }
 0x178   :  { %v3422_v26 = vpop.f32.mrf.mxu1  ;;  %v3373_v22 = vpop.f32.mrf.mxu0 }
 0x179   :  { %v3374_v11 = vadd.f32 %v3373_v22, %v3372_v59 }
 0x17a   :  { %v3423_v45 = vpop.f32.mrf.mxu1 }
 0x17b   :  { %v1383_v60 = vadd.f32 %v3374_v11, %v1146_v55  ;;  %v3424_v37 = vadd.f32 %v3423_v45, %v3422_v26  ;;  %v3375_v39 = vpop.f32.mrf.mxu0 }
 0x17d   :  { %v6366_v41 = vadd.f32 %v3424_v37, %v1369_v5  ;;  %v3425_v50 = vpop.f32.mrf.mxu1  ;;  %v3376_v3 = vpop.f32.mrf.mxu0 }
 0x17e   :  { %v3377_v40 = vadd.f32 %v3376_v3, %v3375_v39 }
 0x17f   :  { %v3426_v17 = vpop.f32.mrf.mxu1 }
 0x180   :  { %v1390_v33 = vadd.f32 %v3377_v40, %v1157_v31  ;;  %v3427_v48 = vadd.f32 %v3426_v17, %v3425_v50 }
 0x182   :  { %v3378_v6 = vpop.f32.mrf.mxu0  ;;  %v6368_v34 = vadd.f32 %v3427_v48, %v1376_v19 }
 0x184   :  { %v3428_v20 = vpop.f32.mrf.mxu1  ;;  %v3379_v32 = vpop.f32.mrf.mxu0 }
 0x185   :  { %v3380_v57 = vadd.f32 %v3379_v32, %v3378_v6 }
 0x186   :  { %v3429_v54 = vpop.f32.mrf.mxu1 }
 0x187   :  { %v1397_v0 = vadd.f32 %v3380_v57, %v1168_v21  ;;  %v3430_v58 = vadd.f32 %v3429_v54, %v3428_v20 }
 0x188   :  { %v3381_v51 = vpop.f32.mrf.mxu0 }
 0x189   :  { %v6370_v55 = vadd.f32 %v3430_v58, %v1383_v60 }
 0x18a   :  { %v3431_v28 = vpop.f32.mrf.mxu1  ;;  %v3382_v47 = vpop.f32.mrf.mxu0 }
 0x18b   :  { %v3383_v62 = vadd.f32 %v3382_v47, %v3381_v51 }
 0x18c   :  { %v3432_v56 = vpop.f32.mrf.mxu1 }
 0x18d   :  { %v1404_v8 = vadd.f32 %v3383_v62, %v1179_v12  ;;  %v3433_v27 = vadd.f32 %v3432_v56, %v3431_v28 }
 0x18e   :  { %v3384_v9 = vpop.f32.mrf.mxu0 }
 0x18f   :  { %v6372_v31 = vadd.f32 %v3433_v27, %v1390_v33 }
 0x190   :  { %v3434_v7 = vpop.f32.mrf.mxu1  ;;  %v3385_v29 = vpop.f32.mrf.mxu0 }
 0x191   :  { %v3386_v1 = vadd.f32 %v3385_v29, %v3384_v9 }
 0x192   :  { %v3435_v4 = vpop.f32.mrf.mxu1 }
 0x193   :  { %v1411_v52 = vadd.f32 %v3386_v1, %v1190_v24  ;;  %v3436_v46 = vadd.f32 %v3435_v4, %v3434_v7 }
 0x194   :  { %v3387_v43 = vpop.f32.mrf.mxu0 }
 0x195   :  { %v6374_v21 = vadd.f32 %v3436_v46, %v1397_v0 }
 0x196   :  { %v3437_v10 = vpop.f32.mrf.mxu1  ;;  %v3388_v25 = vpop.f32.mrf.mxu0 }
 0x197   :  { %v3389_v30 = vadd.f32 %v3388_v25, %v3387_v43 }
 0x198   :  { %v3438_v14 = vpop.f32.mrf.mxu1 }
 0x199   :  { %v1418_v63 = vadd.f32 %v3389_v30, %v1201_v36  ;;  %v3439_v23 = vadd.f32 %v3438_v14, %v3437_v10 }
 0x19a   :  { %v6376_v44 = vpop.f32.mrf.mxu0 }
 0x19b   :  { %v6378_v12 = vadd.f32 %v3439_v23, %v1404_v8 }
 0x19c   :  { %v3440_v16 = vpop.f32.mrf.mxu1  ;;  %v6380_v49 = vpop.f32.mrf.mxu0 }
 0x19e   :  { %v3441_v18 = vpop.f32.mrf.mxu1 }
 0x19f   :  { %v3442_v53 = vadd.f32 %v3441_v18, %v3440_v16 }
 0x1a0   :  { %v6382_v5 = vpop.f32.mrf.mxu0 }
 0x1a1   :  { %v6384_v35 = vadd.f32 %v3442_v53, %v1411_v52 }
 0x1a2   :  { %v3443_v38 = vpop.f32.mrf.mxu1  ;;  %v6386_v24 = vpop.f32.mrf.mxu0 }
 0x1a3   :  { %7372 = vst [vmem:[#allocation30_spill] sm:$0xff] %v6384_v35  ;;  %v3480_v35 = vadd.f32 %v6380_v49, %v6376_v44 }
 0x1a4   :  { %v3444_v61 = vpop.f32.mrf.mxu1 }
 0x1a5   :  { %v3445_v13 = vadd.f32 %v3444_v61, %v3443_v38 }
 0x1a6   :  { %v6388_v2 = vpop.f32.mrf.mxu0 }
 0x1a7   :  { %v6390_v15 = vadd.f32 %v3445_v13, %v1418_v63 }
 0x1a8   :  { %v3534_v19 = vpop.f32.mrf.mxu1  ;;  %v6392_v42 = vpop.f32.mrf.mxu0 }
 0x1a9   :  { %7373 = vst [vmem:[#allocation10_spill] sm:$0xff] %v6390_v15  ;;  %v3486_v49 = vadd.f32 %v6392_v42, %v6388_v2 }
 0x1aa   :  { %v3535_v59 = vpop.f32.mrf.mxu1 }
 0x1ac   :  { %v6394_v36 = vpop.f32.mrf.mxu0 }
 0x1ae   :  { %v6396_v26 = vpop.f32.mrf.mxu1  ;;  %v6398_v22 = vpop.f32.mrf.mxu0 }
 0x1af   :  { %v3489_v2 = vadd.f32 %v6398_v22, %v6394_v36 }
 0x1b0   :  { %v3538_v11 = vpop.f32.mrf.mxu1 }
 0x1b2   :  { %v6400_v45 = vpop.f32.mrf.mxu0 }
 0x1b4   :  { %v6402_v60 = vpop.f32.mrf.mxu1  ;;  %v6404_v37 = vpop.f32.mrf.mxu0 }
 0x1b5   :  { %v3492_v36 = vadd.f32 %v6404_v37, %v6400_v45 }
 0x1b6   :  { %v6406_v39 = vpop.f32.mrf.mxu1 }
 0x1b8   :  { %v6408_v50 = vpop.f32.mrf.mxu0 }
 0x1ba   :  { %v6410_v3 = vpop.f32.mrf.mxu1  ;;  %v6412_v40 = vpop.f32.mrf.mxu0 }
 0x1bc   :  { %v6414_v17 = vpop.f32.mrf.mxu1 }
 0x1be   :  { %v6416_v33 = vpop.f32.mrf.mxu0 }
 0x1bf   :  { %7374 = vst [vmem:[#allocation32_spill] sm:$0xff] %v6416_v33  ;;  %v3539_v33 = vadd.f32 %v3538_v11, %v6396_v26  ;;  %v1713_v11 = vadd.f32 %v3486_v49, %v6370_v55  ;;  %v1728_v55 = vadd.f32 %v3489_v2, %v6372_v31 }
 0x1c0   :  { %v6418_v48 = vpop.f32.mrf.mxu1  ;;  %v6420_v6 = vpop.f32.mrf.mxu0 }
 0x1c1   :  { %7375 = vst [vmem:[#allocation11_spill] sm:$0xff] %v6420_v6 }
 0x1c2   :  { %v6422_v20 = vpop.f32.mrf.mxu1 }
 0x1c4   :  { %v6424_v32 = vpop.f32.mrf.mxu0 }
 0x1c5   :  { %7376 = vst [vmem:[#allocation12_spill] sm:$0xff] %v6424_v32 }
 0x1c6   :  { %v6426_v57 = vpop.f32.mrf.mxu1  ;;  %v6428_v54 = vpop.f32.mrf.mxu0 }
 0x1c7   :  { %7377 = vst [vmem:[#allocation60_spill] sm:$0xff] %v6428_v54 }
 0x1c8   :  { %v6430_v0 = vpop.f32.mrf.mxu1 }
 0x1ca   :  { %v3590_v58 = vpop.f32.mrf.mxu0 }
 0x1cc   :  { %v6432_v51 = vpop.f32.mrf.mxu1  ;;  %v3591_v28 = vpop.f32.mrf.mxu0 }
 0x1cd   :  { %7378 = vst [vmem:[#allocation16_spill] sm:$0xff] %v6432_v51  ;;  %v3536_v51 = vadd.f32 %v3535_v59, %v3534_v19 }
 0x1ce   :  { %v6434_v47 = vpop.f32.mrf.mxu1 }
 0x1cf   :  { %7379 = vst [vmem:[#allocation66_spill] sm:$0xff] %v6434_v47 }
 0x1d0   :  { %v3593_v62 = vpop.f32.mrf.mxu0 }
 0x1d2   :  { %v6436_v56 = vpop.f32.mrf.mxu1  ;;  %v3594_v8 = vpop.f32.mrf.mxu0 }
 0x1d3   :  { %7380 = vst [vmem:[#allocation33_spill] sm:$0xff] %v6436_v56 }
 0x1d4   :  { %v6438_v27 = vpop.f32.mrf.mxu1 }
 0x1d5   :  { %7381 = vst [vmem:[#allocation19_spill] sm:$0xff] %v6438_v27 }
 0x1d6   :  { %v3596_v9 = vpop.f32.mrf.mxu0 }
 0x1d8   :  { %v3646_v7 = vpop.f32.mrf.mxu1  ;;  %v3597_v29 = vpop.f32.mrf.mxu0 }
 0x1d9   :  { %v3598_v42 = vadd.f32 %v3597_v29, %v3596_v9 }
 0x1da   :  { %v3647_v1 = vpop.f32.mrf.mxu1 }
 0x1db   :  { %v3648_v44 = vadd.f32 %v3647_v1, %v3646_v7 }
 0x1dc   :  { %v6440_v4 = vpop.f32.mrf.mxu0 }
 0x1de   :  { %v3649_v52 = vpop.f32.mrf.mxu1  ;;  %v6442_v46 = vpop.f32.mrf.mxu0 }
 0x1e0   :  { %v3650_v43 = vpop.f32.mrf.mxu1 }
 0x1e1   :  { %v3651_v26 = vadd.f32 %v3650_v43, %v3649_v52 }
 0x1e2   :  { %v6444_v10 = vpop.f32.mrf.mxu0 }
 0x1e4   :  { %v3652_v25 = vpop.f32.mrf.mxu1  ;;  %v6446_v30 = vpop.f32.mrf.mxu0 }
 0x1e6   :  { %v3653_v14 = vpop.f32.mrf.mxu1 }
 0x1e8   :  { %v6448_v63 = vpop.f32.mrf.mxu0 }
 0x1e9   :  { %7382 = vst [vmem:[#allocation34_spill] sm:$0xff] %v6448_v63  ;;  %v1683_v63 = vadd.f32 %v3480_v35, %v6366_v41  ;;  %v3595_v35 = vadd.f32 %v3594_v8, %v3593_v62 }
 0x1ea   :  { %v6450_v23 = vpop.f32.mrf.mxu1  ;;  %v6452_v16 = vpop.f32.mrf.mxu0 }
 0x1eb   :  { %7383 = vst [vmem:[#allocation18_spill] sm:$0xff] %v6452_v16  ;;  %v2020_v6 = vadd.f32 %v3536_v51, %v1683_v63 }
 0x1ec   :  { %v6454_v18 = vpop.f32.mrf.mxu1 }
 0x1ed   :  { %v3657_v45 = vadd.f32 %v6454_v18, %v6450_v23  ;;  %v3551_v23 = vadd.f32 %v6430_v0, %v6426_v57  ;;  %v7393_v18 = vld [vmem:[#allocation11_spill] sm:$0xff]  ;;  %v7396_v0 = vld [vmem:[#allocation16_spill] sm:$0xff] }
 0x1ee   :  { %v6456_v53 = vpop.f32.mrf.mxu0 }
 0x1ef   :  { %7384 = vst [vmem:[#allocation35_spill] sm:$0xff] %v6456_v53 }
 0x1f0   :  { %v6458_v38 = vpop.f32.mrf.mxu1  ;;  %v6460_v61 = vpop.f32.mrf.mxu0 }
 0x1f1   :  { %7385 = vst [vmem:[#allocation41_spill] sm:$0xff] %v6460_v61 }
 0x1f2   :  { %v6462_v13 = vpop.f32.mrf.mxu1 }
 0x1f4   :  { %v6464_v15 = vpop.f32.mrf.mxu0 }
 0x1f5   :  { %7386 = vst [vmem:[#allocation45_spill] sm:$0xff] %v6464_v15  ;;  %v3483_v15 = vadd.f32 %v6386_v24, %v6382_v5  ;;  %v3542_v5 = vadd.f32 %v6406_v39, %v6402_v60  ;;  %v3545_v39 = vadd.f32 %v6414_v17, %v6410_v3  ;;  %v3548_v3 = vadd.f32 %v6422_v20, %v6418_v48 }
 0x1f6   :  { %v6466_v27 = vpop.f32.mrf.mxu1  ;;  %v6468_v56 = vpop.f32.mrf.mxu0 }
 0x1f7   :  { %7387 = vst [vmem:[#allocation27_spill] sm:$0xff] %v6466_v27  ;;  %7388 = vst [vmem:[#allocation46_spill] sm:$0xff] %v6468_v56  ;;  %v3592_v27 = vadd.f32 %v3591_v28, %v3590_v58  ;;  %v2034_v62 = vadd.f32 %v3542_v5, %v1713_v11 }
 0x1f8   :  { %v6470_v54 = vpop.f32.mrf.mxu1 }
 0x1f9   :  { %7389 = vst [vmem:[#allocation22_spill] sm:$0xff] %v6470_v54  ;;  %v2207_v41 = vadd.f32 %v3592_v27, %v2020_v6  ;;  %v3654_v27 = vadd.f32 %v3653_v14, %v3652_v25  ;;  %v2225_v22 = vadd.f32 %v3598_v42, %v2034_v62  ;;  %v2041_v14 = vadd.f32 %v3545_v39, %v1728_v55  ;;  %v7401_v39 = vld [vmem:[#allocation12_spill] sm:$0xff]  ;;  %v7404_v55 = vld [vmem:[#allocation41_spill] sm:$0xff] }
 0x1fa   :  { %v3702_v32 = vpop.f32.mrf.mxu0 }
 0x1fb   :  { %v2378_v28 = vadd.f32 %v3648_v44, %v2207_v41  ;;  %v2400_v31 = vadd.f32 %v3654_v27, %v2225_v22 }
 0x1fc   :  { %v6474_v47 = vpop.f32.mrf.mxu1  ;;  %v3703_v53 = vpop.f32.mrf.mxu0 }
 0x1fd   :  { %7390 = vst [vmem:[#allocation43_spill] sm:$0xff] %v6474_v47  ;;  %v3704_v47 = vadd.f32 %v3703_v53, %v3702_v32 }
 0x1fe   :  { %v6476_v16 = vpop.f32.mrf.mxu1  ;;  %v3705_v61 = vpop.f32.mrf.mxu0 }
 0x1ff   :  { %7391 = vst [vmem:[#allocation8_spill] sm:$0xff] %v6476_v16  ;;  %v1698_v16 = vadd.f32 %v3483_v15, %v6368_v34  ;;  %v2623_v15 = vadd.f32 %v3704_v47, %v2378_v28  ;;  %v7394_v28 = vld [vmem:[#allocation34_spill] sm:$0xff] }
 0x200   :  { %v6481_v56 = vpop.f32.mrf.mxu1  ;;  %v3706_v54 = vpop.f32.mrf.mxu0 }
 0x201   :  { %v2027_v51 = vadd.f32 %v3539_v33, %v1698_v16  ;;  %v3707_v6 = vadd.f32 %v3706_v54, %v3705_v61  ;;  %v3601_v54 = vadd.f32 %v6442_v46, %v6440_v4  ;;  %v1743_v16 = vadd.f32 %v3492_v36, %v6374_v21 }
 0x202   :  { %v6486_v19 = vpop.f32.mrf.mxu1  ;;  %v3708_v59 = vpop.f32.mrf.mxu0  ;;  %v3495_v4 = vadd.f32 %v6412_v40, %v6408_v50  ;;  %v3604_v46 = vadd.f32 %v6446_v30, %v6444_v10  ;;  %v3660_v50 = vadd.f32 %v6462_v13, %v6458_v38  ;;  %v7392_v30 = vld [vmem:[#allocation32_spill] sm:$0xff] }
 0x203   :  { %v2216_v34 = vadd.f32 %v3595_v35, %v2027_v51  ;;  %v2234_v44 = vadd.f32 %v3601_v54, %v2041_v14  ;;  %v3498_v5 = vadd.f32 %v7393_v18, %v7392_v30 }
 0x204   :  { %v3758_v24 = vpop.f32.mrf.mxu1  ;;  %v3709_v58 = vpop.f32.mrf.mxu0  ;;  %v1758_v10 = vadd.f32 %v3495_v4, %v6378_v12 }
 0x205   :  { %v2389_v33 = vadd.f32 %v3651_v26, %v2216_v34  ;;  %v3710_v43 = vadd.f32 %v3709_v58, %v3708_v59  ;;  %v2048_v59 = vadd.f32 %v3548_v3, %v1743_v16  ;;  %v2411_v21 = vadd.f32 %v3657_v45, %v2234_v44  ;;  %v7395_v26 = vld [vmem:[#allocation18_spill] sm:$0xff]  ;;  %v7407_v45 = vld [vmem:[#allocation43_spill] sm:$0xff] }
 0x206   :  { %v3759_v7 = vpop.f32.mrf.mxu1  ;;  %v3711_v1 = vpop.f32.mrf.mxu0  ;;  %v3607_v11 = vadd.f32 %v7395_v26, %v7394_v28  ;;  %v2055_v34 = vadd.f32 %v3551_v23, %v1758_v10  ;;  %v3669_v10 = vadd.f32 %v6486_v19, %v6481_v56 }
 0x207   :  { %v3760_v32 = vadd.f32 %v3759_v7, %v3758_v24  ;;  %v2630_v47 = vadd.f32 %v3707_v6, %v2389_v33  ;;  %v2637_v48 = vadd.f32 %v3710_v43, %v2400_v31  ;;  %v2243_v24 = vadd.f32 %v3604_v46, %v2048_v59  ;;  %v7397_v7 = vld [vmem:[#allocation66_spill] sm:$0xff]  ;;  %v7402_v33 = vld [vmem:[#allocation60_spill] sm:$0xff] }
 0x208   :  { %v3761_v8 = vpop.f32.mrf.mxu1  ;;  %v3712_v60 = vpop.f32.mrf.mxu0  ;;  %v7399_v6 = vld [vmem:[#allocation22_spill] sm:$0xff]  ;;  %v3501_v27 = vadd.f32 %v7402_v33, %v7401_v39 }
 0x209   :  { %v2776_v52 = vadd.f32 %v3760_v32, %v2623_v15  ;;  %v3713_v20 = vadd.f32 %v3712_v60, %v3711_v1  ;;  %v3554_v1 = vadd.f32 %v7397_v7, %v7396_v0  ;;  %v2422_v12 = vadd.f32 %v3660_v50, %v2243_v24  ;;  %v7398_v15 = vld [vmem:[#allocation27_spill] sm:$0xff]  ;;  %v7409_v46 = vld [vmem:[#allocation10_spill] sm:$0xff] }
 0x20a   :  { %v3762_v9 = vpop.f32.mrf.mxu1  ;;  %v3714_v29 = vpop.f32.mrf.mxu0  ;;  %v3663_v32 = vadd.f32 %v7399_v6, %v7398_v15 }
 0x20b   :  { %2828 = vst [vmem:[#allocation5] sm:$0xff] %v2776_v52  ;;  %v3763_v63 = vadd.f32 %v3762_v9, %v3761_v8  ;;  %v2644_v2 = vadd.f32 %v3713_v20, %v2411_v21  ;;  %v7400_v8 = vld [vmem:[#allocation30_spill] sm:$0xff]  ;;  %v7403_v52 = vld [vmem:[#allocation35_spill] sm:$0xff]  ;;  %v2252_v9 = vadd.f32 %v3607_v11, %v2055_v34  ;;  %v7410_v20 = vld [vmem:[#allocation45_spill] sm:$0xff] }
 0x20c   :  { %v3764_v17 = vpop.f32.mrf.mxu1  ;;  %v3715_v25 = vpop.f32.mrf.mxu0  ;;  %v1773_v60 = vadd.f32 %v3498_v5, %v7400_v8  ;;  %v3610_v36 = vadd.f32 %v7404_v55, %v7403_v52 }
 0x20d   :  { %v2783_v37 = vadd.f32 %v3763_v63, %v2630_v47  ;;  %v3716_v42 = vadd.f32 %v3715_v25, %v3714_v29  ;;  %v7406_v25 = vld [vmem:[#allocation19_spill] sm:$0xff]  ;;  %v2433_v31 = vadd.f32 %v3663_v32, %v2252_v9 }
 0x20e   :  { %v3765_v53 = vpop.f32.mrf.mxu1  ;;  %v3717_v61 = vpop.f32.mrf.mxu0  ;;  %v2062_v43 = vadd.f32 %v3554_v1, %v1773_v60 }
 0x20f   :  { %2829 = vst [vmem:[#allocation5 + $0x8] sm:$0xff] %v2783_v37  ;;  %v3766_v49 = vadd.f32 %v3765_v53, %v3764_v17  ;;  %v2651_v29 = vadd.f32 %v3716_v42, %v2422_v12  ;;  %v7405_v17 = vld [vmem:[#allocation33_spill] sm:$0xff]  ;;  %v7408_v37 = vld [vmem:[#allocation8_spill] sm:$0xff]  ;;  %v1788_v53 = vadd.f32 %v3501_v27, %v7409_v46 }
 0x210   :  { %v3767_v41 = vpop.f32.mrf.mxu1  ;;  %v3718_v35 = vpop.f32.mrf.mxu0  ;;  %v3557_v14 = vadd.f32 %v7406_v25, %v7405_v17  ;;  %v3666_v16 = vadd.f32 %v7408_v37, %v7407_v45  ;;  %v2261_v44 = vadd.f32 %v3610_v36, %v2062_v43 }
 0x211   :  { %v2790_v40 = vadd.f32 %v3766_v49, %v2637_v48  ;;  %v3719_v54 = vadd.f32 %v3718_v35, %v3717_v61  ;;  %v7411_v49 = vld [vmem:[#allocation46_spill] sm:$0xff] }
 0x212   :  { %v3768_v58 = vpop.f32.mrf.mxu1  ;;  %v3720_v51 = vpop.f32.mrf.mxu0  ;;  %v3613_v61 = vadd.f32 %v7411_v49, %v7410_v20  ;;  %v2069_v50 = vadd.f32 %v3557_v14, %v1788_v53 }
 0x213   :  { %2830 = vst [vmem:[#allocation5 + $0x10] sm:$0xff] %v2790_v40  ;;  %v3769_v57 = vadd.f32 %v3768_v58, %v3767_v41  ;;  %v2658_v59 = vadd.f32 %v3719_v54, %v2433_v31  ;;  %v2444_v40 = vadd.f32 %v3666_v16, %v2261_v44 }
 0x214   :  { %v3770_v38 = vpop.f32.mrf.mxu1  ;;  %v3721_v13 = vpop.f32.mrf.mxu0  ;;  %v2270_v5 = vadd.f32 %v3613_v61, %v2069_v50 }
 0x215   :  { %v2797_v62 = vadd.f32 %v3769_v57, %v2644_v2  ;;  %v3722_v41 = vadd.f32 %v3721_v13, %v3720_v51 }
 0x216   :  { %v3771_v22 = vpop.f32.mrf.mxu1  ;;  %v3723_v63 = vpop.f32.mrf.mxu0  ;;  %v2455_v11 = vadd.f32 %v3669_v10, %v2270_v5 }
 0x217   :  { %2831 = vst [vmem:[#allocation5 + $0x18] sm:$0xff] %v2797_v62  ;;  %v3772_v47 = vadd.f32 %v3771_v22, %v3770_v38  ;;  %v2665_v24 = vadd.f32 %v3722_v41, %v2444_v40 }
 0x218   :  { %v3773_v3 = vpop.f32.mrf.mxu1  ;;  %v3724_v23 = vpop.f32.mrf.mxu0 }
 0x219   :  { %v2804_v4 = vadd.f32 %v3772_v47, %v2651_v29  ;;  %v3725_v58 = vadd.f32 %v3724_v23, %v3723_v63 }
 0x21a   :  { %v3774_v48 = vpop.f32.mrf.mxu1 }
 0x21b   :  { %2832 = vst [vmem:[#allocation5 + $0x20] sm:$0xff] %v2804_v4  ;;  %v3775_v35 = vadd.f32 %v3774_v48, %v3773_v3  ;;  %v2672_v42 = vadd.f32 %v3725_v58, %v2455_v11 }
 0x21c   :  { %v3776_v21 = vpop.f32.mrf.mxu1 }
 0x21d   :  { %v2811_v30 = vadd.f32 %v3775_v35, %v2658_v59 }
 0x21e   :  { %v3777_v18 = vpop.f32.mrf.mxu1 }
 0x21f   :  { %2833 = vst [vmem:[#allocation5 + $0x28] sm:$0xff] %v2811_v30  ;;  %v3778_v28 = vadd.f32 %v3777_v18, %v3776_v21 }
 0x220   :  { %v3779_v26 = vpop.f32.mrf.mxu1 }
 0x221   :  { %v2818_v2 = vadd.f32 %v3778_v28, %v2665_v24 }
 0x222   :  { %v3780_v51 = vpop.f32.mrf.mxu1 }
 0x223   :  { %2834 = vst [vmem:[#allocation5 + $0x30] sm:$0xff] %v2818_v2  ;;  %v3781_v57 = vadd.f32 %v3780_v51, %v3779_v26 }
 0x225   :  { %v2825_v0 = vadd.f32 %v3781_v57, %v2672_v42 }
 0x227   :  { %2835 = vst [vmem:[#allocation5 + $0x38] sm:$0xff] %v2825_v0 }
 0x228   :  { %3822 = shalt.err (!%p3819_p9)
}
 0x229   :  { %s3841_s21 = smov 128   ;;  %s3842_s22 = smov 8  }
 0x22a   :  { %2847 = dma.vmem_to_hbm [thread:$0]  %s2842_s19, 1024, %s6542_s2, [#allocation4], %s3841_s21, %s3841_s21, %s3842_s22  }
 0x22b   :  { %3833 = dma.done.wait [#allocation4], 1024  }
 0x22c   :  { %3834 = vsyncadd [#allocation4], 4294966272 }
 0x22d   :  { %2851 = vsyncpa [#allocation3], 1 }
 0x22e   :  { %2852 = vsyncpa [#allocation4], 1 }

</bundles_post_ra>
